<compile_context>
chip_gen: v5e
topology: v5e:2x2
jax: 0.10.0
libtpu: 0.0.40
codegen_flags: <defaults>
</compile_context>

<pallas_src>
import functools

import jax
import jax.numpy as jnp
from jax.experimental import pallas as pl
from jax.experimental.pallas import tpu as pltpu


def _encoder_kernel(xq_ref, k_ref, v_ref, wq_ref, wout_ref, vec_ref,
                    wff1_ref, wff2_ref,
                    o_ref,
                    q_sc, m_sc, l_sc, acc_sc,
                    *, heads, dim_head, eps, tile, n_real, mask_keys,
                    exp_in_bf16):
    """One (batch, q-tile, kv-tile) grid step.

    Block shapes (channel-on-sublane, token-on-lane):
      xq_ref / o_ref : (1, C, Tq)  f32   query + residual stream / output
      k_ref / v_ref  : (1, C, Tk)  bf16  pre-projected K / V for this kv tile
      wq / wout      : (C, C)      bf16
      wff1 : (4C, C)   wff2 : (C, 4C)    bf16
      vec_ref        : (C, 8)      f32   [b_out, ln1_g, ln1_b, ln2_g, ln2_b, 0..]
    Scratch (token-on-lane, 128-lane dense):
      q_sc  : (h, d, Tq) bf16   pre-scaled Q for the current q tile
      m_sc  : (h, 1, Tq) f32    online-softmax running max
      l_sc  : (h, 1, Tq) f32    online-softmax running sum
      acc_sc: (h, d, Tq) f32    un-normalized attention output
    """
    ki = pl.program_id(2)
    nk = pl.num_programs(2)
    C = heads * dim_head

    # ---- init once per (batch, q-tile): project Q, reset softmax state ----
    @pl.when(ki == 0)
    def _init():
        xq = xq_ref[0].astype(jnp.bfloat16)                                # (C, Tq)
        q = jnp.dot(wq_ref[...], xq, preferred_element_type=jnp.float32)   # (C, Tq)
        q = q * (dim_head ** -0.5)            # fold softmax scale into Q (O(C*T))
        q_sc[...] = q.reshape(heads, dim_head, tile).astype(jnp.bfloat16)
        m_sc[...] = jnp.full(m_sc.shape, -jnp.inf, jnp.float32)
        l_sc[...] = jnp.zeros(l_sc.shape, jnp.float32)
        acc_sc[...] = jnp.zeros(acc_sc.shape, jnp.float32)

    # ---- one KV tile: online softmax, batched over heads, token-on-lane ----
    k = k_ref[0].reshape(heads, dim_head, tile)        # bf16 (h, d, Tk), free split
    v = v_ref[0].reshape(heads, dim_head, tile)        # bf16 (h, d, Tk)

    # scores (h, Tk, Tq): contract d, batch over heads; queries stay on lanes.
    s = jnp.einsum("hdk,hdq->hkq", k, q_sc[...],
                   preferred_element_type=jnp.float32)

    if mask_keys:
        # Zero-padded key tokens (absolute index >= n_real) must get no weight.
        key_idx = jax.lax.broadcasted_iota(jnp.int32, (1, tile, 1), 1) + ki * tile
        s = jnp.where(key_idx < n_real, s, -jnp.inf)

    m_prev = m_sc[...]                                                      # (h,1,Tq)
    m_new = jnp.maximum(m_prev, jnp.max(s, axis=1, keepdims=True))
    alpha = jnp.exp(m_prev - m_new)
    if exp_in_bf16:
        # v6e/v7x only: at small dim_head the EUP (exp) saturates before the
        # MXU; bf16 exp ~doubles EUP throughput.  Keep m/l accumulation in f32.
        p_mx = jnp.exp((s - m_new).astype(jnp.bfloat16))                    # (h,Tk,Tq)
        p_f32 = p_mx.astype(jnp.float32)
    else:
        p_f32 = jnp.exp(s - m_new)
        p_mx = p_f32.astype(jnp.bfloat16)
    l_sc[...] = alpha * l_sc[...] + jnp.sum(p_f32, axis=1, keepdims=True)
    pv = jnp.einsum("hdk,hkq->hdq", v, p_mx,
                    preferred_element_type=jnp.float32)                     # (h,d,Tq)
    acc_sc[...] = alpha * acc_sc[...] + pv
    m_sc[...] = m_new

    # ---- epilogue once per (batch, q-tile): out-proj + LN1 + FFN + LN2 ----
    @pl.when(ki == nk - 1)
    def _finalize():
        xq = xq_ref[0].astype(jnp.float32)                                  # (C, Tq)
        vec = vec_ref[...]                                                  # (C, 8)
        bout, g1, b1 = vec[:, 0:1], vec[:, 1:2], vec[:, 2:3]
        g2, b2 = vec[:, 3:4], vec[:, 4:5]

        # Softmax normalization: runs once per q tile -> exact reciprocal for
        # tighter parity with the PyTorch reference (approx=True is also fine).
        attn = acc_sc[...] * pl.reciprocal(l_sc[...], approx=False)         # (h,d,Tq)
        attn_cn = attn.reshape(C, tile)          # free flatten, no transpose

        attn_out = jnp.dot(wout_ref[...], attn_cn.astype(jnp.bfloat16),
                           preferred_element_type=jnp.float32) + bout

        # residual + LayerNorm 1 (reduce over channels = sublane axis, f32)
        h1 = xq + attn_out
        mu1 = jnp.mean(h1, axis=0, keepdims=True)
        var1 = jnp.mean((h1 - mu1) ** 2, axis=0, keepdims=True)
        a_norm = (h1 - mu1) * jax.lax.rsqrt(var1 + eps) * g1 + b1

        # FFN: Linear(C->4C, no bias) -> ReLU6 -> Linear(4C->C, no bias) -> ReLU6
        f1 = jnp.dot(wff1_ref[...], a_norm.astype(jnp.bfloat16),
                     preferred_element_type=jnp.float32)
        f1 = jnp.clip(f1, 0.0, 6.0)
        f2 = jnp.dot(wff2_ref[...], f1.astype(jnp.bfloat16),
                     preferred_element_type=jnp.float32)
        f2 = jnp.clip(f2, 0.0, 6.0)

        # residual + LayerNorm 2
        h2 = a_norm + f2
        mu2 = jnp.mean(h2, axis=0, keepdims=True)
        var2 = jnp.mean((h2 - mu2) ** 2, axis=0, keepdims=True)
        out = (h2 - mu2) * jax.lax.rsqrt(var2 + eps) * g2 + b2
        o_ref[0] = out.astype(o_ref.dtype)


def prepare_params(params, *, heads, dim_head, mxu_dtype=jnp.bfloat16):
    """Convert PyTorch-layout params into what the kernel/wrapper expect.

    Incoming layout mirrors nn.Linear / nn.LayerNorm:
      w_qkv (3C, C), w_out (C, C), b_out (C,), w_ff1 (4C, C), w_ff2 (C, 4C),
      ln*_g / ln*_b (C,).
    The kernel gets bf16 matmul weights plus a single packed (C, 8) f32 vector
    block; wk/wv (bf16) are used by the wrapper-side K/V pre-projection.
    """
    C = heads * dim_head
    wq, wk, wv = jnp.split(params["w_qkv"], 3, axis=0)
    # Pack the five per-channel vectors into one (C, 8) f32 input:
    # columns = [b_out, ln1_g, ln1_b, ln2_g, ln2_b, 0, 0, 0].
    vec = jnp.stack([params["b_out"], params["ln1_g"], params["ln1_b"],
                     params["ln2_g"], params["ln2_b"]],
                    axis=1).astype(jnp.float32)
    vec = jnp.pad(vec, ((0, 0), (0, 3)))
    return {
        "wq": wq.astype(mxu_dtype),
        "wk": wk.astype(mxu_dtype),     # used by the wrapper K projection
        "wv": wv.astype(mxu_dtype),     # used by the wrapper V projection
        "wout": params["w_out"].astype(mxu_dtype),
        "wff1": params["w_ff1"].astype(mxu_dtype),
        "wff2": params["w_ff2"].astype(mxu_dtype),
        "vec": vec,
    }


def transformer_encoder_3d(x_ncdhw, kparams, *, heads, dim_head, eps=1e-6,
                           seq_tile=128, vmem_limit_bytes=48 * 1024 * 1024,
                           exp_in_bf16=False, single_buffer_weights=True):
    """x_ncdhw: (B, C, Z, H, W) with C == heads*dim_head; kparams from prepare_params.

    VMEM budget (per core) ~ weights (12*C^2 bytes bf16, single-buffered)
      + 2x (xq f32 + K/V bf16 + out f32) tiles (~16*C*tile bytes)
      + q/m/l/acc scratch (~6*C*tile bytes) + per-step (h, tile, tile) scores.
    v5e/v6e: sweep seq_tile 256-512 and vmem_limit up to ~96 MiB.
    v7x: keep vmem_limit <= ~48 MiB, seq_tile 128-256, and B*(N/tile) >= 2.
    """
    B, C, Z, H, W = x_ncdhw.shape
    assert C == heads * dim_head
    N = Z * H * W

    # Channel-on-sublane / token-on-lane: pure reshape, no HBM transpose.
    x_cn = x_ncdhw.reshape(B, C, N)

    # Lane-dense token tile (multiple of 128).  N is zero-padded up to a
    # multiple of the tile; padded keys are masked in-kernel, padded query
    # columns are sliced off after the call.  Keeps VMEM bounded for any N.
    tile = max(128, (min(seq_tile, max(N, 128)) // 128) * 128)
    n_pad = pl.cdiv(N, tile) * tile
    if n_pad != N:
        x_cn = jnp.pad(x_cn, ((0, 0), (0, 0), (0, n_pad - N)))
    nq = nk = n_pad // tile

    # Pre-project K and V once per sequence (plain XLA matmuls, bf16 MXU
    # operands / f32 accumulate) instead of re-projecting them nq times inside
    # the kernel; they are streamed per kv tile as bf16 (half the bytes of the
    # old f32 xkv stream).
    x_bf = x_cn.astype(jnp.bfloat16)
    k_cn = jnp.einsum("oc,bcn->bon", kparams["wk"], x_bf,
                      preferred_element_type=jnp.float32).astype(jnp.bfloat16)
    v_cn = jnp.einsum("oc,bcn->bon", kparams["wv"], x_bf,
                      preferred_element_type=jnp.float32).astype(jnp.bfloat16)

    kernel = functools.partial(
        _encoder_kernel, heads=heads, dim_head=dim_head, eps=eps, tile=tile,
        n_real=N, mask_keys=(n_pad != N), exp_in_bf16=exp_in_bf16)

    def wspec(shape):
        # Constant block index -> weights stay resident across the whole grid;
        # single-buffer them so they don't pay 2x VMEM for double buffering.
        kwargs = {}
        if single_buffer_weights and hasattr(pl, "Buffered"):
            kwargs["pipeline_mode"] = pl.Buffered(1)
        return pl.BlockSpec(shape, lambda b, qi, ki: (0, 0), **kwargs)

    out_cn = pl.pallas_call(
        kernel,
        out_shape=jax.ShapeDtypeStruct((B, C, n_pad), x_ncdhw.dtype),
        grid_spec=pltpu.PrefetchScalarGridSpec(
            num_scalar_prefetch=0,
            grid=(B, nq, nk),
            in_specs=[
                pl.BlockSpec((1, C, tile), lambda b, qi, ki: (b, 0, qi)),  # x (Q + residual)
                pl.BlockSpec((1, C, tile), lambda b, qi, ki: (b, 0, ki)),  # K (bf16)
                pl.BlockSpec((1, C, tile), lambda b, qi, ki: (b, 0, ki)),  # V (bf16)
                wspec((C, C)),        # wq
                wspec((C, C)),        # w_out
                wspec((C, 8)),        # packed [b_out, ln1_g, ln1_b, ln2_g, ln2_b]
                wspec((4 * C, C)),    # w_ff1
                wspec((C, 4 * C)),    # w_ff2
            ],
            out_specs=pl.BlockSpec((1, C, tile), lambda b, qi, ki: (b, 0, qi)),
            scratch_shapes=[
                pltpu.VMEM((heads, dim_head, tile), jnp.bfloat16),  # q (pre-scaled)
                pltpu.VMEM((heads, 1, tile), jnp.float32),          # m (running max)
                pltpu.VMEM((heads, 1, tile), jnp.float32),          # l (running sum)
                pltpu.VMEM((heads, dim_head, tile), jnp.float32),   # acc
            ],
        ),
        compiler_params=pltpu.CompilerParams(
            dimension_semantics=("parallel", "parallel", "arbitrary"),
            vmem_limit_bytes=vmem_limit_bytes),
    )(x_cn, k_cn, v_cn,
      kparams["wq"], kparams["wout"], kparams["vec"],
      kparams["wff1"], kparams["wff2"])

    if n_pad != N:
        out_cn = out_cn[:, :, :N]
    # Pure reshape back to NCDHW (inverse of the input reshape).
    return out_cn.reshape(B, C, Z, H, W)


def _reference(x_ncdhw, params, *, heads, dim_head, eps=1e-6):
    """Pure-JAX f32 reference mirroring the PyTorch forward (PyTorch weight layout)."""
    B, C, Z, H, W = x_ncdhw.shape
    N = Z * H * W
    x = jnp.transpose(x_ncdhw.reshape(B, C, N), (0, 2, 1)).astype(jnp.float32)  # (B, N, C)

    qkv = x @ params["w_qkv"].T
    q, k, v = jnp.split(qkv, 3, axis=-1)

    def split_heads(t):
        return jnp.transpose(t.reshape(B, N, heads, dim_head), (0, 2, 1, 3))

    q, k, v = map(split_heads, (q, k, v))
    dots = jnp.einsum("bhnd,bhmd->bhnm", q, k) * dim_head ** (-0.5)
    attn = jax.nn.softmax(dots, axis=-1)
    o = jnp.einsum("bhnm,bhmd->bhnd", attn, v)
    o = jnp.transpose(o, (0, 2, 1, 3)).reshape(B, N, C)
    o = o @ params["w_out"].T + params["b_out"]

    def ln(t, g, b):
        mu = jnp.mean(t, -1, keepdims=True)
        var = jnp.mean((t - mu) ** 2, -1, keepdims=True)
        return (t - mu) * jax.lax.rsqrt(var + eps) * g + b

    a = ln(x + o, params["ln1_g"], params["ln1_b"])
    f = jnp.clip(a @ params["w_ff1"].T, 0.0, 6.0)
    f = jnp.clip(f @ params["w_ff2"].T, 0.0, 6.0)
    out = ln(a + f, params["ln2_g"], params["ln2_b"])
    return jnp.transpose(out, (0, 2, 1)).reshape(B, C, Z, H, W)


if __name__ == "__main__":
    # Small config: heads=2, dim_head=16 -> C=32.
    heads, dim_head = 2, 16
    C = heads * dim_head

    key = jax.random.PRNGKey(0)
    ks = jax.random.split(key, 11)

    # Deterministic synthetic parameters in PyTorch nn.Linear layout (out, in).
    params = {
        "w_qkv": jax.random.normal(ks[0], (3 * C, C), jnp.float32) * 0.05,
        "w_out": jax.random.normal(ks[1], (C, C), jnp.float32) * 0.05,
        "b_out": jax.random.normal(ks[2], (C,), jnp.float32) * 0.01,
        "ln1_g": 1.0 + 0.1 * jax.random.normal(ks[3], (C,), jnp.float32),
        "ln1_b": 0.05 * jax.random.normal(ks[4], (C,), jnp.float32),
        "w_ff1": jax.random.normal(ks[5], (4 * C, C), jnp.float32) * 0.05,
        "w_ff2": jax.random.normal(ks[6], (C, 4 * C), jnp.float32) * 0.05,
        "ln2_g": 1.0 + 0.1 * jax.random.normal(ks[7], (C,), jnp.float32),
        "ln2_b": 0.05 * jax.random.normal(ks[8], (C,), jnp.float32),
    }
    kparams = prepare_params(params, heads=heads, dim_head=dim_head)

    # Test 1: volume 4x8x8 -> N=256 -> two 128-token q/kv tiles (exercises the
    # online softmax across kv tiles); B*nq = 4 keeps both v7x TCs busy.
    x1 = jax.random.normal(ks[9], (2, C, 4, 8, 8), jnp.float32)
    single_buf = True
    try:
        out1 = jax.block_until_ready(
            transformer_encoder_3d(x1, kparams, heads=heads, dim_head=dim_head,
                                   single_buffer_weights=True))
    except Exception:
        # Some jax builds may reject pl.Buffered(1) on pallas_call BlockSpecs;
        # fall back to default double-buffered resident weights.
        single_buf = False
        out1 = jax.block_until_ready(
            transformer_encoder_3d(x1, kparams, heads=heads, dim_head=dim_head,
                                   single_buffer_weights=False))
    ref1 = _reference(x1, params, heads=heads, dim_head=dim_head)
    assert out1.shape == x1.shape
    err1 = float(jnp.max(jnp.abs(out1 - ref1)))
    assert err1 < 3e-2, f"test1 mismatch vs reference: max abs err {err1}"

    # Test 2: odd volume 3x5x7 -> N=105, padded to one 128-token tile with
    # in-kernel key masking; also exercises the bf16-exp (v6e/v7x) path.
    x2 = jax.random.normal(ks[10], (2, C, 3, 5, 7), jnp.float32)
    try:
        out2 = jax.block_until_ready(
            transformer_encoder_3d(x2, kparams, heads=heads, dim_head=dim_head,
                                   exp_in_bf16=True,
                                   single_buffer_weights=single_buf))
    except Exception:
        # v5e has no bf16 EUP; if the build rejects bf16 exp, rerun in f32.
        out2 = jax.block_until_ready(
            transformer_encoder_3d(x2, kparams, heads=heads, dim_head=dim_head,
                                   exp_in_bf16=False,
                                   single_buffer_weights=single_buf))
    ref2 = _reference(x2, params, heads=heads, dim_head=dim_head)
    assert out2.shape == x2.shape
    err2 = float(jnp.max(jnp.abs(out2 - ref2)))
    assert err2 < 3e-2, f"test2 mismatch vs reference: max abs err {err2}"

    print("KERNEL_OK")
</pallas_src>

<mosaic_0001>
module attributes {stable_mosaic.version = 11 : i64} {
  func.func @_encoder_kernel(%arg0: i32, %arg1: i32, %arg2: i32, %arg3: memref<1x32x128xf32, #tpu.memory_space<vmem>>, %arg4: memref<1x32x128xbf16, #tpu.memory_space<vmem>>, %arg5: memref<1x32x128xbf16, #tpu.memory_space<vmem>>, %arg6: memref<32x32xbf16, #tpu.memory_space<vmem>>, %arg7: memref<32x32xbf16, #tpu.memory_space<vmem>>, %arg8: memref<32x8xf32, #tpu.memory_space<vmem>>, %arg9: memref<128x32xbf16, #tpu.memory_space<vmem>>, %arg10: memref<32x128xbf16, #tpu.memory_space<vmem>>, %arg11: memref<1x32x128xf32, #tpu.memory_space<vmem>>, %arg12: memref<2x16x128xbf16, #tpu.memory_space<vmem>>, %arg13: memref<2x1x128xf32, #tpu.memory_space<vmem>>, %arg14: memref<2x1x128xf32, #tpu.memory_space<vmem>>, %arg15: memref<2x16x128xf32, #tpu.memory_space<vmem>>) attributes {dimension_semantics = [#tpu.dimension_semantics<parallel>, #tpu.dimension_semantics<parallel>, #tpu.dimension_semantics<arbitrary>], iteration_bounds = array<i64: 2, 2, 2>, scalar_prefetch = 0 : i64, scratch_operands = 4 : i64, tpu.core_type = #tpu.core_type<tc>, window_params = [{transform_indices = @transform_0, window_bounds = array<i64: 1, 32, 128>}, {transform_indices = @transform_1, window_bounds = array<i64: 1, 32, 128>}, {transform_indices = @transform_2, window_bounds = array<i64: 1, 32, 128>}, {pipeline_mode = #tpu.pipeline_mode<synchronous>, transform_indices = @transform_3, window_bounds = array<i64: 32, 32>}, {pipeline_mode = #tpu.pipeline_mode<synchronous>, transform_indices = @transform_4, window_bounds = array<i64: 32, 32>}, {pipeline_mode = #tpu.pipeline_mode<synchronous>, transform_indices = @transform_5, window_bounds = array<i64: 32, 8>}, {pipeline_mode = #tpu.pipeline_mode<synchronous>, transform_indices = @transform_6, window_bounds = array<i64: 128, 32>}, {pipeline_mode = #tpu.pipeline_mode<synchronous>, transform_indices = @transform_7, window_bounds = array<i64: 32, 128>}, {transform_indices = @transform_8, window_bounds = array<i64: 1, 32, 128>}]} {
    %c0_i32 = arith.constant 0 : i32
    %0 = arith.cmpi eq, %arg2, %c0_i32 : i32
    %1 = arith.extui %0 : i1 to i32
    %c0_i32_0 = arith.constant 0 : i32
    %2 = arith.cmpi ne, %1, %c0_i32_0 : i32
    scf.if %2 {
      %c0_31 = arith.constant 0 : index
      %c0_32 = arith.constant 0 : index
      %c0_33 = arith.constant 0 : index
      %37 = vector.load %arg3[%c0_31, %c0_32, %c0_33] : memref<1x32x128xf32, #tpu.memory_space<vmem>>, vector<1x32x128xf32>
      %38 = vector.shape_cast %37 : vector<1x32x128xf32> to vector<32x128xf32>
      %39 = arith.truncf %38 : vector<32x128xf32> to vector<32x128xbf16>
      %c0_34 = arith.constant 0 : index
      %c0_35 = arith.constant 0 : index
      %40 = vector.load %arg6[%c0_34, %c0_35] : memref<32x32xbf16, #tpu.memory_space<vmem>>, vector<32x32xbf16>
      %cst_36 = arith.constant dense<0.000000e+00> : vector<32x128xf32>
      %41 = tpu.matmul %40, %39, %cst_36 {dimension_numbers = #tpu.dot_dimension_numbers<[1], [0], [0], [1], [0, 0, 1, 1], [], []>} : vector<32x32xbf16>, vector<32x128xbf16>, vector<32x128xf32> -> vector<32x128xf32>
      %cst_37 = arith.constant 2.500000e-01 : f32
      %42 = vector.broadcast %cst_37 : f32 to vector<32x128xf32>
      %43 = arith.mulf %41, %42 : vector<32x128xf32>
      %44 = vector.shape_cast %43 : vector<32x128xf32> to vector<2x16x128xf32>
      %45 = arith.truncf %44 : vector<2x16x128xf32> to vector<2x16x128xbf16>
      %c0_38 = arith.constant 0 : index
      %c0_39 = arith.constant 0 : index
      %c0_40 = arith.constant 0 : index
      %46 = vector.load %arg12[%c0_38, %c0_39, %c0_40] : memref<2x16x128xbf16, #tpu.memory_space<vmem>>, vector<2x16x128xbf16>
      tpu.vector_store %arg12[%c0_38, %c0_39, %c0_40], %45 {strides = array<i32>} : memref<2x16x128xbf16, #tpu.memory_space<vmem>>, vector<2x16x128xbf16>,
      %cst_41 = arith.constant 0xFF800000 : f32
      %47 = vector.broadcast %cst_41 : f32 to vector<2x1x128xf32>
      %c0_42 = arith.constant 0 : index
      %c0_43 = arith.constant 0 : index
      %c0_44 = arith.constant 0 : index
      %48 = vector.load %arg13[%c0_42, %c0_43, %c0_44] : memref<2x1x128xf32, #tpu.memory_space<vmem>>, vector<2x1x128xf32>
      tpu.vector_store %arg13[%c0_42, %c0_43, %c0_44], %47 {strides = array<i32>} : memref<2x1x128xf32, #tpu.memory_space<vmem>>, vector<2x1x128xf32>,
      %cst_45 = arith.constant 0.000000e+00 : f32
      %49 = vector.broadcast %cst_45 : f32 to vector<2x1x128xf32>
      %c0_46 = arith.constant 0 : index
      %c0_47 = arith.constant 0 : index
      %c0_48 = arith.constant 0 : index
      %50 = vector.load %arg14[%c0_46, %c0_47, %c0_48] : memref<2x1x128xf32, #tpu.memory_space<vmem>>, vector<2x1x128xf32>
      tpu.vector_store %arg14[%c0_46, %c0_47, %c0_48], %49 {strides = array<i32>} : memref<2x1x128xf32, #tpu.memory_space<vmem>>, vector<2x1x128xf32>,
      %cst_49 = arith.constant 0.000000e+00 : f32
      %51 = vector.broadcast %cst_49 : f32 to vector<2x16x128xf32>
      %c0_50 = arith.constant 0 : index
      %c0_51 = arith.constant 0 : index
      %c0_52 = arith.constant 0 : index
      %52 = vector.load %arg15[%c0_50, %c0_51, %c0_52] : memref<2x16x128xf32, #tpu.memory_space<vmem>>, vector<2x16x128xf32>
      tpu.vector_store %arg15[%c0_50, %c0_51, %c0_52], %51 {strides = array<i32>} : memref<2x16x128xf32, #tpu.memory_space<vmem>>, vector<2x16x128xf32>,
    } else {
    }
    %c0 = arith.constant 0 : index
    %c0_1 = arith.constant 0 : index
    %c0_2 = arith.constant 0 : index
    %3 = vector.load %arg4[%c0, %c0_1, %c0_2] : memref<1x32x128xbf16, #tpu.memory_space<vmem>>, vector<1x32x128xbf16>
    %4 = vector.shape_cast %3 : vector<1x32x128xbf16> to vector<32x128xbf16>
    %5 = vector.shape_cast %4 : vector<32x128xbf16> to vector<2x16x128xbf16>
    %c0_3 = arith.constant 0 : index
    %c0_4 = arith.constant 0 : index
    %c0_5 = arith.constant 0 : index
    %6 = vector.load %arg5[%c0_3, %c0_4, %c0_5] : memref<1x32x128xbf16, #tpu.memory_space<vmem>>, vector<1x32x128xbf16>
    %7 = vector.shape_cast %6 : vector<1x32x128xbf16> to vector<32x128xbf16>
    %8 = vector.shape_cast %7 : vector<32x128xbf16> to vector<2x16x128xbf16>
    %c0_6 = arith.constant 0 : index
    %c0_7 = arith.constant 0 : index
    %c0_8 = arith.constant 0 : index
    %9 = vector.load %arg12[%c0_6, %c0_7, %c0_8] : memref<2x16x128xbf16, #tpu.memory_space<vmem>>, vector<2x16x128xbf16>
    "tpu.trace_start"() <{level = 10 : i32, message = "hdk,hdq->hkq"}> : () -> ()
    %cst = arith.constant dense<0.000000e+00> : vector<2x128x128xf32>
    %10 = tpu.matmul %5, %9, %cst {dimension_numbers = #tpu.dot_dimension_numbers<[1], [1], [2], [2], [0, 0, 0, 2, 1, 2], [0], [0]>} : vector<2x16x128xbf16>, vector<2x16x128xbf16>, vector<2x128x128xf32> -> vector<2x128x128xf32>
    "tpu.trace_stop"() : () -> ()
    %c0_9 = arith.constant 0 : index
    %c0_10 = arith.constant 0 : index
    %c0_11 = arith.constant 0 : index
    %11 = vector.load %arg13[%c0_9, %c0_10, %c0_11] : memref<2x1x128xf32, #tpu.memory_space<vmem>>, vector<2x1x128xf32>
    %cst_12 = arith.constant dense<0xFF800000> : vector<2x128xf32>
    %12 = vector.multi_reduction <maximumf>, %10, %cst_12 [1] : vector<2x128x128xf32> to vector<2x128xf32>
    %13 = vector.shape_cast %12 : vector<2x128xf32> to vector<2x1x128xf32>
    %14 = arith.maximumf %11, %13 : vector<2x1x128xf32>
    %15 = arith.subf %11, %14 : vector<2x1x128xf32>
    %16 = math.exp %15 : vector<2x1x128xf32>
    %17 = vector.broadcast %14 : vector<2x1x128xf32> to vector<2x128x128xf32>
    %18 = arith.subf %10, %17 : vector<2x128x128xf32>
    %19 = math.exp %18 : vector<2x128x128xf32>
    %20 = arith.truncf %19 : vector<2x128x128xf32> to vector<2x128x128xbf16>
    %c0_13 = arith.constant 0 : index
    %c0_14 = arith.constant 0 : index
    %c0_15 = arith.constant 0 : index
    %21 = vector.load %arg14[%c0_13, %c0_14, %c0_15] : memref<2x1x128xf32, #tpu.memory_space<vmem>>, vector<2x1x128xf32>
    %22 = arith.mulf %16, %21 : vector<2x1x128xf32>
    %cst_16 = arith.constant dense<0.000000e+00> : vector<2x128xf32>
    %23 = vector.multi_reduction <add>, %19, %cst_16 [1] : vector<2x128x128xf32> to vector<2x128xf32>
    %24 = vector.shape_cast %23 : vector<2x128xf32> to vector<2x1x128xf32>
    %25 = arith.addf %22, %24 : vector<2x1x128xf32>
    %c0_17 = arith.constant 0 : index
    %c0_18 = arith.constant 0 : index
    %c0_19 = arith.constant 0 : index
    %26 = vector.load %arg14[%c0_17, %c0_18, %c0_19] : memref<2x1x128xf32, #tpu.memory_space<vmem>>, vector<2x1x128xf32>
    tpu.vector_store %arg14[%c0_17, %c0_18, %c0_19], %25 {strides = array<i32>} : memref<2x1x128xf32, #tpu.memory_space<vmem>>, vector<2x1x128xf32>,
    "tpu.trace_start"() <{level = 10 : i32, message = "hdk,hkq->hdq"}> : () -> ()
    %cst_20 = arith.constant dense<0.000000e+00> : vector<2x16x128xf32>
    %27 = tpu.matmul %8, %20, %cst_20 {dimension_numbers = #tpu.dot_dimension_numbers<[2], [1], [1], [2], [0, 0, 0, 1, 1, 2], [0], [0]>} : vector<2x16x128xbf16>, vector<2x128x128xbf16>, vector<2x16x128xf32> -> vector<2x16x128xf32>
    "tpu.trace_stop"() : () -> ()
    %c0_21 = arith.constant 0 : index
    %c0_22 = arith.constant 0 : index
    %c0_23 = arith.constant 0 : index
    %28 = vector.load %arg15[%c0_21, %c0_22, %c0_23] : memref<2x16x128xf32, #tpu.memory_space<vmem>>, vector<2x16x128xf32>
    %29 = vector.broadcast %16 : vector<2x1x128xf32> to vector<2x16x128xf32>
    %30 = arith.mulf %29, %28 : vector<2x16x128xf32>
    %31 = arith.addf %30, %27 : vector<2x16x128xf32>
    %c0_24 = arith.constant 0 : index
    %c0_25 = arith.constant 0 : index
    %c0_26 = arith.constant 0 : index
    %32 = vector.load %arg15[%c0_24, %c0_25, %c0_26] : memref<2x16x128xf32, #tpu.memory_space<vmem>>, vector<2x16x128xf32>
    tpu.vector_store %arg15[%c0_24, %c0_25, %c0_26], %31 {strides = array<i32>} : memref<2x16x128xf32, #tpu.memory_space<vmem>>, vector<2x16x128xf32>,
    %c0_27 = arith.constant 0 : index
    %c0_28 = arith.constant 0 : index
    %c0_29 = arith.constant 0 : index
    %33 = vector.load %arg13[%c0_27, %c0_28, %c0_29] : memref<2x1x128xf32, #tpu.memory_space<vmem>>, vector<2x1x128xf32>
    tpu.vector_store %arg13[%c0_27, %c0_28, %c0_29], %14 {strides = array<i32>} : memref<2x1x128xf32, #tpu.memory_space<vmem>>, vector<2x1x128xf32>,
    %c1_i32 = arith.constant 1 : i32
    %34 = arith.cmpi eq, %arg2, %c1_i32 : i32
    %35 = arith.extui %34 : i1 to i32
    %c0_i32_30 = arith.constant 0 : i32
    %36 = arith.cmpi ne, %35, %c0_i32_30 : i32
    scf.if %36 {
      %c0_31 = arith.constant 0 : index
      %c0_32 = arith.constant 0 : index
      %c0_33 = arith.constant 0 : index
      %37 = vector.load %arg3[%c0_31, %c0_32, %c0_33] : memref<1x32x128xf32, #tpu.memory_space<vmem>>, vector<1x32x128xf32>
      %38 = vector.shape_cast %37 : vector<1x32x128xf32> to vector<32x128xf32>
      %c0_34 = arith.constant 0 : index
      %c0_35 = arith.constant 0 : index
      %39 = vector.load %arg8[%c0_34, %c0_35] : memref<32x8xf32, #tpu.memory_space<vmem>>, vector<32x8xf32>
      %40 = vector.extract_strided_slice %39 {offsets = [0, 0], sizes = [32, 1], strides = [1, 1]} : vector<32x8xf32> to vector<32x1xf32>
      %41 = vector.extract_strided_slice %39 {offsets = [0, 1], sizes = [32, 1], strides = [1, 1]} : vector<32x8xf32> to vector<32x1xf32>
      %42 = vector.extract_strided_slice %39 {offsets = [0, 2], sizes = [32, 1], strides = [1, 1]} : vector<32x8xf32> to vector<32x1xf32>
      %43 = vector.extract_strided_slice %39 {offsets = [0, 3], sizes = [32, 1], strides = [1, 1]} : vector<32x8xf32> to vector<32x1xf32>
      %44 = vector.extract_strided_slice %39 {offsets = [0, 4], sizes = [32, 1], strides = [1, 1]} : vector<32x8xf32> to vector<32x1xf32>
      %c0_36 = arith.constant 0 : index
      %c0_37 = arith.constant 0 : index
      %c0_38 = arith.constant 0 : index
      %45 = vector.load %arg15[%c0_36, %c0_37, %c0_38] : memref<2x16x128xf32, #tpu.memory_space<vmem>>, vector<2x16x128xf32>
      %c0_39 = arith.constant 0 : index
      %c0_40 = arith.constant 0 : index
      %c0_41 = arith.constant 0 : index
      %46 = vector.load %arg14[%c0_39, %c0_40, %c0_41] : memref<2x1x128xf32, #tpu.memory_space<vmem>>, vector<2x1x128xf32>
      %47 = tpu.reciprocal %46 : vector<2x1x128xf32> -> vector<2x1x128xf32>
      %48 = vector.broadcast %47 : vector<2x1x128xf32> to vector<2x16x128xf32>
      %49 = arith.mulf %45, %48 : vector<2x16x128xf32>
      %50 = vector.shape_cast %49 : vector<2x16x128xf32> to vector<32x128xf32>
      %c0_42 = arith.constant 0 : index
      %c0_43 = arith.constant 0 : index
      %51 = vector.load %arg7[%c0_42, %c0_43] : memref<32x32xbf16, #tpu.memory_space<vmem>>, vector<32x32xbf16>
      %52 = arith.truncf %50 : vector<32x128xf32> to vector<32x128xbf16>
      %cst_44 = arith.constant dense<0.000000e+00> : vector<32x128xf32>
      %53 = tpu.matmul %51, %52, %cst_44 {dimension_numbers = #tpu.dot_dimension_numbers<[1], [0], [0], [1], [0, 0, 1, 1], [], []>} : vector<32x32xbf16>, vector<32x128xbf16>, vector<32x128xf32> -> vector<32x128xf32>
      %54 = vector.broadcast %40 : vector<32x1xf32> to vector<32x128xf32>
      %55 = arith.addf %53, %54 : vector<32x128xf32>
      %56 = arith.addf %38, %55 : vector<32x128xf32>
      %cst_45 = arith.constant dense<0.000000e+00> : vector<128xf32>
      %57 = vector.multi_reduction <add>, %56, %cst_45 [0] : vector<32x128xf32> to vector<128xf32>
      %58 = vector.shape_cast %57 : vector<128xf32> to vector<1x128xf32>
      %cst_46 = arith.constant 3.200000e+01 : f32
      %59 = vector.broadcast %cst_46 : f32 to vector<1x128xf32>
      %60 = arith.divf %58, %59 : vector<1x128xf32>
      %61 = vector.broadcast %60 : vector<1x128xf32> to vector<32x128xf32>
      %62 = arith.subf %56, %61 : vector<32x128xf32>
      %63 = arith.mulf %62, %62 : vector<32x128xf32>
      %cst_47 = arith.constant dense<0.000000e+00> : vector<128xf32>
      %64 = vector.multi_reduction <add>, %63, %cst_47 [0] : vector<32x128xf32> to vector<128xf32>
      %65 = vector.shape_cast %64 : vector<128xf32> to vector<1x128xf32>
      %cst_48 = arith.constant 3.200000e+01 : f32
      %66 = vector.broadcast %cst_48 : f32 to vector<1x128xf32>
      %67 = arith.divf %65, %66 : vector<1x128xf32>
      %68 = vector.broadcast %60 : vector<1x128xf32> to vector<32x128xf32>
      %69 = arith.subf %56, %68 : vector<32x128xf32>
      %cst_49 = arith.constant 9.99999997E-7 : f32
      %70 = vector.broadcast %cst_49 : f32 to vector<1x128xf32>
      %71 = arith.addf %67, %70 : vector<1x128xf32>
      %72 = math.rsqrt %71 : vector<1x128xf32>
      %73 = vector.broadcast %72 : vector<1x128xf32> to vector<32x128xf32>
      %74 = arith.mulf %69, %73 : vector<32x128xf32>
      %75 = vector.broadcast %41 : vector<32x1xf32> to vector<32x128xf32>
      %76 = arith.mulf %74, %75 : vector<32x128xf32>
      %77 = vector.broadcast %42 : vector<32x1xf32> to vector<32x128xf32>
      %78 = arith.addf %76, %77 : vector<32x128xf32>
      %c0_50 = arith.constant 0 : index
      %c0_51 = arith.constant 0 : index
      %79 = vector.load %arg9[%c0_50, %c0_51] : memref<128x32xbf16, #tpu.memory_space<vmem>>, vector<128x32xbf16>
      %80 = arith.truncf %78 : vector<32x128xf32> to vector<32x128xbf16>
      %cst_52 = arith.constant dense<0.000000e+00> : vector<128x128xf32>
      %81 = tpu.matmul %79, %80, %cst_52 {dimension_numbers = #tpu.dot_dimension_numbers<[1], [0], [0], [1], [0, 0, 1, 1], [], []>} : vector<128x32xbf16>, vector<32x128xbf16>, vector<128x128xf32> -> vector<128x128xf32>
      %cst_53 = arith.constant 0.000000e+00 : f32
      %cst_54 = arith.constant 6.000000e+00 : f32
      %82 = vector.broadcast %cst_53 : f32 to vector<128x128xf32>
      %83 = arith.maximumf %82, %81 : vector<128x128xf32>
      %84 = vector.broadcast %cst_54 : f32 to vector<128x128xf32>
      %85 = arith.minimumf %84, %83 : vector<128x128xf32>
      %c0_55 = arith.constant 0 : index
      %c0_56 = arith.constant 0 : index
      %86 = vector.load %arg10[%c0_55, %c0_56] : memref<32x128xbf16, #tpu.memory_space<vmem>>, vector<32x128xbf16>
      %87 = arith.truncf %85 : vector<128x128xf32> to vector<128x128xbf16>
      %cst_57 = arith.constant dense<0.000000e+00> : vector<32x128xf32>
      %88 = tpu.matmul %86, %87, %cst_57 {dimension_numbers = #tpu.dot_dimension_numbers<[1], [0], [0], [1], [0, 0, 1, 1], [], []>} : vector<32x128xbf16>, vector<128x128xbf16>, vector<32x128xf32> -> vector<32x128xf32>
      %cst_58 = arith.constant 0.000000e+00 : f32
      %cst_59 = arith.constant 6.000000e+00 : f32
      %89 = vector.broadcast %cst_58 : f32 to vector<32x128xf32>
      %90 = arith.maximumf %89, %88 : vector<32x128xf32>
      %91 = vector.broadcast %cst_59 : f32 to vector<32x128xf32>
      %92 = arith.minimumf %91, %90 : vector<32x128xf32>
      %93 = arith.addf %78, %92 : vector<32x128xf32>
      %cst_60 = arith.constant dense<0.000000e+00> : vector<128xf32>
      %94 = vector.multi_reduction <add>, %93, %cst_60 [0] : vector<32x128xf32> to vector<128xf32>
      %95 = vector.shape_cast %94 : vector<128xf32> to vector<1x128xf32>
      %cst_61 = arith.constant 3.200000e+01 : f32
      %96 = vector.broadcast %cst_61 : f32 to vector<1x128xf32>
      %97 = arith.divf %95, %96 : vector<1x128xf32>
      %98 = vector.broadcast %97 : vector<1x128xf32> to vector<32x128xf32>
      %99 = arith.subf %93, %98 : vector<32x128xf32>
      %100 = arith.mulf %99, %99 : vector<32x128xf32>
      %cst_62 = arith.constant dense<0.000000e+00> : vector<128xf32>
      %101 = vector.multi_reduction <add>, %100, %cst_62 [0] : vector<32x128xf32> to vector<128xf32>
      %102 = vector.shape_cast %101 : vector<128xf32> to vector<1x128xf32>
      %cst_63 = arith.constant 3.200000e+01 : f32
      %103 = vector.broadcast %cst_63 : f32 to vector<1x128xf32>
      %104 = arith.divf %102, %103 : vector<1x128xf32>
      %105 = vector.broadcast %97 : vector<1x128xf32> to vector<32x128xf32>
      %106 = arith.subf %93, %105 : vector<32x128xf32>
      %cst_64 = arith.constant 9.99999997E-7 : f32
      %107 = vector.broadcast %cst_64 : f32 to vector<1x128xf32>
      %108 = arith.addf %104, %107 : vector<1x128xf32>
      %109 = math.rsqrt %108 : vector<1x128xf32>
      %110 = vector.broadcast %109 : vector<1x128xf32> to vector<32x128xf32>
      %111 = arith.mulf %106, %110 : vector<32x128xf32>
      %112 = vector.broadcast %43 : vector<32x1xf32> to vector<32x128xf32>
      %113 = arith.mulf %111, %112 : vector<32x128xf32>
      %114 = vector.broadcast %44 : vector<32x1xf32> to vector<32x128xf32>
      %115 = arith.addf %113, %114 : vector<32x128xf32>
      %c0_65 = arith.constant 0 : index
      %c0_66 = arith.constant 0 : index
      %c0_67 = arith.constant 0 : index
      %116 = vector.load %arg11[%c0_65, %c0_66, %c0_67] : memref<1x32x128xf32, #tpu.memory_space<vmem>>, vector<1x32x128xf32>
      %117 = vector.shape_cast %116 : vector<1x32x128xf32> to vector<32x128xf32>
      %118 = vector.shape_cast %115 : vector<32x128xf32> to vector<1x32x128xf32>
      tpu.vector_store %arg11[%c0_65, %c0_66, %c0_67], %118 {strides = array<i32>} : memref<1x32x128xf32, #tpu.memory_space<vmem>>, vector<1x32x128xf32>,
    } else {
    }
    return
  }
  func.func @transform_0(%arg0: i32, %arg1: i32, %arg2: i32) -> (i32, i32, i32) {
    %c0_i32 = arith.constant 0 : i32
    %c0_i32_0 = arith.constant 0 : i32
    return %arg0, %c0_i32, %arg1 : i32, i32, i32
  }
  func.func @transform_1(%arg0: i32, %arg1: i32, %arg2: i32) -> (i32, i32, i32) {
    %c0_i32 = arith.constant 0 : i32
    %c0_i32_0 = arith.constant 0 : i32
    return %arg0, %c0_i32, %arg2 : i32, i32, i32
  }
  func.func @transform_2(%arg0: i32, %arg1: i32, %arg2: i32) -> (i32, i32, i32) {
    %c0_i32 = arith.constant 0 : i32
    %c0_i32_0 = arith.constant 0 : i32
    return %arg0, %c0_i32, %arg2 : i32, i32, i32
  }
  func.func @transform_3(%arg0: i32, %arg1: i32, %arg2: i32) -> (i32, i32) {
    %c0_i32 = arith.constant 0 : i32
    %c0_i32_0 = arith.constant 0 : i32
    %c0_i32_1 = arith.constant 0 : i32
    return %c0_i32, %c0_i32_0 : i32, i32
  }
  func.func @transform_4(%arg0: i32, %arg1: i32, %arg2: i32) -> (i32, i32) {
    %c0_i32 = arith.constant 0 : i32
    %c0_i32_0 = arith.constant 0 : i32
    %c0_i32_1 = arith.constant 0 : i32
    return %c0_i32, %c0_i32_0 : i32, i32
  }
  func.func @transform_5(%arg0: i32, %arg1: i32, %arg2: i32) -> (i32, i32) {
    %c0_i32 = arith.constant 0 : i32
    %c0_i32_0 = arith.constant 0 : i32
    %c0_i32_1 = arith.constant 0 : i32
    return %c0_i32, %c0_i32_0 : i32, i32
  }
  func.func @transform_6(%arg0: i32, %arg1: i32, %arg2: i32) -> (i32, i32) {
    %c0_i32 = arith.constant 0 : i32
    %c0_i32_0 = arith.constant 0 : i32
    %c0_i32_1 = arith.constant 0 : i32
    return %c0_i32, %c0_i32_0 : i32, i32
  }
  func.func @transform_7(%arg0: i32, %arg1: i32, %arg2: i32) -> (i32, i32) {
    %c0_i32 = arith.constant 0 : i32
    %c0_i32_0 = arith.constant 0 : i32
    %c0_i32_1 = arith.constant 0 : i32
    return %c0_i32, %c0_i32_0 : i32, i32
  }
  func.func @transform_8(%arg0: i32, %arg1: i32, %arg2: i32) -> (i32, i32, i32) {
    %c0_i32 = arith.constant 0 : i32
    %c0_i32_0 = arith.constant 0 : i32
    return %arg0, %c0_i32, %arg1 : i32, i32, i32
  }
}

module attributes {stable_mosaic.version = 11 : i64} {
  func.func @_encoder_kernel(%arg0: i32, %arg1: i32, %arg2: i32, %arg3: memref<1x32x128xf32, #tpu.memory_space<vmem>>, %arg4: memref<1x32x128xbf16, #tpu.memory_space<vmem>>, %arg5: memref<1x32x128xbf16, #tpu.memory_space<vmem>>, %arg6: memref<32x32xbf16, #tpu.memory_space<vmem>>, %arg7: memref<32x32xbf16, #tpu.memory_space<vmem>>, %arg8: memref<32x8xf32, #tpu.memory_space<vmem>>, %arg9: memref<128x32xbf16, #tpu.memory_space<vmem>>, %arg10: memref<32x128xbf16, #tpu.memory_space<vmem>>, %arg11: memref<1x32x128xf32, #tpu.memory_space<vmem>>, %arg12: memref<2x16x128xbf16, #tpu.memory_space<vmem>>, %arg13: memref<2x1x128xf32, #tpu.memory_space<vmem>>, %arg14: memref<2x1x128xf32, #tpu.memory_space<vmem>>, %arg15: memref<2x16x128xf32, #tpu.memory_space<vmem>>) attributes {dimension_semantics = [#tpu.dimension_semantics<parallel>, #tpu.dimension_semantics<parallel>, #tpu.dimension_semantics<arbitrary>], iteration_bounds = array<i64: 2, 2, 2>, scalar_prefetch = 0 : i64, scratch_operands = 4 : i64, tpu.core_type = #tpu.core_type<tc>, window_params = [{transform_indices = @transform_0, window_bounds = array<i64: 1, 32, 128>}, {transform_indices = @transform_1, window_bounds = array<i64: 1, 32, 128>}, {transform_indices = @transform_2, window_bounds = array<i64: 1, 32, 128>}, {pipeline_mode = #tpu.pipeline_mode<synchronous>, transform_indices = @transform_3, window_bounds = array<i64: 32, 32>}, {pipeline_mode = #tpu.pipeline_mode<synchronous>, transform_indices = @transform_4, window_bounds = array<i64: 32, 32>}, {pipeline_mode = #tpu.pipeline_mode<synchronous>, transform_indices = @transform_5, window_bounds = array<i64: 32, 8>}, {pipeline_mode = #tpu.pipeline_mode<synchronous>, transform_indices = @transform_6, window_bounds = array<i64: 128, 32>}, {pipeline_mode = #tpu.pipeline_mode<synchronous>, transform_indices = @transform_7, window_bounds = array<i64: 32, 128>}, {transform_indices = @transform_8, window_bounds = array<i64: 1, 32, 128>}]} {
    %c0_i32 = arith.constant 0 : i32
    %0 = arith.cmpi eq, %arg2, %c0_i32 : i32
    %1 = arith.extui %0 : i1 to i32
    %c0_i32_0 = arith.constant 0 : i32
    %2 = arith.cmpi ne, %1, %c0_i32_0 : i32
    scf.if %2 {
      %c0_31 = arith.constant 0 : index
      %c0_32 = arith.constant 0 : index
      %c0_33 = arith.constant 0 : index
      %37 = vector.load %arg3[%c0_31, %c0_32, %c0_33] : memref<1x32x128xf32, #tpu.memory_space<vmem>>, vector<1x32x128xf32>
      %38 = vector.shape_cast %37 : vector<1x32x128xf32> to vector<32x128xf32>
      %39 = arith.truncf %38 : vector<32x128xf32> to vector<32x128xbf16>
      %c0_34 = arith.constant 0 : index
      %c0_35 = arith.constant 0 : index
      %40 = vector.load %arg6[%c0_34, %c0_35] : memref<32x32xbf16, #tpu.memory_space<vmem>>, vector<32x32xbf16>
      %cst_36 = arith.constant dense<0.000000e+00> : vector<32x128xf32>
      %41 = tpu.matmul %40, %39, %cst_36 {dimension_numbers = #tpu.dot_dimension_numbers<[1], [0], [0], [1], [0, 0, 1, 1], [], []>} : vector<32x32xbf16>, vector<32x128xbf16>, vector<32x128xf32> -> vector<32x128xf32>
      %cst_37 = arith.constant 2.500000e-01 : f32
      %42 = vector.broadcast %cst_37 : f32 to vector<32x128xf32>
      %43 = arith.mulf %41, %42 : vector<32x128xf32>
      %44 = vector.shape_cast %43 : vector<32x128xf32> to vector<2x16x128xf32>
      %45 = arith.truncf %44 : vector<2x16x128xf32> to vector<2x16x128xbf16>
      %c0_38 = arith.constant 0 : index
      %c0_39 = arith.constant 0 : index
      %c0_40 = arith.constant 0 : index
      %46 = vector.load %arg12[%c0_38, %c0_39, %c0_40] : memref<2x16x128xbf16, #tpu.memory_space<vmem>>, vector<2x16x128xbf16>
      tpu.vector_store %arg12[%c0_38, %c0_39, %c0_40], %45 {strides = array<i32>} : memref<2x16x128xbf16, #tpu.memory_space<vmem>>, vector<2x16x128xbf16>,
      %cst_41 = arith.constant 0xFF800000 : f32
      %47 = vector.broadcast %cst_41 : f32 to vector<2x1x128xf32>
      %c0_42 = arith.constant 0 : index
      %c0_43 = arith.constant 0 : index
      %c0_44 = arith.constant 0 : index
      %48 = vector.load %arg13[%c0_42, %c0_43, %c0_44] : memref<2x1x128xf32, #tpu.memory_space<vmem>>, vector<2x1x128xf32>
      tpu.vector_store %arg13[%c0_42, %c0_43, %c0_44], %47 {strides = array<i32>} : memref<2x1x128xf32, #tpu.memory_space<vmem>>, vector<2x1x128xf32>,
      %cst_45 = arith.constant 0.000000e+00 : f32
      %49 = vector.broadcast %cst_45 : f32 to vector<2x1x128xf32>
      %c0_46 = arith.constant 0 : index
      %c0_47 = arith.constant 0 : index
      %c0_48 = arith.constant 0 : index
      %50 = vector.load %arg14[%c0_46, %c0_47, %c0_48] : memref<2x1x128xf32, #tpu.memory_space<vmem>>, vector<2x1x128xf32>
      tpu.vector_store %arg14[%c0_46, %c0_47, %c0_48], %49 {strides = array<i32>} : memref<2x1x128xf32, #tpu.memory_space<vmem>>, vector<2x1x128xf32>,
      %cst_49 = arith.constant 0.000000e+00 : f32
      %51 = vector.broadcast %cst_49 : f32 to vector<2x16x128xf32>
      %c0_50 = arith.constant 0 : index
      %c0_51 = arith.constant 0 : index
      %c0_52 = arith.constant 0 : index
      %52 = vector.load %arg15[%c0_50, %c0_51, %c0_52] : memref<2x16x128xf32, #tpu.memory_space<vmem>>, vector<2x16x128xf32>
      tpu.vector_store %arg15[%c0_50, %c0_51, %c0_52], %51 {strides = array<i32>} : memref<2x16x128xf32, #tpu.memory_space<vmem>>, vector<2x16x128xf32>,
    } else {
    }
    %c0 = arith.constant 0 : index
    %c0_1 = arith.constant 0 : index
    %c0_2 = arith.constant 0 : index
    %3 = vector.load %arg4[%c0, %c0_1, %c0_2] : memref<1x32x128xbf16, #tpu.memory_space<vmem>>, vector<1x32x128xbf16>
    %4 = vector.shape_cast %3 : vector<1x32x128xbf16> to vector<32x128xbf16>
    %5 = vector.shape_cast %4 : vector<32x128xbf16> to vector<2x16x128xbf16>
    %c0_3 = arith.constant 0 : index
    %c0_4 = arith.constant 0 : index
    %c0_5 = arith.constant 0 : index
    %6 = vector.load %arg5[%c0_3, %c0_4, %c0_5] : memref<1x32x128xbf16, #tpu.memory_space<vmem>>, vector<1x32x128xbf16>
    %7 = vector.shape_cast %6 : vector<1x32x128xbf16> to vector<32x128xbf16>
    %8 = vector.shape_cast %7 : vector<32x128xbf16> to vector<2x16x128xbf16>
    %c0_6 = arith.constant 0 : index
    %c0_7 = arith.constant 0 : index
    %c0_8 = arith.constant 0 : index
    %9 = vector.load %arg12[%c0_6, %c0_7, %c0_8] : memref<2x16x128xbf16, #tpu.memory_space<vmem>>, vector<2x16x128xbf16>
    "tpu.trace_start"() <{level = 10 : i32, message = "hdk,hdq->hkq"}> : () -> ()
    %cst = arith.constant dense<0.000000e+00> : vector<2x128x128xf32>
    %10 = tpu.matmul %5, %9, %cst {dimension_numbers = #tpu.dot_dimension_numbers<[1], [1], [2], [2], [0, 0, 0, 2, 1, 2], [0], [0]>} : vector<2x16x128xbf16>, vector<2x16x128xbf16>, vector<2x128x128xf32> -> vector<2x128x128xf32>
    "tpu.trace_stop"() : () -> ()
    %c0_9 = arith.constant 0 : index
    %c0_10 = arith.constant 0 : index
    %c0_11 = arith.constant 0 : index
    %11 = vector.load %arg13[%c0_9, %c0_10, %c0_11] : memref<2x1x128xf32, #tpu.memory_space<vmem>>, vector<2x1x128xf32>
    %cst_12 = arith.constant dense<0xFF800000> : vector<2x128xf32>
    %12 = vector.multi_reduction <maximumf>, %10, %cst_12 [1] : vector<2x128x128xf32> to vector<2x128xf32>
    %13 = vector.shape_cast %12 : vector<2x128xf32> to vector<2x1x128xf32>
    %14 = arith.maximumf %11, %13 : vector<2x1x128xf32>
    %15 = arith.subf %11, %14 : vector<2x1x128xf32>
    %16 = math.exp %15 : vector<2x1x128xf32>
    %17 = vector.broadcast %14 : vector<2x1x128xf32> to vector<2x128x128xf32>
    %18 = arith.subf %10, %17 : vector<2x128x128xf32>
    %19 = math.exp %18 : vector<2x128x128xf32>
    %20 = arith.truncf %19 : vector<2x128x128xf32> to vector<2x128x128xbf16>
    %c0_13 = arith.constant 0 : index
    %c0_14 = arith.constant 0 : index
    %c0_15 = arith.constant 0 : index
    %21 = vector.load %arg14[%c0_13, %c0_14, %c0_15] : memref<2x1x128xf32, #tpu.memory_space<vmem>>, vector<2x1x128xf32>
    %22 = arith.mulf %16, %21 : vector<2x1x128xf32>
    %cst_16 = arith.constant dense<0.000000e+00> : vector<2x128xf32>
    %23 = vector.multi_reduction <add>, %19, %cst_16 [1] : vector<2x128x128xf32> to vector<2x128xf32>
    %24 = vector.shape_cast %23 : vector<2x128xf32> to vector<2x1x128xf32>
    %25 = arith.addf %22, %24 : vector<2x1x128xf32>
    %c0_17 = arith.constant 0 : index
    %c0_18 = arith.constant 0 : index
    %c0_19 = arith.constant 0 : index
    %26 = vector.load %arg14[%c0_17, %c0_18, %c0_19] : memref<2x1x128xf32, #tpu.memory_space<vmem>>, vector<2x1x128xf32>
    tpu.vector_store %arg14[%c0_17, %c0_18, %c0_19], %25 {strides = array<i32>} : memref<2x1x128xf32, #tpu.memory_space<vmem>>, vector<2x1x128xf32>,
    "tpu.trace_start"() <{level = 10 : i32, message = "hdk,hkq->hdq"}> : () -> ()
    %cst_20 = arith.constant dense<0.000000e+00> : vector<2x16x128xf32>
    %27 = tpu.matmul %8, %20, %cst_20 {dimension_numbers = #tpu.dot_dimension_numbers<[2], [1], [1], [2], [0, 0, 0, 1, 1, 2], [0], [0]>} : vector<2x16x128xbf16>, vector<2x128x128xbf16>, vector<2x16x128xf32> -> vector<2x16x128xf32>
    "tpu.trace_stop"() : () -> ()
    %c0_21 = arith.constant 0 : index
    %c0_22 = arith.constant 0 : index
    %c0_23 = arith.constant 0 : index
    %28 = vector.load %arg15[%c0_21, %c0_22, %c0_23] : memref<2x16x128xf32, #tpu.memory_space<vmem>>, vector<2x16x128xf32>
    %29 = vector.broadcast %16 : vector<2x1x128xf32> to vector<2x16x128xf32>
    %30 = arith.mulf %29, %28 : vector<2x16x128xf32>
    %31 = arith.addf %30, %27 : vector<2x16x128xf32>
    %c0_24 = arith.constant 0 : index
    %c0_25 = arith.constant 0 : index
    %c0_26 = arith.constant 0 : index
    %32 = vector.load %arg15[%c0_24, %c0_25, %c0_26] : memref<2x16x128xf32, #tpu.memory_space<vmem>>, vector<2x16x128xf32>
    tpu.vector_store %arg15[%c0_24, %c0_25, %c0_26], %31 {strides = array<i32>} : memref<2x16x128xf32, #tpu.memory_space<vmem>>, vector<2x16x128xf32>,
    %c0_27 = arith.constant 0 : index
    %c0_28 = arith.constant 0 : index
    %c0_29 = arith.constant 0 : index
    %33 = vector.load %arg13[%c0_27, %c0_28, %c0_29] : memref<2x1x128xf32, #tpu.memory_space<vmem>>, vector<2x1x128xf32>
    tpu.vector_store %arg13[%c0_27, %c0_28, %c0_29], %14 {strides = array<i32>} : memref<2x1x128xf32, #tpu.memory_space<vmem>>, vector<2x1x128xf32>,
    %c1_i32 = arith.constant 1 : i32
    %34 = arith.cmpi eq, %arg2, %c1_i32 : i32
    %35 = arith.extui %34 : i1 to i32
    %c0_i32_30 = arith.constant 0 : i32
    %36 = arith.cmpi ne, %35, %c0_i32_30 : i32
    scf.if %36 {
      %c0_31 = arith.constant 0 : index
      %c0_32 = arith.constant 0 : index
      %c0_33 = arith.constant 0 : index
      %37 = vector.load %arg3[%c0_31, %c0_32, %c0_33] : memref<1x32x128xf32, #tpu.memory_space<vmem>>, vector<1x32x128xf32>
      %38 = vector.shape_cast %37 : vector<1x32x128xf32> to vector<32x128xf32>
      %c0_34 = arith.constant 0 : index
      %c0_35 = arith.constant 0 : index
      %39 = vector.load %arg8[%c0_34, %c0_35] : memref<32x8xf32, #tpu.memory_space<vmem>>, vector<32x8xf32>
      %40 = vector.extract_strided_slice %39 {offsets = [0, 0], sizes = [32, 1], strides = [1, 1]} : vector<32x8xf32> to vector<32x1xf32>
      %41 = vector.extract_strided_slice %39 {offsets = [0, 1], sizes = [32, 1], strides = [1, 1]} : vector<32x8xf32> to vector<32x1xf32>
      %42 = vector.extract_strided_slice %39 {offsets = [0, 2], sizes = [32, 1], strides = [1, 1]} : vector<32x8xf32> to vector<32x1xf32>
      %43 = vector.extract_strided_slice %39 {offsets = [0, 3], sizes = [32, 1], strides = [1, 1]} : vector<32x8xf32> to vector<32x1xf32>
      %44 = vector.extract_strided_slice %39 {offsets = [0, 4], sizes = [32, 1], strides = [1, 1]} : vector<32x8xf32> to vector<32x1xf32>
      %c0_36 = arith.constant 0 : index
      %c0_37 = arith.constant 0 : index
      %c0_38 = arith.constant 0 : index
      %45 = vector.load %arg15[%c0_36, %c0_37, %c0_38] : memref<2x16x128xf32, #tpu.memory_space<vmem>>, vector<2x16x128xf32>
      %c0_39 = arith.constant 0 : index
      %c0_40 = arith.constant 0 : index
      %c0_41 = arith.constant 0 : index
      %46 = vector.load %arg14[%c0_39, %c0_40, %c0_41] : memref<2x1x128xf32, #tpu.memory_space<vmem>>, vector<2x1x128xf32>
      %47 = tpu.reciprocal %46 : vector<2x1x128xf32> -> vector<2x1x128xf32>
      %48 = vector.broadcast %47 : vector<2x1x128xf32> to vector<2x16x128xf32>
      %49 = arith.mulf %45, %48 : vector<2x16x128xf32>
      %50 = vector.shape_cast %49 : vector<2x16x128xf32> to vector<32x128xf32>
      %c0_42 = arith.constant 0 : index
      %c0_43 = arith.constant 0 : index
      %51 = vector.load %arg7[%c0_42, %c0_43] : memref<32x32xbf16, #tpu.memory_space<vmem>>, vector<32x32xbf16>
      %52 = arith.truncf %50 : vector<32x128xf32> to vector<32x128xbf16>
      %cst_44 = arith.constant dense<0.000000e+00> : vector<32x128xf32>
      %53 = tpu.matmul %51, %52, %cst_44 {dimension_numbers = #tpu.dot_dimension_numbers<[1], [0], [0], [1], [0, 0, 1, 1], [], []>} : vector<32x32xbf16>, vector<32x128xbf16>, vector<32x128xf32> -> vector<32x128xf32>
      %54 = vector.broadcast %40 : vector<32x1xf32> to vector<32x128xf32>
      %55 = arith.addf %53, %54 : vector<32x128xf32>
      %56 = arith.addf %38, %55 : vector<32x128xf32>
      %cst_45 = arith.constant dense<0.000000e+00> : vector<128xf32>
      %57 = vector.multi_reduction <add>, %56, %cst_45 [0] : vector<32x128xf32> to vector<128xf32>
      %58 = vector.shape_cast %57 : vector<128xf32> to vector<1x128xf32>
      %cst_46 = arith.constant 3.200000e+01 : f32
      %59 = vector.broadcast %cst_46 : f32 to vector<1x128xf32>
      %60 = arith.divf %58, %59 : vector<1x128xf32>
      %61 = vector.broadcast %60 : vector<1x128xf32> to vector<32x128xf32>
      %62 = arith.subf %56, %61 : vector<32x128xf32>
      %63 = arith.mulf %62, %62 : vector<32x128xf32>
      %cst_47 = arith.constant dense<0.000000e+00> : vector<128xf32>
      %64 = vector.multi_reduction <add>, %63, %cst_47 [0] : vector<32x128xf32> to vector<128xf32>
      %65 = vector.shape_cast %64 : vector<128xf32> to vector<1x128xf32>
      %cst_48 = arith.constant 3.200000e+01 : f32
      %66 = vector.broadcast %cst_48 : f32 to vector<1x128xf32>
      %67 = arith.divf %65, %66 : vector<1x128xf32>
      %68 = vector.broadcast %60 : vector<1x128xf32> to vector<32x128xf32>
      %69 = arith.subf %56, %68 : vector<32x128xf32>
      %cst_49 = arith.constant 9.99999997E-7 : f32
      %70 = vector.broadcast %cst_49 : f32 to vector<1x128xf32>
      %71 = arith.addf %67, %70 : vector<1x128xf32>
      %72 = math.rsqrt %71 : vector<1x128xf32>
      %73 = vector.broadcast %72 : vector<1x128xf32> to vector<32x128xf32>
      %74 = arith.mulf %69, %73 : vector<32x128xf32>
      %75 = vector.broadcast %41 : vector<32x1xf32> to vector<32x128xf32>
      %76 = arith.mulf %74, %75 : vector<32x128xf32>
      %77 = vector.broadcast %42 : vector<32x1xf32> to vector<32x128xf32>
      %78 = arith.addf %76, %77 : vector<32x128xf32>
      %c0_50 = arith.constant 0 : index
      %c0_51 = arith.constant 0 : index
      %79 = vector.load %arg9[%c0_50, %c0_51] : memref<128x32xbf16, #tpu.memory_space<vmem>>, vector<128x32xbf16>
      %80 = arith.truncf %78 : vector<32x128xf32> to vector<32x128xbf16>
      %cst_52 = arith.constant dense<0.000000e+00> : vector<128x128xf32>
      %81 = tpu.matmul %79, %80, %cst_52 {dimension_numbers = #tpu.dot_dimension_numbers<[1], [0], [0], [1], [0, 0, 1, 1], [], []>} : vector<128x32xbf16>, vector<32x128xbf16>, vector<128x128xf32> -> vector<128x128xf32>
      %cst_53 = arith.constant 0.000000e+00 : f32
      %cst_54 = arith.constant 6.000000e+00 : f32
      %82 = vector.broadcast %cst_53 : f32 to vector<128x128xf32>
      %83 = arith.maximumf %82, %81 : vector<128x128xf32>
      %84 = vector.broadcast %cst_54 : f32 to vector<128x128xf32>
      %85 = arith.minimumf %84, %83 : vector<128x128xf32>
      %c0_55 = arith.constant 0 : index
      %c0_56 = arith.constant 0 : index
      %86 = vector.load %arg10[%c0_55, %c0_56] : memref<32x128xbf16, #tpu.memory_space<vmem>>, vector<32x128xbf16>
      %87 = arith.truncf %85 : vector<128x128xf32> to vector<128x128xbf16>
      %cst_57 = arith.constant dense<0.000000e+00> : vector<32x128xf32>
      %88 = tpu.matmul %86, %87, %cst_57 {dimension_numbers = #tpu.dot_dimension_numbers<[1], [0], [0], [1], [0, 0, 1, 1], [], []>} : vector<32x128xbf16>, vector<128x128xbf16>, vector<32x128xf32> -> vector<32x128xf32>
      %cst_58 = arith.constant 0.000000e+00 : f32
      %cst_59 = arith.constant 6.000000e+00 : f32
      %89 = vector.broadcast %cst_58 : f32 to vector<32x128xf32>
      %90 = arith.maximumf %89, %88 : vector<32x128xf32>
      %91 = vector.broadcast %cst_59 : f32 to vector<32x128xf32>
      %92 = arith.minimumf %91, %90 : vector<32x128xf32>
      %93 = arith.addf %78, %92 : vector<32x128xf32>
      %cst_60 = arith.constant dense<0.000000e+00> : vector<128xf32>
      %94 = vector.multi_reduction <add>, %93, %cst_60 [0] : vector<32x128xf32> to vector<128xf32>
      %95 = vector.shape_cast %94 : vector<128xf32> to vector<1x128xf32>
      %cst_61 = arith.constant 3.200000e+01 : f32
      %96 = vector.broadcast %cst_61 : f32 to vector<1x128xf32>
      %97 = arith.divf %95, %96 : vector<1x128xf32>
      %98 = vector.broadcast %97 : vector<1x128xf32> to vector<32x128xf32>
      %99 = arith.subf %93, %98 : vector<32x128xf32>
      %100 = arith.mulf %99, %99 : vector<32x128xf32>
      %cst_62 = arith.constant dense<0.000000e+00> : vector<128xf32>
      %101 = vector.multi_reduction <add>, %100, %cst_62 [0] : vector<32x128xf32> to vector<128xf32>
      %102 = vector.shape_cast %101 : vector<128xf32> to vector<1x128xf32>
      %cst_63 = arith.constant 3.200000e+01 : f32
      %103 = vector.broadcast %cst_63 : f32 to vector<1x128xf32>
      %104 = arith.divf %102, %103 : vector<1x128xf32>
      %105 = vector.broadcast %97 : vector<1x128xf32> to vector<32x128xf32>
      %106 = arith.subf %93, %105 : vector<32x128xf32>
      %cst_64 = arith.constant 9.99999997E-7 : f32
      %107 = vector.broadcast %cst_64 : f32 to vector<1x128xf32>
      %108 = arith.addf %104, %107 : vector<1x128xf32>
      %109 = math.rsqrt %108 : vector<1x128xf32>
      %110 = vector.broadcast %109 : vector<1x128xf32> to vector<32x128xf32>
      %111 = arith.mulf %106, %110 : vector<32x128xf32>
      %112 = vector.broadcast %43 : vector<32x1xf32> to vector<32x128xf32>
      %113 = arith.mulf %111, %112 : vector<32x128xf32>
      %114 = vector.broadcast %44 : vector<32x1xf32> to vector<32x128xf32>
      %115 = arith.addf %113, %114 : vector<32x128xf32>
      %c0_65 = arith.constant 0 : index
      %c0_66 = arith.constant 0 : index
      %c0_67 = arith.constant 0 : index
      %116 = vector.load %arg11[%c0_65, %c0_66, %c0_67] : memref<1x32x128xf32, #tpu.memory_space<vmem>>, vector<1x32x128xf32>
      %117 = vector.shape_cast %116 : vector<1x32x128xf32> to vector<32x128xf32>
      %118 = vector.shape_cast %115 : vector<32x128xf32> to vector<1x32x128xf32>
      tpu.vector_store %arg11[%c0_65, %c0_66, %c0_67], %118 {strides = array<i32>} : memref<1x32x128xf32, #tpu.memory_space<vmem>>, vector<1x32x128xf32>,
    } else {
    }
    return
  }
  func.func @transform_0(%arg0: i32, %arg1: i32, %arg2: i32) -> (i32, i32, i32) {
    %c0_i32 = arith.constant 0 : i32
    %c0_i32_0 = arith.constant 0 : i32
    return %arg0, %c0_i32, %arg1 : i32, i32, i32
  }
  func.func @transform_1(%arg0: i32, %arg1: i32, %arg2: i32) -> (i32, i32, i32) {
    %c0_i32 = arith.constant 0 : i32
    %c0_i32_0 = arith.constant 0 : i32
    return %arg0, %c0_i32, %arg2 : i32, i32, i32
  }
  func.func @transform_2(%arg0: i32, %arg1: i32, %arg2: i32) -> (i32, i32, i32) {
    %c0_i32 = arith.constant 0 : i32
    %c0_i32_0 = arith.constant 0 : i32
    return %arg0, %c0_i32, %arg2 : i32, i32, i32
  }
  func.func @transform_3(%arg0: i32, %arg1: i32, %arg2: i32) -> (i32, i32) {
    %c0_i32 = arith.constant 0 : i32
    %c0_i32_0 = arith.constant 0 : i32
    %c0_i32_1 = arith.constant 0 : i32
    return %c0_i32, %c0_i32_0 : i32, i32
  }
  func.func @transform_4(%arg0: i32, %arg1: i32, %arg2: i32) -> (i32, i32) {
    %c0_i32 = arith.constant 0 : i32
    %c0_i32_0 = arith.constant 0 : i32
    %c0_i32_1 = arith.constant 0 : i32
    return %c0_i32, %c0_i32_0 : i32, i32
  }
  func.func @transform_5(%arg0: i32, %arg1: i32, %arg2: i32) -> (i32, i32) {
    %c0_i32 = arith.constant 0 : i32
    %c0_i32_0 = arith.constant 0 : i32
    %c0_i32_1 = arith.constant 0 : i32
    return %c0_i32, %c0_i32_0 : i32, i32
  }
  func.func @transform_6(%arg0: i32, %arg1: i32, %arg2: i32) -> (i32, i32) {
    %c0_i32 = arith.constant 0 : i32
    %c0_i32_0 = arith.constant 0 : i32
    %c0_i32_1 = arith.constant 0 : i32
    return %c0_i32, %c0_i32_0 : i32, i32
  }
  func.func @transform_7(%arg0: i32, %arg1: i32, %arg2: i32) -> (i32, i32) {
    %c0_i32 = arith.constant 0 : i32
    %c0_i32_0 = arith.constant 0 : i32
    %c0_i32_1 = arith.constant 0 : i32
    return %c0_i32, %c0_i32_0 : i32, i32
  }
  func.func @transform_8(%arg0: i32, %arg1: i32, %arg2: i32) -> (i32, i32, i32) {
    %c0_i32 = arith.constant 0 : i32
    %c0_i32_0 = arith.constant 0 : i32
    return %arg0, %c0_i32, %arg1 : i32, i32, i32
  }
}

</mosaic_0001>

<bundles_post_ra>
// kernel: tpu_custom_call.1
= control target key start
LH: loop header
LB: loop body
LE: loop exit
PB: predicated region body
PF: predicated region fallthrough
CT: control target
= control target key end

     0   :  { %s3310_s0 = inlined_call_operand.hbm [shape: f32[2,32,256], index: 0, kind: input, shape index: {}]   ;;  %s3311_s1 = inlined_call_operand.vmem [shape: bf16[2,32,256], index: 1, kind: input, shape index: {}]   ;;  %s3312_s2 = inlined_call_operand.hbm [shape: bf16[2,32,256], index: 2, kind: input, shape index: {}]   ;;  %s3313_s3 = inlined_call_operand.vmem [shape: bf16[32,32], index: 3, kind: input, shape index: {}]   ;;  %s3314_s4 = inlined_call_operand.vmem [shape: bf16[32,32], index: 4, kind: input, shape index: {}]   ;;  %s3315_s5 = inlined_call_operand.vmem [shape: f32[32,8], index: 5, kind: input, shape index: {}]   ;;  %s3316_s6 = inlined_call_operand.vmem [shape: bf16[128,32], index: 6, kind: input, shape index: {}]   ;;  %s3317_s7 = inlined_call_operand.hbm [shape: bf16[32,128], index: 7, kind: input, shape index: {}]   ;;  %s3318_s8 = inlined_call_operand.hbm [shape: f32[2,32,256], index: 8, kind: output, shape index: {}]  }
   0x1   :  { %3334 = sst [smem:[#allocation30_spill]] %s3310_s0 }
   0x2   :  { %3335 = sst [smem:[#allocation31_spill]] %s3311_s1 }
   0x3   :  { %3336 = sst [smem:[#allocation32_spill]] %s3312_s2 }
   0x4   :  { %3337 = sst [smem:[#allocation33_spill]] %s3313_s3 }
   0x5   :  { %3338 = sst [smem:[#allocation34_spill]] %s3314_s4 }
   0x6   :  { %3339 = sst [smem:[#allocation35_spill]] %s3315_s5 }
   0x7   :  { %3340 = sst [smem:[#allocation36_spill]] %s3316_s6 }
   0x8   :  { %3341 = sst [smem:[#allocation37_spill]] %s3317_s7 }
   0x9   :  { %3342 = sst [smem:[#allocation38_spill]] %s3318_s8 }
   0xa   :  { %13 = vsyncpa [#allocation7], 0 }
   0xb   :  { %15 = vsyncpa [#allocation7 + $0x1], 0 }
   0xc   :  { %16 = vsyncpa [#allocation11], 0 }
   0xd   :  { %18 = vsyncpa [#allocation11 + $0x1], 0 }
   0xe   :  { %19 = vsyncpa [#allocation8], 0 }
   0xf   :  { %21 = vsyncpa [#allocation8 + $0x1], 0  ;;  %s2577_s27 = smov 0   ;;  %s2579_s28 = smov 0  }
  0x10   :  { %s2581_s29 = smov 0   ;;  %s2583_s30 = smov 0  }
  0x11   :  { %s2585_s9 = smov 0   ;;  %s2587_s10 = smov 0  }
  0x12   :  { %s2589_s11 = smov 0   ;;  %s2591_s12 = smov 0  }
  0x13   :  { %s2593_s13 = smov 0   ;;  %s2595_s14 = smov 0  }
  0x14   :  { %s2597_s15 = smov 0   ;;  %s2599_s16 = smov 0  }
  0x15   :  { %s2601_s17 = smov 0  }
  0x16 LB: > { %3343 = sst [smem:[#allocation18_spill]] %s2475_s30  ;;  %s2643_s18 = sadd.s32 4294967295, %s2511_s17   ;;  %s2511_s17 = sphi %s2601_s17, %s27_s17   ;;  %s2507_s16 = sphi %s2599_s16, %s3407_s16   ;;  %s2503_s15 = sphi %s2597_s15, %s3406_s15   ;;  %s2499_s14 = sphi %s2595_s14, %s3405_s14   ;;  %s2495_s13 = sphi %s2593_s13, %s3404_s13   ;;  %s2491_s12 = sphi %s2591_s12, %s3403_s12   ;;  %s2487_s11 = sphi %s2589_s11, %s3402_s11   ;;  %s2483_s10 = sphi %s2587_s10, %s3401_s10   ;;  %s2479_s9 = sphi %s2585_s9, %s3400_s9   ;;  %s2475_s30 = sphi %s2583_s30, %s3399_s30   ;;  %s2471_s29 = sphi %s2581_s29, %s3398_s29   ;;  %s2467_s28 = sphi %s2579_s28, %s3397_s28   ;;  %s2463_s27 = sphi %s2577_s27, %s3396_s27  }
  0x17   : > { %3344 = sst [smem:[#allocation19_spill]] %s2487_s11  ;;  %s39_s20 = sadd.s32 1, %s2499_s14 }
  0x18   : > { %3345 = sst [smem:[#allocation20_spill]] %s2491_s12  ;;  %s42_s21 = sadd.s32 1, %s2503_s15 }
  0x19   : > { %3346 = sst [smem:[#allocation21_spill]] %s2495_s13  ;;  %p40_p0 = scmp.ge.s32.totalorder %s39_s20, 2 }
  0x1a   : > { %s46_s22 = sadd.s32 1, %s2507_s16  ;;  %p62_p1 = scmp.ne.s32.totalorder %s2483_s10, %s2479_s9 }
  0x1b   : > { %s3409_s20 = smov (%p40_p0, %s39_s20), 0  ;;  %s3411_s21 = smov (!%p40_p0, %s42_s21), %s2503_s15 }
  0x1c   : > { %3347 = sst [smem:[#allocation22_spill]] %s3409_s20  ;;  %p63_p2 = scmp.eq.s32.totalorder %s2511_s17, 0 }
  0x1d   : > { %p68_p3 = scmp.ne.s32.totalorder %s2479_s9, %s2475_s30  ;;  %p44_p4 = scmp.ge.s32.totalorder %s3411_s21, 2 }
  0x1e   : > { %p3327_p5 = scmp.eq.s32.totalorder %s2643_s18, 0  ;;  %p2664_p6 = por %p63_p2, %p62_p1 }
  0x1f   : > { %s79_s25 = ssub.s32 %s2499_s14, %s3409_s20  ;;  %s3413_s21 = smov (%p44_p4, %s3411_s21), 0 }
  0x20   : > { %3349 = sst [smem:[#allocation23_spill]] %s3413_s21  ;;  %s3415_s22 = smov (!%p44_p4, %s46_s22), %s2507_s16 }
  0x21   : > { %s51_s26 = ssub.s32 %s2503_s15, %s3413_s21  ;;  %p2680_p7 = por %p3327_p5, %p68_p3 }
  0x22   : > { %p48_p8 = scmp.ge.s32.totalorder %s3415_s22, 2  ;;  %s83_s19 = sadd.s32 1, %s2471_s29 }
  0x23   : > { %p90_p9 = scmp.ne.s32.totalorder %s2471_s29, %s2467_s28  ;;  %p124_p10 = scmp.ne.s32.totalorder %s2467_s28, %s2463_s27 }
  0x24   : > { %s3417_s22 = smov (%p48_p8, %s3415_s22), 0  ;;  %p255_p13 = scmp.eq.s32.totalorder %s2643_s18, 7 }
  0x25   : > { %3351 = sst [smem:[#allocation24_spill]] %s3417_s22  ;;  %p2693_p11 = por %p90_p9, %p63_p2 }
  0x26   : > { %p2699_p12 = por %p124_p10, %p3327_p5  ;;  %s50_s8 = ssub.s32 %s2507_s16, %s3417_s22 }
  0x27   : > { %s52_s12 = sor.u32 %s51_s26, %s50_s8  ;;  %s80_s13 = sor.u32 %s79_s25, %s50_s8 }
  0x28   : > { %s3353_s20 = scalar_select %p2699_p12, 1, 0 }
  0x29   : > { %p53_p0 = scmp.eq.s32.totalorder %s52_s12, 0  ;;  %p81_p4 = scmp.eq.s32.totalorder %s80_s13, 0 }
  0x2a   : > { %3354 = sst [smem:[#allocation25_spill]] %s3353_s20  ;;  %p2709_p8 = por %p255_p13, %p62_p1 }
  0x2b   : > { %s3357_s6 = sadd.s32 4294967294, %s2511_s17   ;;  %s3358_s4 = sadd.s32 1, %s2483_s10 }
  0x2c   : > { %s3355_s27 = scalar_select %p2709_p8, 1, 0 }
  0x2d   : > { %p261_p2 = scmp.eq.s32.totalorder %s3357_s6, 7  ;;  %p1856_p10 = scmp.ge.s32.totalorder %s2511_s17, 1 }
  0x2e   : > { %3356 = sst [smem:[#allocation26_spill]] %s3355_s27  ;;  %p268_p5 = scmp.lt.s32.totalorder %s2511_s17, 9 }
  0x2f   : > { %s2718_s5 = scalar_select %p53_p0, %s2483_s10, %s3358_s4  }
  0x30   : > { %s2721_s3 = scalar_select %p81_p4, %s2471_s29, %s83_s19  }
  0x31   : > { %3359 = sst [smem:[#allocation27_spill]] %s2718_s5  ;;  %p2726_p9 = por %p261_p2, %p68_p3 }
  0x32   : > { %3360 = sst [smem:[#allocation28_spill]] %s2721_s3  ;;  %p2735_p1 = pnand %p1856_p10, %p268_p5 }
  0x33   : > { %s3361_s22 = scalar_select %p2726_p9, 1, 0 }
  0x34   : > { %s3363_s7 = sld [smem:[#allocation37_spill]]  ;;  %s2513_s4 = smov [#allocation12]  }
  0x35   : > { %3362 = sst [smem:[#allocation29_spill]] %s3361_s22  ;;  %s293_s6 = sshll.u32 %s2513_s4, 4  ;;  %s294_s6 = int_to_ptr.vmem [resolvable:$true] %s293_s6 }
  0x36   : > { %p2036_p13 = pneg %p2735_p1  ;;  %p3365_p3 = scmp.eq.s32.totalorder %s2643_s18, 0 }
  0x37   : > { %s2514_s19 = smov 64   ;;  %s2515_s26 = smov 4  }
  0x38   : > { %p2037_p0 = pnand %p2036_p13, %p3365_p3  ;;  %p1858_p4 = scmp.ge.s32.totalorder %s2511_s17, 8 }
  0x39   : > { %s307_s8 = sand.u32 (!%p1858_p4), 1, %s2483_s10   ;;  %s2746_s12 = sshll.u32 (!%p1858_p4), %s2507_s16, 3 }
  0x3a   : > { %s291_s13 = sshll.u32 %s3363_s7, 4  ;;  %303 = sbr.rel (%p1858_p4) target bundleno = 91 (0x5b), region = 36  ;;  %s292_s13 = int_to_ptr.hbm [resolvable:$true] %s291_s13 }
  0x3b   : > { %2039 = dma.hbm_to_vmem [thread:$0]  (!%p2037_p0), %s292_s13, 256, %s294_s6, [#allocation11], %s2514_s19, %s2514_s19, %s2515_s26  }
  0x3c   : > { %s1859_s4 = sshll.u32 (!%p1858_p4), %s307_s8, 5  ;;  %s315_s7 = sadd.s32 (!%p1858_p4), %s2503_s15, %s2746_s12 }
  0x3d   : > { %s1861_s5 = sshll.u32 (!%p1858_p4), %s315_s7, 3  ;;  %s311_s3 = scalar_lea.vmem (!%p1858_p4), [#allocation6], %s1859_s4 }
  0x3e   : > { %s320_s22 = sshll.u32 (!%p1858_p4), %s311_s3, 4  ;;  %s3366_s0 = sld [smem:[#allocation30_spill]] (!%p1858_p4)  ;;  %s321_s22 = int_to_ptr.vmem [resolvable:$true] %s320_s22 }
  0x3f   : > { %s308_s19 = scalar_lea.sflag [#allocation7], %s307_s8  ;;  %s2516_s26 = smov 256  }
  0x40   : > { %s2517_s11 = smov 128   ;;  %s2518_s20 = smov 8  }
  0x41   : > { %s331_s3 = sand.u32 (%p2693_p11), 1, %s2471_s29   ;;  %s335_s7 = sadd.s32 (%p2693_p11), %s2499_s14, %s2746_s12 }
  0x42   : > { %329 = sbr.rel (!%p2693_p11) target bundleno = 79 (0x4f), region = 44  ;;  %s1862_s30 = sshll.u32 (%p2693_p11), %s331_s3, 4 }
  0x43   : > { %s3367_s1 = sld [smem:[#allocation31_spill]] (%p2693_p11)  ;;  %s333_s24 = scalar_lea.vmem (%p2693_p11), [#allocation9], %s1862_s30 }
  0x44   : > { %s317_s13 = scalar_lea.hbm %s3366_s0, %s1861_s5  ;;  %s1864_s5 = sshll.u32 (%p2693_p11), %s335_s7, 2 }
  0x45   : > { %s318_s6 = sshll.u32 %s317_s13, 4  ;;  %s319_s6 = int_to_ptr.hbm [resolvable:$true] %s318_s6 }
  0x46   : > { %2028 = dma.hbm_to_vmem [thread:$0]  (%p2664_p6), %s319_s6, 512, %s321_s22, %s308_s19, %s2516_s26, %s2517_s11, %s2518_s20  }
  0x49   : > { %s337_s8 = scalar_lea.vmem %s3367_s1, %s1864_s5 }
  0x4a   : > { %v354_v0 = vld [vmem:[%s337_s8] sm:$0xf]  ;;  %v356_v1 = vld [vmem:[%s337_s8 + $0x8] sm:$0xf]  ;;  %v358_v2 = vld [vmem:[%s337_s8 + $0x10] sm:$0xf] }
  0x4b   : > { %355 = vst [vmem:[%s333_s24] sm:$0xf] %v354_v0  ;;  %v360_v3 = vld [vmem:[%s337_s8 + $0x18] sm:$0xf] }
  0x4c   : > { %357 = vst [vmem:[%s333_s24 + $0x4] sm:$0xf] %v356_v1 }
  0x4d   : > { %359 = vst [vmem:[%s333_s24 + $0x8] sm:$0xf] %v358_v2 }
  0x4e   : > { %361 = vst [vmem:[%s333_s24 + $0xc] sm:$0xf] %v360_v3 }
  0x4f PF: > { %s394_s20 = sand.u32 1, %s2511_s17   ;;  %s396_s22 = sand.u32 1, %s2471_s29  }
  0x50   : > { %s1865_s13 = sshll.u32 %s396_s22, 4  ;;  %s402_s6 = sadd.s32 %s2499_s14, %s2746_s12 }
  0x51   : > { %s1867_s19 = sshll.u32 %s402_s6, 2  ;;  %s398_s26 = scalar_lea.vmem [#allocation10], %s1865_s13 }
  0x52   : > { %s407_s3 = sshll.u32 %s398_s26, 4  ;;  %s3368_s2 = sld [smem:[#allocation32_spill]]  ;;  %s408_s3 = int_to_ptr.vmem [resolvable:$true] %s407_s3 }
  0x53   : > { %s395_s4 = scalar_lea.sflag [#allocation11], %s394_s20  ;;  %s2519_s8 = smov 64  }
  0x54   : > { %s2520_s24 = smov 4  }
  0x58   : > { %s404_s5 = scalar_lea.hbm %s3368_s2, %s1867_s19 }
  0x59   : > { %s405_s27 = sshll.u32 %s404_s5, 4  ;;  %s406_s27 = int_to_ptr.hbm [resolvable:$true] %s405_s27 }
  0x5a   : > { %2029 = dma.hbm_to_vmem [thread:$0]  (%p2693_p11), %s406_s27, 256, %s408_s3, %s395_s4, %s2517_s11, %s2519_s8, %s2520_s24  }
  0x5b PF: > { %419 = sbr.rel (%p2735_p1) target bundleno = 1677 (0x68d), region = 89  ;;  %s2777_s12 = sand.u32 (!%p2735_p1), 1, %s2479_s9  }
  0x5c   : > { %s1869_s22 = sshll.u32 (!%p2735_p1), %s2777_s12, 5  ;;  %s422_s13 = scalar_lea.sflag (!%p2735_p1), [#allocation7], %s2777_s12 }
  0x5d   : > { %s2781_s6 = scalar_lea.vmem (!%p2735_p1), [#allocation6], %s1869_s22 }
  0x60   : > { %2446 = dma.done.wait (%p2680_p7), %s422_s13, 512  }
  0x61   : > { %2448 = vsyncadd (%p2680_p7), %s422_s13, 4294966784  ;;  %s432_s21 = sand.u32 1, %s2467_s28   ;;  %s438_s25 = sand.u32 1, %s2643_s18  }
  0x62   : > { %s2789_s20 = sshll.u32 %s432_s21, 4  ;;  %s439_s26 = scalar_lea.sflag [#allocation11], %s438_s25 }
  0x63   : > { %s434_s19 = scalar_lea.vmem [#allocation9], %s2789_s20  ;;  %s442_s3 = scalar_lea.vmem [#allocation10], %s2789_s20 }
  0x64   : > { %2450 = dma.done.wait (%p2699_p12), %s439_s26, 256  }
  0x65   : > { %2452 = vsyncadd (%p2699_p12), %s439_s26, 4294967040  ;;  %p3370_p5 = scmp.eq.s32.totalorder %s2643_s18, 0 }
  0x67   : > { %2454 = dma.done.wait (%p3370_p5), [#allocation11], 256   ;;  %p3371_p6 = pmov %p3370_p5 }
  0x68   : > { %s2801_s23 = scalar_lea.vmem [#allocation13], %s1869_s22  ;;  %s3372_s7 = sld [smem:[#allocation19_spill]] }
  0x69   : > { %2456 = vsyncadd (%p3371_p6), [#allocation11], 4294967040 }
  0x6e   : > { %p1874_p7 = scmp.ne.s32.totalorder %s3372_s7, 0 }
  0x6f   : > { %s3373_s5 = sld [smem:[#allocation33_spill]] (!%p1874_p7) }
  0x70   : > { %494 = sbr.rel (%p1874_p7) target bundleno = 267 (0x10b), region = 109 }
  0x75   : > { %v497_v4 = vld [vmem:[%s2781_s6 + $0x10] sm:$0xff]  ;;  %v498_v5 = vld [vmem:[%s2781_s6 + $0x18] sm:$0xff]  ;;  %v495_v6 = vld [vmem:[%s2781_s6] sm:$0xff]  ;;  %vm515_vm0 = vcmask 261120   ;;  %v2521_v12 = vmov -inf   ;;  %v2522_v13 = vmov 0.0  }
  0x76   : > { %v500_v7 = vpack.c.bf16 %v498_v5, %v497_v4  ;;  %v496_v8 = vld [vmem:[%s2781_s6 + $0x8] sm:$0xff]  ;;  %v1990_v11 = vld [vmem:[%s3373_s5 + $0x8] sm:$0xff]  ;;  %553 = vst [vmem:[#allocation3] sm:$0x1] %v2521_v12 }
  0x77   : > { %v499_v9 = vpack.c.bf16 %v496_v8, %v495_v6  ;;  %v1989_v10 = vld [vmem:[%s3373_s5] sm:$0xff]  ;;  %554 = vst [vmem:[#allocation3 + $0x1] sm:$0x1] %v2521_v12 }
  0x78   : > { %528 = vmatpush.bf16.msra.mxu0 %v500_v7  ;;  %2020 = vmatpush.bf16.msra.mxu1 %v500_v7  ;;  %555 = vst [vmem:[#allocation4] sm:$0x1] %v2522_v13 }
  0x79   : > { %556 = vst [vmem:[#allocation4 + $0x1] sm:$0x1] %v2522_v13 }
  0x7a   : > { %557 = vst [vmem:[#allocation5 + $0x8] sm:$0xff] %v2522_v13 }
  0x7b   : > { %558 = vst [vmem:[#allocation5 + $0x10] sm:$0xff] %v2522_v13 }
  0x7c   : > { %529 = vmatpush.bf16.msra.mxu0 %v499_v9  ;;  %2021 = vmatpush.bf16.msra.mxu1 %v499_v9  ;;  %559 = vst [vmem:[#allocation5] sm:$0xff] %v2522_v13 }
  0x7d   : > { %560 = vst [vmem:[#allocation5 + $0x18] sm:$0xff] %v2522_v13 }
  0x7f   : > { %1883 = vmatmul.msk.bf16.vlgmr.msra.gmra.mxu0 %vm515_vm0, %v1989_v10  ;;  %1884 = vmatmul.msk.bf16.vlgmr.msra.gmra.mxu1 %vm515_vm0, %v1990_v11 }
  0xfc   : > { %v531_v14 = vpop.f32.mrf.mxu0  ;;  %v536_v15 = vpop.f32.mrf.mxu1 }
  0xfd   : > { %v541_v18 = vmul.f32 0.25, %v531_v14  ;;  %v543_v19 = vmul.f32 0.25, %v536_v15 }
 0x104   : > { %v533_v16 = vpop.f32.mrf.mxu0  ;;  %v538_v17 = vpop.f32.mrf.mxu1 }
 0x105   : > { %v542_v20 = vmul.f32 0.25, %v533_v16  ;;  %v544_v21 = vmul.f32 0.25, %v538_v17 }
 0x107   : > { %v2012_v22 = vpack.c.bf16 %v542_v20, %v541_v18  ;;  %v2017_v23 = vpack.c.bf16 %v544_v21, %v543_v19 }
 0x109   : > { %2013 = vst [vmem:[#allocation2] sm:$0xff] %v2012_v22  }
 0x10a   : > { %2019 = vst [vmem:[#allocation2 + $0x8] sm:$0xff] %v2017_v23  }
 0x10b PF: > { %v1991_v24 = vld [vmem:[%s434_s19] sm:$0xff]  ;;  %v1992_v25 = vld [vmem:[%s434_s19 + $0x8] sm:$0xff]  ;;  %vm601_vm1 = vcmask 130048   ;;  %s3374_s8 = sld [smem:[#allocation19_spill]] }
 0x10c   : > { %2171 = vxpose.binary.xlu0.c.b16.start.end [1/2] (short) %v1992_v25, %v1991_v24, 128 }
 0x110   : > { %v1995_v26 = vld [vmem:[#allocation2] sm:$0xff] }
 0x111   : > { %633 = vmatpush.bf16.msra.mxu0 %v1995_v26  ;;  %2022 = vmatpush.bf16.msra.mxu2 %v1995_v26  ;;  %v1996_v27 = vld [vmem:[#allocation2 + $0x8] sm:$0xff]  ;;  %p1925_p11 = scmp.ne.s32.totalorder %s3374_s8, 1 }
 0x112   : > { %734 = vmatpush.bf16.msra.mxu1 %v1996_v27  ;;  %2023 = vmatpush.bf16.msra.mxu3 %v1996_v27  ;;  %s3375_s13 = sld [smem:[#allocation35_spill]] (!%p1925_p11) }
 0x113   : > { %s3381_s18 = sld [smem:[#allocation34_spill]] (!%p1925_p11) }
 0x114   : > { %s3382_s24 = sld [smem:[#allocation36_spill]] (!%p1925_p11) }
 0x118   : > { %s3376_s21 = smov (!%p1925_p11), %s3375_s13 }
 0x1b8   : > { %v2172_v28 = vpop.trf.xlu0 }
 0x1b9   : > { %1893 = vmatmul.msk.bf16.vlgmr.msra.gmra.mxu0 %vm601_vm1, %v2172_v28 }
 0x1c0   : > { %v2173_v29 = vpop.trf.xlu0 }
 0x1c1   : > { %1909 = vmatmul.msk.bf16.vlgmr.msra.gmra.mxu1 %vm601_vm1, %v2173_v29 }
 0x1c8   : > { %v2174_v30 = vpop.trf.xlu0 }
 0x1c9   : > { %1894 = vmatmul.msk.bf16.gmra.mxu0 %vm601_vm1, %v2174_v30 }
 0x1d0   : > { %v2175_v31 = vpop.trf.xlu0 }
 0x1d1   : > { %1910 = vmatmul.msk.bf16.gmra.mxu1 %vm601_vm1, %v2175_v31 }
 0x1d8   : > { %v2176_v32 = vpop.trf.xlu0 }
 0x1d9   : > { %1895 = vmatmul.msk.bf16.gmra.mxu0 %vm601_vm1, %v2176_v32 }
 0x1e0   : > { %v2177_v33 = vpop.trf.xlu0 }
 0x1e1   : > { %1911 = vmatmul.msk.bf16.gmra.mxu1 %vm601_vm1, %v2177_v33 }
 0x1e8   : > { %v2178_v34 = vpop.trf.xlu0 }
 0x1e9   : > { %1896 = vmatmul.msk.bf16.gmra.mxu0 %vm601_vm1, %v2178_v34 }
 0x1f0   : > { %v2179_v35 = vpop.trf.xlu0 }
 0x1f1   : > { %1912 = vmatmul.msk.bf16.gmra.mxu1 %vm601_vm1, %v2179_v35 }
 0x1f8   : > { %v2180_v36 = vpop.trf.xlu0 }
 0x1f9   : > { %1897 = vmatmul.msk.bf16.gmra.mxu0 %vm601_vm1, %v2180_v36 }
 0x200   : > { %v2181_v37 = vpop.trf.xlu0 }
 0x201   : > { %1913 = vmatmul.msk.bf16.gmra.mxu1 %vm601_vm1, %v2181_v37 }
 0x208   : > { %v2182_v38 = vpop.trf.xlu0 }
 0x209   : > { %1898 = vmatmul.msk.bf16.vlgmr.msra.gmra.mxu2 %vm601_vm1, %v2182_v38 }
 0x210   : > { %v2183_v39 = vpop.trf.xlu0 }
 0x211   : > { %1914 = vmatmul.msk.bf16.vlgmr.msra.gmra.mxu3 %vm601_vm1, %v2183_v39 }
 0x218   : > { %v2184_v40 = vpop.trf.xlu0 }
 0x219   : > { %1899 = vmatmul.msk.bf16.gmra.mxu2 %vm601_vm1, %v2184_v40 }
 0x220   : > { %v2185_v41 = vpop.trf.xlu0 }
 0x221   : > { %1915 = vmatmul.msk.bf16.gmra.mxu3 %vm601_vm1, %v2185_v41 }
 0x228   : > { %v2186_v42 = vpop.trf.xlu0 }
 0x229   : > { %1900 = vmatmul.msk.bf16.gmra.mxu2 %vm601_vm1, %v2186_v42 }
 0x230   : > { %v2187_v43 = vpop.trf.xlu0 }
 0x231   : > { %1916 = vmatmul.msk.bf16.gmra.mxu3 %vm601_vm1, %v2187_v43 }
 0x236   : > { %v2834_v44 = vpop.f32.mrf.mxu0 }
 0x23e   : > { %v2836_v45 = vpop.f32.mrf.mxu1  ;;  %v2838_v46 = vpop.f32.mrf.mxu0 }
 0x246   : > { %v2840_v47 = vpop.f32.mrf.mxu1  ;;  %v2842_v48 = vpop.f32.mrf.mxu0 }
 0x247   : > { %v778_v4 = vmax.f32 %v2834_v44, %v2842_v48 }
 0x24e   : > { %v2844_v49 = vpop.f32.mrf.mxu1  ;;  %v2846_v50 = vpop.f32.mrf.mxu0 }
 0x24f   : > { %v779_v5 = vmax.f32 %v2838_v46, %v2846_v50  ;;  %v799_v16 = vmax.f32 %v2836_v45, %v2844_v49 }
 0x256   : > { %v2848_v51 = vpop.f32.mrf.mxu1  ;;  %v2850_v52 = vpop.f32.mrf.mxu0 }
 0x257   : > { %v780_v7 = vmax.f32 %v778_v4, %v2850_v52  ;;  %v800_v17 = vmax.f32 %v2840_v47, %v2848_v51 }
 0x25e   : > { %v2852_v53 = vpop.f32.mrf.mxu1  ;;  %v2854_v54 = vpop.f32.mrf.mxu0 }
 0x25f   : > { %v781_v8 = vmax.f32 %v779_v5, %v2854_v54  ;;  %v801_v20 = vmax.f32 %v799_v16, %v2852_v53 }
 0x266   : > { %v2856_v55 = vpop.f32.mrf.mxu1  ;;  %v2860_v57 = vpop.f32.mrf.mxu0 }
 0x267   : > { %v782_v12 = vmax.f32 %v780_v7, %v2860_v57  ;;  %v802_v21 = vmax.f32 %v800_v17, %v2856_v55 }
 0x26e   : > { %v2866_v60 = vpop.f32.mrf.mxu1  ;;  %v2868_v61 = vpop.f32.mrf.mxu0 }
 0x26f   : > { %v783_v13 = vmax.f32 %v781_v8, %v2868_v61  ;;  %v803_v27 = vmax.f32 %v801_v20, %v2866_v60  ;;  %v2930_v8 = vld [vmem:[#allocation3] sm:$0x1] }
 0x276   : > { %v2874_v0 = vpop.f32.mrf.mxu1  ;;  %v2876_v1 = vpop.f32.mrf.mxu0 }
 0x277   : > { %v784_v14 = vmax.f32 %v782_v12, %v2876_v1  ;;  %v804_v28 = vmax.f32 %v802_v21, %v2874_v0 }
 0x27e   : > { %v2886_v6 = vpop.f32.mrf.mxu1  ;;  %v2890_v9 = vpop.f32.mrf.mxu0 }
 0x27f   : > { %v785_v15 = vmax.f32 %v783_v13, %v2890_v9  ;;  %v805_v31 = vmax.f32 %v803_v27, %v2886_v6 }
 0x286   : > { %v2908_v22 = vpop.f32.mrf.mxu1 }
 0x287   : > { %v806_v32 = vmax.f32 %v804_v28, %v2908_v22 }
 0x28c   : > { %v2858_v56 = vpop.f32.mrf.mxu2 }
 0x28d   : > { %v786_v18 = vmax.f32 %v784_v14, %v2858_v56 }
 0x294   : > { %v2862_v58 = vpop.f32.mrf.mxu2  ;;  %v2864_v59 = vpop.f32.mrf.mxu3 }
 0x295   : > { %v787_v19 = vmax.f32 %v785_v15, %v2862_v58  ;;  %v807_v34 = vmax.f32 %v805_v31, %v2864_v59 }
 0x29c   : > { %v2870_v62 = vpop.f32.mrf.mxu2  ;;  %v2872_v63 = vpop.f32.mrf.mxu3 }
 0x29d   : > { %v788_v23 = vmax.f32 %v786_v18, %v2870_v62  ;;  %v808_v35 = vmax.f32 %v806_v32, %v2872_v63 }
 0x2a4   : > { %v2878_v2 = vpop.f32.mrf.mxu2  ;;  %v2880_v3 = vpop.f32.mrf.mxu3 }
 0x2a5   : > { %v789_v24 = vmax.f32 %v787_v19, %v2878_v2  ;;  %v809_v37 = vmax.f32 %v807_v34, %v2880_v3 }
 0x2ac   : > { %v2892_v10 = vpop.f32.mrf.mxu2  ;;  %v2894_v11 = vpop.f32.mrf.mxu3 }
 0x2ad   : > { %v790_v29 = vmax.f32 %v788_v23, %v2892_v10  ;;  %v810_v38 = vmax.f32 %v808_v35, %v2894_v11 }
 0x2b4   : > { %v2912_v25 = vpop.f32.mrf.mxu2  ;;  %v2914_v26 = vpop.f32.mrf.mxu3 }
 0x2b5   : > { %v791_v30 = vmax.f32 %v789_v24, %v2912_v25  ;;  %v811_v42 = vmax.f32 %v809_v37, %v2914_v26 }
 0x2b7   : > { %v792_v33 = vmax.f32 %v790_v29, %v791_v30 }
 0x2b9   : > { %v793_v36 = vrot.slane %v792_v33, 4 }
 0x2bb   : > { %v794_v39 = vmax.f32 %v792_v33, %v793_v36 }
 0x2bc   : > { %v2926_v40 = vpop.f32.mrf.mxu3 }
 0x2bd   : > { %v795_v41 = vrot.slane %v794_v39, 2  ;;  %v812_v43 = vmax.f32 %v810_v38, %v2926_v40 }
 0x2bf   : > { %v796_v4 = vmax.f32 %v794_v39, %v795_v41  ;;  %v813_v5 = vmax.f32 %v811_v42, %v812_v43 }
 0x2c1   : > { %v797_v7 = vrot.slane %v796_v4, 1  ;;  %v814_v12 = vrot.slane %v813_v5, 4 }
 0x2c3   : > { %v798_v13 = vmax.f32 %v796_v4, %v797_v7  ;;  %v815_v15 = vmax.f32 %v813_v5, %v814_v12 }
 0x2c5   : > { %v2933_v14 = vmax.f32 %v2930_v8, %v798_v13  ;;  %v816_v21 = vrot.slane %v815_v15, 2 }
 0x2c7   : > { %v830_v16 = vperm.slane %v2933_v14, 0  ;;  %1170 = vst [vmem:[#allocation3] sm:$0x1] %v2933_v14 }
 0x2c9   : > { %v834_v17 = vsub.f32 %v2834_v44, %v830_v16  ;;  %v835_v18 = vsub.f32 %v2838_v46, %v830_v16  ;;  %v836_v19 = vsub.f32 %v2842_v48, %v830_v16  ;;  %v837_v20 = vsub.f32 %v2846_v50, %v830_v16 }
 0x2ca   : > { %v838_v23 = vsub.f32 %v2850_v52, %v830_v16  ;;  %v839_v24 = vsub.f32 %v2854_v54, %v830_v16  ;;  %v840_v27 = vsub.f32 %v2860_v57, %v830_v16  ;;  %v841_v31 = vsub.f32 %v2868_v61, %v830_v16 }
 0x2cb   : > { %v866_v28 = vmul.f32 1.442695, %v834_v17  ;;  %v868_v29 = vmul.f32 1.442695, %v835_v18  ;;  %v870_v30 = vmul.f32 1.442695, %v836_v19  ;;  %v817_v44 = vmax.f32 %v815_v15, %v816_v21 }
 0x2cc   : > { %v872_v32 = vmul.f32 1.442695, %v837_v20  ;;  %v842_v46 = vsub.f32 %v2876_v1, %v830_v16  ;;  %v874_v48 = vmul.f32 1.442695, %v838_v23  ;;  %v843_v50 = vsub.f32 %v2890_v9, %v830_v16  ;;  %v2950_v1 = vld [vmem:[#allocation3 + $0x1] sm:$0x1] }
 0x2cd   : > { %2188 = vpow2.f32 %v866_v28  ;;  %v876_v33 = vmul.f32 1.442695, %v839_v24  ;;  %v844_v52 = vsub.f32 %v2858_v56, %v830_v16  ;;  %v878_v54 = vmul.f32 1.442695, %v840_v27 }
 0x2ce   : > { %2190 = vpow2.f32 %v868_v29  ;;  %v845_v57 = vsub.f32 %v2862_v58, %v830_v16  ;;  %v880_v34 = vmul.f32 1.442695, %v841_v31  ;;  %v818_v35 = vrot.slane %v817_v44, 1 }
 0x2cf   : > { %2192 = vpow2.f32 %v870_v30  ;;  %v846_v61 = vsub.f32 %v2870_v62, %v830_v16  ;;  %v882_v36 = vmul.f32 1.442695, %v842_v46  ;;  %v847_v37 = vsub.f32 %v2878_v2, %v830_v16 }
 0x2d0   : > { %2194 = vpow2.f32 %v872_v32  ;;  %v884_v9 = vmul.f32 1.442695, %v843_v50  ;;  %v819_v38 = vmax.f32 %v817_v44, %v818_v35  ;;  %v848_v56 = vsub.f32 %v2892_v10, %v830_v16 }
 0x2d1   : > { %2196 = vpow2.f32 %v874_v48  ;;  %v886_v58 = vmul.f32 1.442695, %v844_v52  ;;  %v849_v42 = vsub.f32 %v2912_v25, %v830_v16  ;;  %v888_v62 = vmul.f32 1.442695, %v845_v57 }
 0x2d2   : > { %2198 = vpow2.f32 %v876_v33  ;;  %v2960_v43 = vmax.f32 %v2950_v1, %v819_v38  ;;  %v890_v2 = vmul.f32 1.442695, %v846_v61  ;;  %v892_v10 = vmul.f32 1.442695, %v847_v37 }
 0x2d3   : > { %v2953_v39 = vpop.eup %2188  ;;  %2200 = vpow2.f32 %v878_v54  ;;  %v894_v13 = vmul.f32 1.442695, %v848_v56  ;;  %v896_v17 = vmul.f32 1.442695, %v849_v42 }
 0x2d4   : > { %v2956_v41 = vpop.eup %2190  ;;  %2202 = vpow2.f32 %v880_v34  ;;  %v2969_v12 = vperm.slane %v2960_v43, 0  ;;  %1171 = vst [vmem:[#allocation3 + $0x1] sm:$0x1] %v2960_v43 }
 0x2d5   : > { %v2962_v4 = vpop.eup %2192  ;;  %2204 = vpow2.f32 %v882_v36  ;;  %v966_v5 = vadd.f32 %v2956_v41, %v2953_v39 }
 0x2d6   : > { %v2966_v7 = vpop.eup %2194  ;;  %2206 = vpow2.f32 %v884_v9  ;;  %v850_v20 = vsub.f32 %v2836_v45, %v2969_v12  ;;  %v851_v23 = vsub.f32 %v2840_v47, %v2969_v12  ;;  %v852_v24 = vsub.f32 %v2844_v49, %v2969_v12 }
 0x2d7   : > { %v2972_v25 = vpop.eup %2196  ;;  %2208 = vpow2.f32 %v886_v58  ;;  %v967_v15 = vadd.f32 %v2962_v4, %v966_v5  ;;  %v853_v27 = vsub.f32 %v2848_v51, %v2969_v12  ;;  %v854_v45 = vsub.f32 %v2852_v53, %v2969_v12 }
 0x2d8   : > { %v2975_v16 = vpop.eup %2198  ;;  %2210 = vpow2.f32 %v888_v62  ;;  %v855_v30 = vsub.f32 %v2856_v55, %v2969_v12  ;;  %v856_v47 = vsub.f32 %v2866_v60, %v2969_v12  ;;  %v857_v49 = vsub.f32 %v2874_v0, %v2969_v12 }
 0x2d9   : > { %v2977_v18 = vpop.eup %2200  ;;  %2212 = vpow2.f32 %v890_v2  ;;  %v968_v19 = vadd.f32 %v2966_v7, %v967_v15  ;;  %v858_v51 = vsub.f32 %v2886_v6, %v2969_v12  ;;  %v859_v53 = vsub.f32 %v2908_v22, %v2969_v12 }
 0x2da   : > { %v2982_v21 = vpop.eup %2202  ;;  %2214 = vpow2.f32 %v892_v10  ;;  %v860_v55 = vsub.f32 %v2864_v59, %v2969_v12  ;;  %v861_v46 = vsub.f32 %v2872_v63, %v2969_v12  ;;  %v862_v60 = vsub.f32 %v2880_v3, %v2969_v12 }
 0x2db   : > { %v2990_v28 = vpop.eup %2204  ;;  %2216 = vpow2.f32 %v894_v13  ;;  %v969_v29 = vadd.f32 %v2972_v25, %v968_v19  ;;  %v898_v0 = vmul.f32 1.442695, %v850_v20  ;;  %v900_v50 = vmul.f32 1.442695, %v851_v23 }
 0x2dc   : > { %v2997_v31 = vpop.eup %2206  ;;  %2218 = vpow2.f32 %v896_v17  ;;  %v902_v33 = vmul.f32 1.442695, %v852_v24  ;;  %v863_v54 = vsub.f32 %v2894_v11, %v2969_v12  ;;  %v864_v57 = vsub.f32 %v2914_v26, %v2969_v12 }
 0x2dd   : > { %v2209_v32 = vpop.eup %2208  ;;  %v970_v44 = vadd.f32 %v2975_v16, %v969_v29  ;;  %v865_v59 = vsub.f32 %v2926_v40, %v2969_v12  ;;  %2220 = vpow2.f32 %v898_v0  ;;  %v904_v34 = vmul.f32 1.442695, %v853_v27 }
 0x2de   : > { %v2211_v48 = vpop.eup %2210  ;;  %v906_v3 = vmul.f32 1.442695, %v854_v45  ;;  %v940_v35 = vpack.c.bf16 %v2209_v32, %v2209_v32  ;;  %2222 = vpow2.f32 %v900_v50  ;;  %v908_v37 = vmul.f32 1.442695, %v855_v30 }
 0x2df   : > { %v2213_v6 = vpop.eup %2212  ;;  %v971_v52 = vadd.f32 %v2977_v18, %v970_v44  ;;  %v910_v9 = vmul.f32 1.442695, %v856_v47  ;;  %2224 = vpow2.f32 %v902_v33  ;;  %v912_v26 = vmul.f32 1.442695, %v857_v49 }
 0x2e0   : > { %v3021_v63 = vpop.eup %2214  ;;  %v914_v38 = vmul.f32 1.442695, %v858_v51  ;;  %v918_v56 = vmul.f32 1.442695, %v860_v55  ;;  %v920_v58 = vmul.f32 1.442695, %v861_v46  ;;  %2226 = vpow2.f32 %v904_v34 }
 0x2e1   : > { %v3023_v61 = vpop.eup %2216  ;;  %v972_v36 = vadd.f32 %v2982_v21, %v971_v52  ;;  %v922_v42 = vmul.f32 1.442695, %v862_v60  ;;  %v924_v62 = vmul.f32 1.442695, %v863_v54  ;;  %v942_v10 = vpack.c.bf16 %v2213_v6, %v2213_v6 }
 0x2e2   : > { %v3026_v11 = vpop.eup %2218  ;;  %v944_v2 = vpack.c.bf16 %v3023_v61, %v3023_v61  ;;  %2228 = vpow2.f32 %v906_v3  ;;  %v943_v15 = vpack.c.bf16 %v3021_v63, %v3021_v63  ;;  %v941_v17 = vpack.c.bf16 %v2211_v48, %v2211_v48 }
 0x2e3   : > { %v973_v40 = vadd.f32 %v2990_v28, %v972_v36  ;;  %v945_v5 = vpack.c.bf16 %v3026_v11, %v3026_v11  ;;  %v3036_v19 = vpop.eup %2220  ;;  %2230 = vpow2.f32 %v908_v37  ;;  %v1046_v24 = vunpack.c.l.b16 %v942_v10 }
 0x2e4   : > { %v1048_v20 = vunpack.c.l.b16 %v944_v2  ;;  %v3038_v27 = vpop.eup %2222  ;;  %2232 = vpow2.f32 %v910_v9  ;;  %v1047_v45 = vunpack.c.l.b16 %v943_v15  ;;  %v1044_v30 = vunpack.c.l.b16 %v940_v35 }
 0x2e5   : > { %v974_v13 = vadd.f32 %v2997_v31, %v973_v40  ;;  %v1049_v23 = vunpack.c.l.b16 %v945_v5  ;;  %v3040_v47 = vpop.eup %2224  ;;  %2234 = vpow2.f32 %v912_v26  ;;  %v987_v49 = vadd.f32 %v3038_v27, %v3036_v19 }
 0x2e6   : > { %v1045_v44 = vunpack.c.l.b16 %v941_v17  ;;  %2236 = vpow2.f32 %v914_v38  ;;  %v926_v46 = vmul.f32 1.442695, %v864_v57  ;;  %v928_v60 = vmul.f32 1.442695, %v865_v59  ;;  %v3044_v0 = vpop.eup %2226 }
 0x2e7   : > { %v975_v29 = vadd.f32 %v2209_v32, %v974_v13  ;;  %v1057_v51 = vpack.c.b16 %v1049_v23, %v1048_v20  ;;  %2238 = vpow2.f32 %v918_v56  ;;  %v988_v32 = vadd.f32 %v3040_v47, %v987_v49 }
 0x2e8   : > { %v1056_v50 = vpack.c.b16 %v1047_v45, %v1046_v24  ;;  %v1055_v33 = vpack.c.b16 %v1045_v44, %v1044_v30  ;;  %v3047_v52 = vpop.eup %2228  ;;  %2240 = vpow2.f32 %v920_v58  ;;  %v938_v34 = vpack.c.bf16 %v2990_v28, %v2990_v28 }
 0x2e9   : > { %v976_v55 = vadd.f32 %v2211_v48, %v975_v29  ;;  %1066 = vmatpush.bf16.msrb.mxu2 %v1057_v51  ;;  %v936_v48 = vpack.c.bf16 %v2977_v18, %v2977_v18  ;;  %v3053_v57 = vpop.eup %2230  ;;  %2242 = vpow2.f32 %v922_v42  ;;  %v989_v59 = vadd.f32 %v3044_v0, %v988_v32 }
 0x2ea   : > { %v939_v3 = vpack.c.bf16 %v2997_v31, %v2997_v31  ;;  %v937_v35 = vpack.c.bf16 %v2982_v21, %v2982_v21  ;;  %v3060_v36 = vpop.eup %2232  ;;  %v916_v28 = vmul.f32 1.442695, %v859_v53  ;;  %2244 = vpow2.f32 %v924_v62 }
 0x2eb   : > { %v977_v54 = vadd.f32 %v2213_v6, %v976_v55  ;;  %v1040_v18 = vunpack.c.l.b16 %v936_v48  ;;  %v3066_v37 = vpop.eup %2234  ;;  %2246 = vpow2.f32 %v926_v46  ;;  %v990_v9 = vadd.f32 %v3047_v52, %v989_v59 }
 0x2ec   : > { %v1041_v31 = vunpack.c.l.b16 %v937_v35  ;;  %v3069_v26 = vpop.eup %2236  ;;  %2248 = vpow2.f32 %v928_v60  ;;  %v1042_v56 = vunpack.c.l.b16 %v938_v34  ;;  %v1043_v22 = vunpack.c.l.b16 %v939_v3 }
 0x2ed   : > { %v978_v6 = vadd.f32 %v3021_v63, %v977_v54  ;;  %1067 = vmatpush.bf16.msrb.mxu2 %v1056_v50  ;;  %v2239_v38 = vpop.eup %2238  ;;  %v991_v63 = vadd.f32 %v3053_v57, %v990_v9  ;;  %2250 = vpow2.f32 %v916_v28  ;;  %v934_v13 = vpack.c.bf16 %v2972_v25, %v2972_v25 }
 0x2ee   : > { %v1053_v12 = vpack.c.b16 %v1041_v31, %v1040_v18  ;;  %v2241_v53 = vpop.eup %2240  ;;  %v1054_v10 = vpack.c.b16 %v1043_v22, %v1042_v56  ;;  %v935_v15 = vpack.c.bf16 %v2975_v16, %v2975_v16  ;;  %v822_v23 = vsub.f32 %v2930_v8, %v2933_v14 }
 0x2ef   : > { %v979_v21 = vadd.f32 %v3023_v61, %v978_v6  ;;  %v2243_v58 = vpop.eup %2242  ;;  %v992_v42 = vadd.f32 %v3060_v36, %v991_v63  ;;  %v932_v25 = vpack.c.bf16 %v2962_v4, %v2962_v4  ;;  %v933_v16 = vpack.c.bf16 %v2966_v7, %v2966_v7 }
 0x2f0   : > { %v2245_v62 = vpop.eup %2244  ;;  %v958_v45 = vpack.c.bf16 %v2243_v58, %v2243_v58  ;;  %v1038_v60 = vunpack.c.l.b16 %v934_v13  ;;  %v1039_v32 = vunpack.c.l.b16 %v935_v15  ;;  %v956_v8 = vpack.c.bf16 %v2239_v38, %v2239_v38 }
 0x2f1   : > { %v980_v40 = vadd.f32 %v3026_v11, %v979_v21  ;;  %1068 = vmatpush.bf16.msrb.mxu2 %v1055_v33  ;;  %v2247_v5 = vpop.eup %2246  ;;  %v993_v61 = vadd.f32 %v3066_v37, %v992_v42  ;;  %v959_v30 = vpack.c.bf16 %v2245_v62, %v2245_v62  ;;  %v957_v14 = vpack.c.bf16 %v2241_v53, %v2241_v53 }
 0x2f2   : > { %v2249_v17 = vpop.eup %2248  ;;  %v960_v11 = vpack.c.bf16 %v2247_v5, %v2247_v5  ;;  %v824_v50 = vmul.f32 1.442695, %v822_v23  ;;  %v1114_v34 = vunpack.c.l.b16 %v958_v45  ;;  %v930_v3 = vpack.c.bf16 %v2953_v39, %v2953_v39 }
 0x2f3   : > { %v981_v2 = vrot.slane %v980_v40, 4  ;;  %v994_v24 = vadd.f32 %v3069_v26, %v993_v61  ;;  %v961_v29 = vpack.c.bf16 %v2249_v17, %v2249_v17  ;;  %v2251_v49 = vpop.eup %2250  ;;  %v1115_v48 = vunpack.c.l.b16 %v959_v30  ;;  %v962_v61 = vld [vmem:[#allocation4] sm:$0x1] }
 0x2f4   : > { %v1116_v44 = vunpack.c.l.b16 %v960_v11  ;;  %v931_v4 = vpack.c.bf16 %v2956_v41, %v2956_v41  ;;  %v1052_v35 = vpack.c.b16 %v1039_v32, %v1038_v60  ;;  %v1036_v6 = vunpack.c.l.b16 %v932_v25 }
 0x2f5   : > { %v982_v20 = vadd.f32 %v981_v2, %v980_v40  ;;  %1069 = vmatpush.bf16.msrb.mxu2 %v1054_v10  ;;  %v995_v55 = vadd.f32 %v2251_v49, %v994_v24  ;;  %v1117_v46 = vunpack.c.l.b16 %v961_v29  ;;  %v1037_v28 = vunpack.c.l.b16 %v933_v16  ;;  %v1993_v24 = vld [vmem:[%s442_s3] sm:$0xff] }
 0x2f6   : > { %v1112_v18 = vunpack.c.l.b16 %v956_v8  ;;  %v954_v9 = vpack.c.bf16 %v3069_v26, %v3069_v26  ;;  %v955_v31 = vpack.c.bf16 %v2251_v49, %v2251_v49  ;;  %v1113_v63 = vunpack.c.l.b16 %v957_v14 }
 0x2f7   : > { %v983_v51 = vrot.slane %v982_v20, 2  ;;  %v996_v33 = vadd.f32 %v2239_v38, %v995_v55  ;;  %v1125_v54 = vpack.c.b16 %v1117_v46, %v1116_v44  ;;  %v1124_v38 = vpack.c.b16 %v1115_v48, %v1114_v34  ;;  %v1994_v48 = vld [vmem:[%s442_s3 + $0x8] sm:$0xff] }
 0x2f8   : > { %2252 = vpow2.f32 %v824_v50  ;;  %v1051_v22 = vpack.c.b16 %v1037_v28, %v1036_v6  ;;  %v1034_v41 = vunpack.c.l.b16 %v930_v3  ;;  %v1111_v40 = vunpack.c.l.b16 %v955_v31  ;;  %v1149_v6 = vld [vmem:[#allocation5 + $0x10] sm:$0xff] }
 0x2f9   : > { %1070 = vmatpush.bf16.msrb.mxu2 %v1053_v12  ;;  %v984_v59 = vadd.f32 %v983_v51, %v982_v20  ;;  %v997_v7 = vadd.f32 %v2241_v53, %v996_v33  ;;  %1134 = vmatpush.bf16.msrb.mxu3 %v1125_v54  ;;  %v1035_v12 = vunpack.c.l.b16 %v931_v4  ;;  %v1110_v53 = vunpack.c.l.b16 %v954_v9  ;;  %v963_v33 = vld [vmem:[#allocation4 + $0x1] sm:$0x1] }
 0x2fa   : > { %v952_v42 = vpack.c.bf16 %v3060_v36, %v3060_v36  ;;  %v1123_v26 = vpack.c.b16 %v1113_v63, %v1112_v18  ;;  %v950_v23 = vpack.c.bf16 %v3047_v52, %v3047_v52  ;;  %v823_v45 = vsub.f32 %v2950_v1, %v2960_v43 }
 0x2fb   : > { %v998_v21 = vadd.f32 %v2243_v58, %v997_v7  ;;  %v985_v56 = vrot.slane %v984_v59, 1  ;;  %v953_v58 = vpack.c.bf16 %v3066_v37, %v3066_v37  ;;  %v1050_v15 = vpack.c.b16 %v1035_v12, %v1034_v41 }
 0x2fc   : > { %v1122_v20 = vpack.c.b16 %v1111_v40, %v1110_v53  ;;  %v1108_v11 = vunpack.c.l.b16 %v952_v42  ;;  %v951_v37 = vpack.c.bf16 %v3053_v57, %v3053_v57  ;;  %v1106_v49 = vunpack.c.l.b16 %v950_v23 }
 0x2fd   : > { %1071 = vmatpush.bf16.msrb.mxu2 %v1052_v35  ;;  %v999_v39 = vadd.f32 %v2245_v62, %v998_v21  ;;  %1135 = vmatpush.bf16.msrb.mxu3 %v1124_v38  ;;  %v986_v10 = vadd.f32 %v985_v56, %v984_v59  ;;  %v1109_v29 = vunpack.c.l.b16 %v953_v58  ;;  %v948_v52 = vpack.c.bf16 %v3040_v47, %v3040_v47  ;;  %v1150_v21 = vld [vmem:[#allocation5] sm:$0xff] }
 0x2fe   : > { %v2253_v13 = vpop.eup %2252  ;;  %v949_v51 = vpack.c.bf16 %v3044_v0, %v3044_v0  ;;  %v1107_v16 = vunpack.c.l.b16 %v951_v37  ;;  %v826_v55 = vmul.f32 1.442695, %v823_v45  ;;  %v946_v1 = vpack.c.bf16 %v3036_v19, %v3036_v19 }
 0x2ff   : > { %v1000_v2 = vadd.f32 %v2247_v5, %v999_v39  ;;  %v964_v36 = vmul.f32 %v2253_v13, %v962_v61  ;;  %v1121_v25 = vpack.c.b16 %v1109_v29, %v1108_v11  ;;  %v1104_v46 = vunpack.c.l.b16 %v948_v52  ;;  %v1151_v39 = vld [vmem:[#allocation5 + $0x18] sm:$0xff] }
 0x300   : > { %v1120_v43 = vpack.c.b16 %v1107_v16, %v1106_v49  ;;  %v1105_v60 = vunpack.c.l.b16 %v949_v51  ;;  %v947_v47 = vpack.c.bf16 %v3038_v27, %v3038_v27  ;;  %2254 = vpow2.f32 %v826_v55  ;;  %v1148_v27 = vld [vmem:[#allocation5 + $0x8] sm:$0xff] }
 0x301   : > { %1072 = vmatpush.bf16.msrb.mxu2 %v1051_v22  ;;  %v1001_v62 = vadd.f32 %v2249_v17, %v1000_v2  ;;  %1136 = vmatpush.bf16.msrb.mxu3 %v1123_v26  ;;  %v1008_v17 = vadd.f32 %v986_v10, %v964_v36  ;;  %v1102_v8 = vunpack.c.l.b16 %v946_v1  ;;  %v1154_v3 = vperm.slane %v2253_v13, 0 }
 0x302   : > { %v1119_v32 = vpack.c.b16 %v1105_v60, %v1104_v46  ;;  %v1103_v14 = vunpack.c.l.b16 %v947_v47 }
 0x303   : > { %v1002_v5 = vrot.slane %v1001_v62, 4  ;;  %1010 = vst [vmem:[#allocation4] sm:$0x1] %v1008_v17  ;;  %v1158_v4 = vmul.f32 %v1154_v3, %v1148_v27  ;;  %v1159_v28 = vmul.f32 %v1154_v3, %v1149_v6 }
 0x304   : > { %v1118_v34 = vpack.c.b16 %v1103_v14, %v1102_v8 }
 0x305   : > { %1073 = vmatpush.bf16.msrb.mxu2 %v1050_v15  ;;  %v1003_v30 = vadd.f32 %v1002_v5, %v1001_v62  ;;  %1137 = vmatpush.bf16.msrb.mxu3 %v1122_v20 }
 0x306   : > { %v2255_v50 = vpop.eup %2254 }
 0x307   : > { %v1004_v44 = vrot.slane %v1003_v30, 2  ;;  %v965_v59 = vmul.f32 %v2255_v50, %v963_v33  ;;  %v1155_v31 = vperm.slane %v2255_v50, 0 }
 0x308   : > { %1074 = vmatmul.bf16.vlgmr.msrb.gmra.mxu2 %v1993_v24 }
 0x309   : > { %1138 = vmatpush.bf16.msrb.mxu3 %v1121_v25  ;;  %v1005_v57 = vadd.f32 %v1004_v44, %v1003_v30  ;;  %v1160_v38 = vmul.f32 %v1155_v31, %v1150_v21  ;;  %v1161_v22 = vmul.f32 %v1155_v31, %v1151_v39 }
 0x30b   : > { %v1006_v0 = vrot.slane %v1005_v57, 1 }
 0x30d   : > { %1139 = vmatpush.bf16.msrb.mxu3 %v1120_v43  ;;  %v1007_v54 = vadd.f32 %v1006_v0, %v1005_v57 }
 0x30f   : > { %v1009_v19 = vadd.f32 %v1007_v54, %v965_v59 }
 0x311   : > { %1140 = vmatpush.bf16.msrb.mxu3 %v1119_v32  ;;  %1011 = vst [vmem:[#allocation4 + $0x1] sm:$0x1] %v1009_v19 }
 0x315   : > { %1141 = vmatpush.bf16.msrb.mxu3 %v1118_v34 }
 0x318   : > { %1142 = vmatmul.bf16.vlgmr.msrb.gmra.mxu3 %v1994_v48 }
 0x38b   : > { %v1075_v7 = vpop.f32.mrf.mxu2 }
 0x38c   : > { %v1162_v35 = vadd.f32 %v1158_v4, %v1075_v7 }
 0x38e   : > { %1166 = vst [vmem:[#allocation5 + $0x8] sm:$0xff] %v1162_v35 }
 0x393   : > { %v1077_v18 = vpop.f32.mrf.mxu2 }
 0x394   : > { %v1163_v9 = vadd.f32 %v1159_v28, %v1077_v18 }
 0x396   : > { %1167 = vst [vmem:[#allocation5 + $0x10] sm:$0xff] %v1163_v9 }
 0x39b   : > { %v1143_v63 = vpop.f32.mrf.mxu3 }
 0x39c   : > { %v1164_v56 = vadd.f32 %v1160_v38, %v1143_v63 }
 0x39e   : > { %1168 = vst [vmem:[#allocation5] sm:$0xff] %v1164_v56 }
 0x3a2   : > { %1175 = sbr.rel (%p1925_p11) target bundleno = 1652 (0x674), region = 113 }
 0x3a3   : > { %v1145_v41 = vpop.f32.mrf.mxu3 }
 0x3a4   : > { %v1165_v12 = vadd.f32 %v1161_v22, %v1145_v41 }
 0x3a6   : > { %1169 = vst [vmem:[#allocation5 + $0x18] sm:$0xff] %v1165_v12 }
 0x3a7   : > { %v1189_v53 = vld [vmem:[#allocation4 + $0x1] sm:$0x1]  ;;  %v2523_v40 = vmov 0   ;;  %v1188_v42 = vld [vmem:[#allocation4] sm:$0x1]  ;;  %v3119_v2 = vld [vmem:[%s3375_s13] sm:$0xff] }
 0x3a8   : > { %2269 = vrcp.f32 %v1189_v53  ;;  %2256 = vset.pattern.permute.xlu0 %v2523_v40  ;;  %2257 = vset.pattern.permute.xlu1 %v2523_v40  ;;  %vm1209_vm2 = vweird.f32 %v1189_v53  ;;  %v1215_v10 = vand.u32 2147483648, %v1189_v53  ;;  %v1213_v62 = vand.u32 2147483647, %v1189_v53  ;;  %v3133_v30 = vld [vmem:[%s3376_s21 + $0x10] sm:$0xff]  ;;  %v3138_v49 = vld [vmem:[%s3376_s21 + $0x8] sm:$0xff]  ;;  %v1184_v1 = vld [vmem:[#allocation5 + $0x8] sm:$0xff] }
 0x3a9   : > { %2271 = vrcp.f32 %v1188_v42  ;;  %1236 = vperm.xlu0 %2256, %v3119_v2   ;;  %vm1195_vm4 = vweird.f32 %v1188_v42  ;;  %v1201_v20 = vand.u32 2147483648, %v1188_v42  ;;  %v1199_v24 = vand.u32 2147483647, %v1188_v42  ;;  %1246 = vperm.xlu1 %2257, %v3133_v30   ;;  %v1186_v44 = vld [vmem:[#allocation5] sm:$0xff]  ;;  %v1185_v43 = vld [vmem:[#allocation5 + $0x10] sm:$0xff]  ;;  %v1177_v18 = vld [vmem:[%s2781_s6 + $0x8] sm:$0xff] }
 0x3aa   : > { %v1216_v5 = vor.u32 1.1754944e-38, %v1215_v10  ;;  %vm1214_vm7 = vcmp.eq.f32.partialorder %v1213_v62, 8.507059e+37  ;;  %v2524_v55 = vmov 1   ;;  %v3150_v8 = vld [vmem:[%s3376_s21 + $0x18] sm:$0xff]  ;;  %v2525_v34 = vmov 2   ;;  %v1997_v48 = vld [vmem:[%s3381_s18] sm:$0xff] }
 0x3ab   : > { %v1202_v17 = vor.u32 1.1754944e-38, %v1201_v20  ;;  %vm1200_vm9 = vcmp.eq.f32.partialorder %v1199_v24, 8.507059e+37  ;;  %2258 = vset.pattern.permute.xlu2 %v2524_v55  ;;  %vm1264_vm10 = vcmask 261120   ;;  %v1998_v59 = vld [vmem:[%s3381_s18 + $0x8] sm:$0xff]  ;;  %v2526_v35 = vmov 32.0   ;;  %v1176_v21 = vld [vmem:[%s2781_s6] sm:$0xff] }
 0x3ac   : > { %1353 = vperm.xlu2 %2258, %v3133_v30   ;;  %2273 = vrcp.f32 %v2526_v35  ;;  %v1178_v38 = vld [vmem:[%s2781_s6 + $0x10] sm:$0xff]  ;;  %v1179_v12 = vld [vmem:[%s2781_s6 + $0x18] sm:$0xff] }
 0x3ad   : > { %v1187_v25 = vld [vmem:[#allocation5 + $0x18] sm:$0xff] }
 0x3ae   : > { %v2270_v26 = vpop.eup %2269 }
 0x3af   : > { %v1205_v58 = vmul.f32 %v2270_v26, %v1189_v53  ;;  %v2272_v61 = vpop.eup %2271  ;;  %vm1210_vm3 = vweird.f32 %v2270_v26 }
 0x3b0   : > { %v1191_v15 = vmul.f32 %v2272_v61, %v1188_v42  ;;  %vm1196_vm5 = vweird.f32 %v2272_v61  ;;  %vm3122_vm6 = vmor %vm1209_vm2, %vm1210_vm3 }
 0x3b1   : > { %v1206_v13 = vsub.f32 1.0, %v1205_v58  ;;  %vm3126_vm8 = vmor %vm1195_vm4, %vm1196_vm5  ;;  %1241 = vperm.xlu0 %2256, %v3138_v49   ;;  %1251 = vperm.xlu1 %2257, %v3150_v8  }
 0x3b2   : > { %v1192_v23 = vsub.f32 1.0, %v1191_v15  ;;  %v2274_v63 = vpop.eup %2273 }
 0x3b3   : > { %v1207_v11 = vmul.f32 %v2270_v26, %v1206_v13  ;;  %v1304_v40 = vmul.f32 32.0, %v2274_v63  ;;  %vm1308_vm11 = vweird.f32 %v2274_v63 }
 0x3b4   : > { %v1193_v37 = vmul.f32 %v2272_v61, %v1192_v23  ;;  %1357 = vperm.xlu2 %2258, %v3150_v8  }
 0x3b5   : > { %v1208_v29 = vadd.f32 %v2270_v26, %v1207_v11  ;;  %v1305_v10 = vsub.f32 1.0, %v1304_v40 }
 0x3b6   : > { %v1194_v51 = vadd.f32 %v2272_v61, %v1193_v37 }
 0x3b7   : > { %v1212_v52 = vsel %vm3122_vm6, %v2270_v26, %v1208_v29  ;;  %v1306_v15 = vmul.f32 %v2274_v63, %v1305_v10  ;;  %v2003_v10 = vld [vmem:[%s3382_s24 + $0x20] sm:$0xff] }
 0x3b8   : > { %v1217_v16 = vsel %vm1214_vm7, %v1216_v5, %v1212_v52  ;;  %v1198_v46 = vsel %vm3126_vm8, %v2272_v61, %v1194_v51 }
 0x3b9   : > { %v1221_v57 = vperm.slane %v1217_v16, 0  ;;  %v1203_v60 = vsel %vm1200_vm9, %v1202_v17, %v1198_v46  ;;  %2259 = vset.pattern.permute.xlu0 %v2525_v34  ;;  %2260 = vset.pattern.permute.xlu1 %v2525_v34  ;;  %v1307_v23 = vadd.f32 %v2274_v63, %v1306_v15  ;;  %v2000_v15 = vld [vmem:[%s3382_s24 + $0x8] sm:$0xff] }
 0x3ba   : > { %v1220_v32 = vperm.slane %v1203_v60, 0  ;;  %1373 = vperm.xlu0 %2259, %v3133_v30   ;;  %1377 = vperm.xlu1 %2260, %v3150_v8  }
 0x3bb   : > { %v1226_v47 = vmul.f32 %v1221_v57, %v1186_v44  ;;  %v1227_v0 = vmul.f32 %v1221_v57, %v1187_v25  ;;  %v3172_v5 = vsel %vm1308_vm11, %v2274_v63, %v1307_v23  ;;  %v2006_v23 = vld [vmem:[%s3382_s24 + $0x38] sm:$0xff] }
 0x3bc   : > { %v1224_v50 = vmul.f32 %v1220_v32, %v1184_v1  ;;  %v1225_v33 = vmul.f32 %v1220_v32, %v1185_v43  ;;  %1345 = vperm.xlu2 %2258, %v3119_v2  }
 0x3bd   : > { %v1233_v14 = vpack.c.bf16 %v1227_v0, %v1226_v47 }
 0x3be   : > { %v1232_v54 = vpack.c.bf16 %v1225_v33, %v1224_v50 }
 0x3bf   : > { %1277 = vmatpush.bf16.msra.mxu0 %v1233_v14 }
 0x3c2   : > { %1369 = vperm.xlu0 %2259, %v3138_v49   ;;  %2261 = vset.pattern.permute.xlu1 %v2524_v55 }
 0x3c3   : > { %1278 = vmatpush.bf16.msra.mxu0 %v1232_v54  ;;  %1349 = vperm.xlu1 %2261, %v3138_v49  }
 0x3c4   : > { %2262 = vset.pattern.permute.xlu2 %v2525_v34 }
 0x3c5   : > { %1365 = vperm.xlu2 %2262, %v3119_v2  }
 0x3c6   : > { %1934 = vmatmul.msk.bf16.vlgmr.msra.gmra.mxu0 %vm1264_vm10, %v1997_v48 }
 0x3d6   : > { %1935 = vmatmul.msk.bf16.gmra.mxu0 %vm1264_vm10, %v1998_v59 }
 0x406   : > { %v1354_v14 = vpop.permute.xlu2 %1353 }
 0x40e   : > { %v1358_v34 = vpop.permute.xlu2 %1357 }
 0x41b   : > { %v1237_v3 = vpop.permute.xlu0 %1236  ;;  %v1247_v4 = vpop.permute.xlu1 %1246 }
 0x423   : > { %v1242_v7 = vpop.permute.xlu0 %1241  ;;  %v1252_v41 = vpop.permute.xlu1 %1251 }
 0x42c   : > { %v1374_v35 = vpop.permute.xlu0 %1373 }
 0x434   : > { %v1370_v40 = vpop.permute.xlu0 %1369 }
 0x443   : > { %v1280_v19 = vpop.f32.mrf.mxu0 }
 0x444   : > { %v1281_v9 = vadd.f32 %v1280_v19, %v1237_v3  ;;  %v1378_v19 = vpop.permute.xlu1 %1377 }
 0x446   : > { %v1290_v39 = vadd.f32 %v1281_v9, %v1176_v21 }
 0x44b   : > { %v1282_v27 = vpop.f32.mrf.mxu0 }
 0x44c   : > { %v1283_v28 = vadd.f32 %v1282_v27, %v1242_v7  ;;  %v1346_v7 = vpop.permute.xlu2 %1345 }
 0x44e   : > { %v1291_v56 = vadd.f32 %v1283_v28, %v1177_v18  ;;  %v1350_v18 = vpop.permute.xlu1 %1349 }
 0x450   : > { %v1294_v42 = vadd.f32 %v1291_v56, %v1290_v39 }
 0x453   : > { %v1285_v6 = vpop.f32.mrf.mxu0 }
 0x454   : > { %v1286_v31 = vadd.f32 %v1285_v6, %v1247_v4 }
 0x456   : > { %v1292_v22 = vadd.f32 %v1286_v31, %v1178_v38 }
 0x458   : > { %v1295_v58 = vadd.f32 %v1294_v42, %v1292_v22 }
 0x45b   : > { %v1287_v53 = vpop.f32.mrf.mxu0 }
 0x45c   : > { %v1288_v26 = vadd.f32 %v1287_v53, %v1252_v41  ;;  %v1366_v41 = vpop.permute.xlu2 %1365 }
 0x45e   : > { %v1293_v61 = vadd.f32 %v1288_v26, %v1179_v12 }
 0x460   : > { %v1296_v13 = vadd.f32 %v1295_v58, %v1293_v61 }
 0x462   : > { %v1297_v62 = vrot.slane %v1296_v13, 4 }
 0x464   : > { %v1298_v20 = vadd.f32 %v1297_v62, %v1296_v13  ;;  %v1999_v13 = vld [vmem:[%s3382_s24] sm:$0xff]  ;;  %v2004_v62 = vld [vmem:[%s3382_s24 + $0x28] sm:$0xff] }
 0x466   : > { %v1299_v11 = vrot.slane %v1298_v20, 2 }
 0x468   : > { %v1300_v24 = vadd.f32 %v1299_v11, %v1298_v20  ;;  %v2005_v20 = vld [vmem:[%s3382_s24 + $0x30] sm:$0xff] }
 0x469   : > { %v2001_v11 = vld [vmem:[%s3382_s24 + $0x10] sm:$0xff] }
 0x46a   : > { %v1301_v36 = vrot.slane %v1300_v24, 1 }
 0x46c   : > { %v1302_v29 = vadd.f32 %v1301_v36, %v1300_v24  ;;  %v2002_v24 = vld [vmem:[%s3382_s24 + $0x18] sm:$0xff] }
 0x46e   : > { %v1310_v37 = vmul.f32 %v3172_v5, %v1302_v29 }
 0x470   : > { %v1311_v45 = vsub.f32 %v1290_v39, %v1310_v37  ;;  %v1312_v17 = vsub.f32 %v1291_v56, %v1310_v37  ;;  %v1313_v52 = vsub.f32 %v1292_v22, %v1310_v37  ;;  %v1314_v51 = vsub.f32 %v1293_v61, %v1310_v37 }
 0x472   : > { %v1315_v44 = vmul.f32 %v1311_v45, %v1311_v45  ;;  %v1316_v25 = vmul.f32 %v1312_v17, %v1312_v17  ;;  %v1317_v16 = vmul.f32 %v1313_v52, %v1313_v52  ;;  %v1318_v57 = vmul.f32 %v1314_v51, %v1314_v51 }
 0x474   : > { %v1319_v55 = vadd.f32 %v1316_v25, %v1315_v44 }
 0x476   : > { %v1320_v46 = vadd.f32 %v1319_v55, %v1317_v16 }
 0x478   : > { %v1321_v1 = vadd.f32 %v1320_v46, %v1318_v57 }
 0x47a   : > { %v1322_v43 = vrot.slane %v1321_v1, 4 }
 0x47c   : > { %v1323_v60 = vadd.f32 %v1322_v43, %v1321_v1 }
 0x47e   : > { %v1324_v47 = vrot.slane %v1323_v60, 2 }
 0x480   : > { %v1325_v0 = vadd.f32 %v1324_v47, %v1323_v60 }
 0x482   : > { %v1326_v32 = vrot.slane %v1325_v0, 1 }
 0x484   : > { %v1327_v50 = vadd.f32 %v1326_v32, %v1325_v0 }
 0x486   : > { %v1328_v33 = vmul.f32 %v1327_v50, %v3172_v5 }
 0x488   : > { %v1329_v54 = vadd.f32 1e-06, %v1328_v33 }
 0x48a   : > { %2275 = vrsqrt.f32 %v1329_v54  ;;  %vm1336_vm13 = vweird.f32 %v1329_v54 }
 0x490   : > { %v2276_v48 = vpop.eup %2275 }
 0x491   : > { %v1331_v59 = vmul.f32 %v2276_v48, %v1329_v54  ;;  %vm1337_vm12 = vweird.f32 %v2276_v48 }
 0x492   : > { %vm1338_vm14 = vmor %vm1336_vm13, %vm1337_vm12 }
 0x493   : > { %v1332_v3 = vmul.f32 %v2276_v48, %v1331_v59 }
 0x495   : > { %v1333_v27 = vmul.f32 0.5, %v1332_v3 }
 0x497   : > { %v1334_v4 = vsub.f32 1.5, %v1333_v27 }
 0x499   : > { %v1335_v6 = vmul.f32 %v2276_v48, %v1334_v4 }
 0x49b   : > { %v1339_v28 = vsel %vm1338_vm14, %v2276_v48, %v1335_v6 }
 0x49c   : > { %v1342_v9 = vmul.f32 %v1339_v28, %v1313_v52  ;;  %v1343_v31 = vmul.f32 %v1339_v28, %v1314_v51  ;;  %v1340_v21 = vmul.f32 %v1339_v28, %v1311_v45  ;;  %v1341_v38 = vmul.f32 %v1339_v28, %v1312_v17 }
 0x49e   : > { %v1362_v63 = vmul.f32 %v1354_v14, %v1342_v9  ;;  %v1363_v56 = vmul.f32 %v1358_v34, %v1343_v31  ;;  %v1360_v39 = vmul.f32 %v1346_v7, %v1340_v21  ;;  %v1361_v22 = vmul.f32 %v1350_v18, %v1341_v38 }
 0x4a0   : > { %v3176_v12 = vadd.f32 %v1374_v35, %v1362_v63  ;;  %v3178_v53 = vadd.f32 %v1378_v19, %v1363_v56  ;;  %v3180_v42 = vadd.f32 %v1370_v40, %v1361_v22  ;;  %v3182_v26 = vadd.f32 %v1366_v41, %v1360_v39 }
 0x4a2   : > { %v1401_v58 = vpack.c.bf16 %v3178_v53, %v3176_v12  ;;  %v1400_v61 = vpack.c.bf16 %v3180_v42, %v3182_v26 }
 0x4a4   : > { %1472 = vmatpush.bf16.msra.mxu1 %v1401_v58  ;;  %2024 = vmatpush.bf16.msra.mxu3 %v1401_v58 }
 0x4a8   : > { %1473 = vmatpush.bf16.msra.mxu1 %v1400_v61  ;;  %2025 = vmatpush.bf16.msra.mxu3 %v1400_v61 }
 0x4ab   : > { %1972 = vmatmul.msk.bf16.vlgmr.msra.gmra.mxu3 %vm1264_vm10, %v2003_v10  ;;  %1968 = vmatmul.msk.bf16.vlgmr.msra.gmra.mxu1 %vm1264_vm10, %v1999_v13  ;;  %v2527_v10 = vmov 3  }
 0x4ac   : > { %2263 = vset.pattern.permute.xlu1 %v2527_v10  ;;  %2265 = vset.pattern.permute.xlu0 %v2527_v10 }
 0x4ad   : > { %1646 = vperm.xlu1 %2263, %v3119_v2   ;;  %1654 = vperm.xlu0 %2265, %v3133_v30  }
 0x4ae   : > { %2264 = vset.pattern.permute.xlu2 %v2527_v10 }
 0x4af   : > { %1650 = vperm.xlu2 %2264, %v3138_v49  }
 0x4b5   : > { %1658 = vperm.xlu1 %2263, %v3150_v8  }
 0x4bb   : > { %1973 = vmatmul.msk.bf16.gmra.mxu3 %vm1264_vm10, %v2004_v62  ;;  %1969 = vmatmul.msk.bf16.gmra.mxu1 %vm1264_vm10, %v2000_v15 }
 0x4cb   : > { %1974 = vmatmul.msk.bf16.gmra.mxu3 %vm1264_vm10, %v2005_v20  ;;  %1970 = vmatmul.msk.bf16.gmra.mxu1 %vm1264_vm10, %v2001_v11 }
 0x4db   : > { %1975 = vmatmul.msk.bf16.gmra.mxu3 %vm1264_vm10, %v2006_v23  ;;  %1971 = vmatmul.msk.bf16.gmra.mxu1 %vm1264_vm10, %v2002_v24 }
 0x51f   : > { %v1655_v10 = vpop.permute.xlu0 %1654 }
 0x528   : > { %v3220_v36 = vpop.f32.mrf.mxu1 }
 0x529   : > { %v1515_v13 = vmax.f32 %v3220_v36, 0.0 }
 0x52b   : > { %v1531_v23 = vmin.f32 %v1515_v13, 6.0 }
 0x52e   : > { %v1495_v29 = vpop.f32.mrf.mxu3 }
 0x52f   : > { %v1523_v4 = vmax.f32 %v1495_v29, 0.0 }
 0x530   : > { %v3222_v37 = vpop.f32.mrf.mxu1 }
 0x531   : > { %v1539_v31 = vmin.f32 %v1523_v4, 6.0  ;;  %v1516_v62 = vmax.f32 %v3222_v37, 0.0  ;;  %v2008_v37 = vld [vmem:[#allocation12 + $0x8] sm:$0xff] }
 0x533   : > { %v1532_v24 = vmin.f32 %v1516_v62, 6.0 }
 0x535   : > { %v1551_v36 = vpack.c.bf16 %v1532_v24, %v1531_v23 }
 0x536   : > { %v1497_v45 = vpop.f32.mrf.mxu3 }
 0x537   : > { %v1524_v19 = vmax.f32 %v1497_v45, 0.0  ;;  %v2528_v45 = vmov 4  }
 0x538   : > { %v1480_v52 = vpop.f32.mrf.mxu1  ;;  %2268 = vset.pattern.permute.xlu0 %v2528_v45  ;;  %2266 = vset.pattern.permute.xlu2 %v2528_v45 }
 0x539   : > { %v1540_v6 = vmin.f32 %v1524_v19, 6.0  ;;  %v1517_v22 = vmax.f32 %v1480_v52, 0.0  ;;  %1678 = vperm.xlu0 %2268, %v3150_v8   ;;  %1666 = vperm.xlu2 %2266, %v3119_v2  }
 0x53a   : > { %2267 = vset.pattern.permute.xlu1 %v2528_v45 }
 0x53b   : > { %v1555_v21 = vpack.c.bf16 %v1540_v6, %v1539_v31  ;;  %v1533_v15 = vmin.f32 %v1517_v22, 6.0  ;;  %1670 = vperm.xlu1 %2267, %v3138_v49   ;;  %v1647_v22 = vpop.permute.xlu1 %1646 }
 0x53e   : > { %v1500_v17 = vpop.f32.mrf.mxu3 }
 0x53f   : > { %v1525_v48 = vmax.f32 %v1500_v17, 0.0  ;;  %v2007_v17 = vld [vmem:[#allocation12] sm:$0xff] }
 0x540   : > { %v1482_v44 = vpop.f32.mrf.mxu1 }
 0x541   : > { %v1541_v35 = vmin.f32 %v1525_v48, 6.0  ;;  %v1518_v41 = vmax.f32 %v1482_v44, 0.0  ;;  %1674 = vperm.xlu2 %2266, %v3133_v30  }
 0x543   : > { %v1534_v20 = vmin.f32 %v1518_v41, 6.0  ;;  %v1651_v41 = vpop.permute.xlu2 %1650  ;;  %v1659_v62 = vpop.permute.xlu1 %1658 }
 0x545   : > { %v1552_v29 = vpack.c.bf16 %v1534_v20, %v1533_v15 }
 0x546   : > { %v1502_v51 = vpop.f32.mrf.mxu3 }
 0x547   : > { %v1526_v33 = vmax.f32 %v1502_v51, 0.0 }
 0x548   : > { %v1485_v16 = vpop.f32.mrf.mxu1 }
 0x549   : > { %v1542_v3 = vmin.f32 %v1526_v33, 6.0  ;;  %v1519_v38 = vmax.f32 %v1485_v16, 0.0 }
 0x54b   : > { %v1556_v9 = vpack.c.bf16 %v1542_v3, %v1541_v35  ;;  %v1535_v40 = vmin.f32 %v1519_v38, 6.0 }
 0x54e   : > { %v1505_v25 = vpop.f32.mrf.mxu3 }
 0x54f   : > { %v1527_v32 = vmax.f32 %v1505_v25, 0.0 }
 0x550   : > { %v1487_v57 = vpop.f32.mrf.mxu1 }
 0x551   : > { %v1543_v59 = vmin.f32 %v1527_v32, 6.0  ;;  %v1520_v63 = vmax.f32 %v1487_v57, 0.0 }
 0x553   : > { %v1536_v58 = vmin.f32 %v1520_v63, 6.0 }
 0x555   : > { %v1553_v11 = vpack.c.bf16 %v1536_v58, %v1535_v40 }
 0x556   : > { %v1507_v55 = vpop.f32.mrf.mxu3 }
 0x557   : > { %v1528_v47 = vmax.f32 %v1507_v55, 0.0 }
 0x558   : > { %v1490_v43 = vpop.f32.mrf.mxu1 }
 0x559   : > { %v1544_v54 = vmin.f32 %v1528_v47, 6.0  ;;  %v1521_v28 = vmax.f32 %v1490_v43, 0.0 }
 0x55b   : > { %v1557_v27 = vpack.c.bf16 %v1544_v54, %v1543_v59  ;;  %v1537_v56 = vmin.f32 %v1521_v28, 6.0 }
 0x55e   : > { %v1510_v46 = vpop.f32.mrf.mxu3 }
 0x55f   : > { %v1529_v1 = vmax.f32 %v1510_v46, 0.0 }
 0x560   : > { %v1492_v7 = vpop.f32.mrf.mxu1 }
 0x561   : > { %v1545_v14 = vmin.f32 %v1529_v1, 6.0  ;;  %v1522_v18 = vmax.f32 %v1492_v7, 0.0 }
 0x563   : > { %v1538_v39 = vmin.f32 %v1522_v18, 6.0 }
 0x565   : > { %v1554_v61 = vpack.c.bf16 %v1538_v39, %v1537_v56 }
 0x566   : > { %v1512_v60 = vpop.f32.mrf.mxu3 }
 0x567   : > { %v1530_v0 = vmax.f32 %v1512_v60, 0.0 }
 0x569   : > { %v1546_v50 = vmin.f32 %v1530_v0, 6.0 }
 0x56b   : > { %v1558_v34 = vpack.c.bf16 %v1546_v50, %v1545_v14 }
 0x56d   : > { %1571 = vmatpush.bf16.msra.mxu2 %v1558_v34 }
 0x571   : > { %1572 = vmatpush.bf16.msra.mxu2 %v1557_v27 }
 0x575   : > { %1573 = vmatpush.bf16.msra.mxu2 %v1556_v9 }
 0x579   : > { %1574 = vmatpush.bf16.msra.mxu2 %v1555_v21 }
 0x57d   : > { %1575 = vmatpush.bf16.msra.mxu2 %v1554_v61 }
 0x581   : > { %1576 = vmatpush.bf16.msra.mxu2 %v1553_v11 }
 0x585   : > { %1577 = vmatpush.bf16.msra.mxu2 %v1552_v29 }
 0x589   : > { %1578 = vmatpush.bf16.msra.mxu2 %v1551_v36 }
 0x58c   : > { %1579 = vmatmul.bf16.vlgmr.msra.gmra.mxu2 %v2007_v17 }
 0x593   : > { %v1667_v15 = vpop.permute.xlu2 %1666 }
 0x59c   : > { %1584 = vmatmul.bf16.gmra.mxu2 %v2008_v37 }
 0x5ad   : > { %v1671_v45 = vpop.permute.xlu1 %1670 }
 0x60f   : > { %v1580_v52 = vpop.f32.mrf.mxu2 }
 0x610   : > { %v1590_v16 = vmax.f32 %v1580_v52, 0.0 }
 0x612   : > { %v1594_v8 = vmin.f32 %v1590_v16, 6.0 }
 0x614   : > { %v1598_v43 = vadd.f32 %v1594_v8, %v3182_v26 }
 0x617   : > { %v1582_v51 = vpop.f32.mrf.mxu2 }
 0x618   : > { %v1591_v44 = vmax.f32 %v1582_v51, 0.0 }
 0x61a   : > { %v1595_v57 = vmin.f32 %v1591_v44, 6.0  ;;  %v1679_v44 = vpop.permute.xlu0 %1678 }
 0x61c   : > { %v1599_v1 = vadd.f32 %v1595_v57, %v3180_v42 }
 0x61e   : > { %v1602_v30 = vadd.f32 %v1599_v1, %v1598_v43 }
 0x61f   : > { %v1585_v25 = vpop.f32.mrf.mxu2 }
 0x620   : > { %v1592_v55 = vmax.f32 %v1585_v25, 0.0  ;;  %v1675_v25 = vpop.permute.xlu2 %1674 }
 0x622   : > { %v1596_v46 = vmin.f32 %v1592_v55, 6.0 }
 0x624   : > { %v1600_v49 = vadd.f32 %v1596_v46, %v3176_v12 }
 0x626   : > { %v1603_v0 = vadd.f32 %v1602_v30, %v1600_v49 }
 0x627   : > { %v1587_v2 = vpop.f32.mrf.mxu2 }
 0x628   : > { %v1593_v60 = vmax.f32 %v1587_v2, 0.0 }
 0x62a   : > { %v1597_v47 = vmin.f32 %v1593_v60, 6.0 }
 0x62c   : > { %v1601_v32 = vadd.f32 %v1597_v47, %v3178_v53 }
 0x62e   : > { %v1604_v14 = vadd.f32 %v1603_v0, %v1601_v32 }
 0x630   : > { %v1605_v50 = vrot.slane %v1604_v14, 4 }
 0x632   : > { %v1606_v33 = vadd.f32 %v1605_v50, %v1604_v14 }
 0x634   : > { %v1607_v54 = vrot.slane %v1606_v33, 2 }
 0x636   : > { %v1608_v34 = vadd.f32 %v1607_v54, %v1606_v33 }
 0x638   : > { %v1609_v48 = vrot.slane %v1608_v34, 1 }
 0x63a   : > { %v1610_v59 = vadd.f32 %v1609_v48, %v1608_v34 }
 0x63c   : > { %v1611_v42 = vmul.f32 %v1610_v59, %v3172_v5 }
 0x63e   : > { %v1613_v19 = vsub.f32 %v1599_v1, %v1611_v42  ;;  %v1614_v3 = vsub.f32 %v1600_v49, %v1611_v42  ;;  %v1612_v26 = vsub.f32 %v1598_v43, %v1611_v42  ;;  %v1615_v27 = vsub.f32 %v1601_v32, %v1611_v42 }
 0x640   : > { %v1616_v12 = vmul.f32 %v1612_v26, %v1612_v26  ;;  %v1617_v4 = vmul.f32 %v1613_v19, %v1613_v19  ;;  %v1618_v7 = vmul.f32 %v1614_v3, %v1614_v3  ;;  %v1619_v6 = vmul.f32 %v1615_v27, %v1615_v27 }
 0x642   : > { %v1620_v35 = vadd.f32 %v1617_v4, %v1616_v12 }
 0x644   : > { %v1621_v28 = vadd.f32 %v1620_v35, %v1618_v7 }
 0x646   : > { %v1622_v53 = vadd.f32 %v1621_v28, %v1619_v6 }
 0x648   : > { %v1623_v18 = vrot.slane %v1622_v53, 4 }
 0x64a   : > { %v1624_v9 = vadd.f32 %v1623_v18, %v1622_v53 }
 0x64c   : > { %v1625_v31 = vrot.slane %v1624_v9, 2 }
 0x64e   : > { %v1626_v21 = vadd.f32 %v1625_v31, %v1624_v9 }
 0x650   : > { %v1627_v38 = vrot.slane %v1626_v21, 1 }
 0x652   : > { %v1628_v63 = vadd.f32 %v1627_v38, %v1626_v21 }
 0x654   : > { %v1629_v56 = vmul.f32 %v1628_v63, %v3172_v5 }
 0x656   : > { %v1630_v39 = vadd.f32 1e-06, %v1629_v56 }
 0x658   : > { %2277 = vrsqrt.f32 %v1630_v39  ;;  %vm1637_vm0 = vweird.f32 %v1630_v39 }
 0x65e   : > { %v2278_v40 = vpop.eup %2277 }
 0x65f   : > { %v1632_v58 = vmul.f32 %v2278_v40, %v1630_v39  ;;  %vm1638_vm15 = vweird.f32 %v2278_v40 }
 0x660   : > { %vm1639_vm1 = vmor %vm1637_vm0, %vm1638_vm15 }
 0x661   : > { %v1633_v61 = vmul.f32 %v2278_v40, %v1632_v58 }
 0x663   : > { %v1634_v13 = vmul.f32 0.5, %v1633_v61 }
 0x665   : > { %v1635_v20 = vsub.f32 1.5, %v1634_v13 }
 0x667   : > { %v1636_v11 = vmul.f32 %v2278_v40, %v1635_v20 }
 0x669   : > { %v1640_v23 = vsel %vm1639_vm1, %v2278_v40, %v1636_v11 }
 0x66a   : > { %v1641_v24 = vmul.f32 %v1640_v23, %v1612_v26  ;;  %v1642_v5 = vmul.f32 %v1640_v23, %v1613_v19  ;;  %v1644_v29 = vmul.f32 %v1640_v23, %v1615_v27  ;;  %v1643_v36 = vmul.f32 %v1640_v23, %v1614_v3 }
 0x66c   : > { %v1661_v17 = vmul.f32 %v1647_v22, %v1641_v24  ;;  %v1662_v37 = vmul.f32 %v1651_v41, %v1642_v5  ;;  %v1664_v52 = vmul.f32 %v1659_v62, %v1644_v29  ;;  %v1663_v51 = vmul.f32 %v1655_v10, %v1643_v36 }
 0x66e   : > { %v1681_v16 = vadd.f32 %v1667_v15, %v1661_v17  ;;  %v1683_v55 = vadd.f32 %v1675_v25, %v1663_v51  ;;  %v1682_v57 = vadd.f32 %v1671_v45, %v1662_v37  ;;  %v1684_v8 = vadd.f32 %v1679_v44, %v1664_v52 }
 0x670   : > { %1685 = vst [vmem:[%s2801_s23] sm:$0xff] %v1681_v16 }
 0x671   : > { %1687 = vst [vmem:[%s2801_s23 + $0x10] sm:$0xff] %v1683_v55 }
 0x672   : > { %1686 = vst [vmem:[%s2801_s23 + $0x8] sm:$0xff] %v1682_v57 }
 0x673   : > { %1688 = vst [vmem:[%s2801_s23 + $0x18] sm:$0xff] %v1684_v8 }
 0x674 PF: > { %s3383_s22 = sld [smem:[#allocation21_spill]]  ;;  %s1703_s19 = sshll.u32 %s2801_s23, 4  ;;  %s1704_s19 = int_to_ptr.vmem [resolvable:$true] %s1703_s19 }
 0x675   : > { %s3384_s13 = sld [smem:[#allocation20_spill]]  ;;  %s1690_s8 = scalar_lea.sflag [#allocation8], %s2777_s12 }
 0x676   : > { %s3386_s30 = sld [smem:[#allocation38_spill]] }
 0x67a   : > { %s1985_s25 = sshll.u32 %s3383_s22, 3 }
 0x67b   : > { %s1700_s20 = sadd.s32 %s3384_s13, %s1985_s25 }
 0x67c   : > { %s1986_s26 = sshll.u32 %s1700_s20, 3  ;;  %s3387_s4 = smov %s3386_s30 }
 0x67d   : > { %s1702_s27 = scalar_lea.hbm %s3386_s30, %s1986_s26  ;;  %s2385_s23 = scalar_lea.hbm %s3387_s4, 128 }
 0x67e   : > { %s1705_s6 = sshll.u32 %s1702_s27, 4  ;;  %s1706_s6 = int_to_ptr.hbm [resolvable:$true] %s1705_s6 }
 0x67f   : > { %s2379_s0 = sshra.s32 %s1706_s6, 4  ;;  %s2380_s0 = int_to_ptr.hbm [resolvable:$true] %s2379_s0 }
 0x680   : > { %s2381_s1 = scalar_lea.hbm %s2380_s0, 32  ;;  %p2386_p1 = scmp.lt.s32.totalorder %s2380_s0, %s3387_s4 }
 0x681   : > { %p2382_p12 = scmp.ne.s32.totalorder %s2380_s0, %s2381_s1  ;;  %p2387_p13 = scmp.lt.s32.totalorder %s2385_s23, %s2381_s1 }
 0x683   : > { %p2383_p2 = pnand %p2382_p12, %p2709_p8  ;;  %p2388_p3 = por %p2387_p13, %p2386_p1 }
 0x685   : > { %p2384_p10 = pneg %p2383_p2 }
 0x687   : > { %p2389_p0 = pnand %p2388_p3, %p2384_p10 }
 0x689   : > { %2392 = shalt.err (!%p2389_p0)
}
 0x68a   : > { %s2529_s12 = smov 128   ;;  %s2530_s20 = smov 256  }
 0x68b   : > { %s2531_s26 = smov 8  }
 0x68c   : > { %2034 = dma.vmem_to_hbm [thread:$0]  (%p2709_p8), %s1704_s19, 512, %s1706_s6, %s1690_s8, %s2529_s12, %s2530_s20, %s2531_s26  }
 0x68d PF: > { %s3388_s3 = sld [smem:[#allocation18_spill]]  ;;  %p2046_p4 = scmp.ge.s32.totalorder %s2511_s17, 2 }
 0x68f   : > { %p2041_p5 = pnand %p2046_p4, %p2726_p9 }
 0x691   : > { %p2042_p6 = pneg %p2041_p5 }
 0x693   : > { %s1720_s2 = sand.u32 1, %s3388_s3  }
 0x694   : > { %s1721_s0 = scalar_lea.sflag [#allocation8], %s1720_s2 }
 0x695   : > { %2458 = dma.done.wait (%p2042_p6), %s1721_s0, 512  }
 0x696   : > { %2460 = vsyncadd (%p2042_p6), %s1721_s0, 4294966784  ;;  %s27_s17 = sadd.s32 1, %s2511_s17   ;;  %s3391_s11 = sld [smem:[#allocation28_spill]] }
 0x697   : > { %p3266_p7 = scmp.ge.s32.totalorder %s27_s17, 10   ;;  %s3392_s19 = sld [smem:[#allocation27_spill]] }
 0x698   : > { %s3393_s6 = sld [smem:[#allocation22_spill]]  ;;  %s3396_s27 = smov %s2467_s28 }
 0x699   : > { %s3394_s8 = sld [smem:[#allocation23_spill]]  ;;  %s3397_s28 = smov %s2471_s29 }
 0x69a   : > { %s3395_s22 = sld [smem:[#allocation24_spill]]  ;;  %s3399_s30 = smov %s2479_s9 }
 0x69b   : > { %s3400_s9 = smov %s2483_s10  ;;  %s3403_s12 = smov %s2503_s15 }
 0x69c   : > { %s3398_s29 = smov %s3391_s11  ;;  %s3402_s11 = smov %s2499_s14 }
 0x69d   : > { %s3401_s10 = smov %s3392_s19  ;;  %s3404_s13 = smov %s2507_s16 }
 0x69e   : > { %s3405_s14 = smov %s3393_s6  ;;  %26 = sbr.rel (!%p3266_p7) target bundleno = 22 (0x16), region = 171 }
 0x69f   : > { %s3406_s15 = smov %s3394_s8 }
 0x6a0   : > { %s3407_s16 = smov %s3395_s22 }
 0x6a3   :  { %1727 = vsyncpa [#allocation7], 1 }
 0x6a4   :  { %1729 = vsyncpa [#allocation7 + $0x1], 1 }
 0x6a5   :  { %1730 = vsyncpa [#allocation11], 1 }
 0x6a6   :  { %1732 = vsyncpa [#allocation11 + $0x1], 1 }
 0x6a7   :  { %1733 = vsyncpa [#allocation8], 1 }
 0x6a8   :  { %1735 = vsyncpa [#allocation8 + $0x1], 1 }

// kernel: tpu_custom_call.1
= control target key start
LH: loop header
LB: loop body
LE: loop exit
PB: predicated region body
PF: predicated region fallthrough
CT: control target
= control target key end

     0   :  { %s3310_s0 = inlined_call_operand.hbm [shape: f32[2,32,256], index: 0, kind: input, shape index: {}]   ;;  %s3311_s1 = inlined_call_operand.vmem [shape: bf16[2,32,256], index: 1, kind: input, shape index: {}]   ;;  %s3312_s2 = inlined_call_operand.hbm [shape: bf16[2,32,256], index: 2, kind: input, shape index: {}]   ;;  %s3313_s3 = inlined_call_operand.vmem [shape: bf16[32,32], index: 3, kind: input, shape index: {}]   ;;  %s3314_s4 = inlined_call_operand.vmem [shape: bf16[32,32], index: 4, kind: input, shape index: {}]   ;;  %s3315_s5 = inlined_call_operand.vmem [shape: f32[32,8], index: 5, kind: input, shape index: {}]   ;;  %s3316_s6 = inlined_call_operand.vmem [shape: bf16[128,32], index: 6, kind: input, shape index: {}]   ;;  %s3317_s7 = inlined_call_operand.hbm [shape: bf16[32,128], index: 7, kind: input, shape index: {}]   ;;  %s3318_s8 = inlined_call_operand.hbm [shape: f32[2,32,256], index: 8, kind: output, shape index: {}]  }
   0x1   :  { %3334 = sst [smem:[#allocation30_spill]] %s3310_s0 }
   0x2   :  { %3335 = sst [smem:[#allocation31_spill]] %s3311_s1 }
   0x3   :  { %3336 = sst [smem:[#allocation32_spill]] %s3312_s2 }
   0x4   :  { %3337 = sst [smem:[#allocation33_spill]] %s3313_s3 }
   0x5   :  { %3338 = sst [smem:[#allocation34_spill]] %s3314_s4 }
   0x6   :  { %3339 = sst [smem:[#allocation35_spill]] %s3315_s5 }
   0x7   :  { %3340 = sst [smem:[#allocation36_spill]] %s3316_s6 }
   0x8   :  { %3341 = sst [smem:[#allocation37_spill]] %s3317_s7 }
   0x9   :  { %3342 = sst [smem:[#allocation38_spill]] %s3318_s8 }
   0xa   :  { %13 = vsyncpa [#allocation7], 0 }
   0xb   :  { %15 = vsyncpa [#allocation7 + $0x1], 0 }
   0xc   :  { %16 = vsyncpa [#allocation11], 0 }
   0xd   :  { %18 = vsyncpa [#allocation11 + $0x1], 0 }
   0xe   :  { %19 = vsyncpa [#allocation8], 0 }
   0xf   :  { %21 = vsyncpa [#allocation8 + $0x1], 0  ;;  %s2577_s27 = smov 0   ;;  %s2579_s28 = smov 0  }
  0x10   :  { %s2581_s29 = smov 0   ;;  %s2583_s30 = smov 0  }
  0x11   :  { %s2585_s9 = smov 0   ;;  %s2587_s10 = smov 0  }
  0x12   :  { %s2589_s11 = smov 0   ;;  %s2591_s12 = smov 0  }
  0x13   :  { %s2593_s13 = smov 0   ;;  %s2595_s14 = smov 0  }
  0x14   :  { %s2597_s15 = smov 0   ;;  %s2599_s16 = smov 0  }
  0x15   :  { %s2601_s17 = smov 0  }
  0x16 LB: > { %3343 = sst [smem:[#allocation18_spill]] %s2475_s30  ;;  %s2643_s18 = sadd.s32 4294967295, %s2511_s17   ;;  %s2511_s17 = sphi %s2601_s17, %s27_s17   ;;  %s2507_s16 = sphi %s2599_s16, %s3407_s16   ;;  %s2503_s15 = sphi %s2597_s15, %s3406_s15   ;;  %s2499_s14 = sphi %s2595_s14, %s3405_s14   ;;  %s2495_s13 = sphi %s2593_s13, %s3404_s13   ;;  %s2491_s12 = sphi %s2591_s12, %s3403_s12   ;;  %s2487_s11 = sphi %s2589_s11, %s3402_s11   ;;  %s2483_s10 = sphi %s2587_s10, %s3401_s10   ;;  %s2479_s9 = sphi %s2585_s9, %s3400_s9   ;;  %s2475_s30 = sphi %s2583_s30, %s3399_s30   ;;  %s2471_s29 = sphi %s2581_s29, %s3398_s29   ;;  %s2467_s28 = sphi %s2579_s28, %s3397_s28   ;;  %s2463_s27 = sphi %s2577_s27, %s3396_s27  }
  0x17   : > { %3344 = sst [smem:[#allocation19_spill]] %s2487_s11  ;;  %s39_s20 = sadd.s32 1, %s2499_s14 }
  0x18   : > { %3345 = sst [smem:[#allocation20_spill]] %s2491_s12  ;;  %s42_s21 = sadd.s32 1, %s2503_s15 }
  0x19   : > { %3346 = sst [smem:[#allocation21_spill]] %s2495_s13  ;;  %p40_p0 = scmp.ge.s32.totalorder %s39_s20, 2 }
  0x1a   : > { %s46_s22 = sadd.s32 1, %s2507_s16  ;;  %p62_p1 = scmp.ne.s32.totalorder %s2483_s10, %s2479_s9 }
  0x1b   : > { %s3409_s20 = smov (%p40_p0, %s39_s20), 0  ;;  %s3411_s21 = smov (!%p40_p0, %s42_s21), %s2503_s15 }
  0x1c   : > { %3347 = sst [smem:[#allocation22_spill]] %s3409_s20  ;;  %p63_p2 = scmp.eq.s32.totalorder %s2511_s17, 0 }
  0x1d   : > { %p68_p3 = scmp.ne.s32.totalorder %s2479_s9, %s2475_s30  ;;  %p44_p4 = scmp.ge.s32.totalorder %s3411_s21, 2 }
  0x1e   : > { %p3327_p5 = scmp.eq.s32.totalorder %s2643_s18, 0  ;;  %p2664_p6 = por %p63_p2, %p62_p1 }
  0x1f   : > { %s79_s25 = ssub.s32 %s2499_s14, %s3409_s20  ;;  %s3413_s21 = smov (%p44_p4, %s3411_s21), 0 }
  0x20   : > { %3349 = sst [smem:[#allocation23_spill]] %s3413_s21  ;;  %s3415_s22 = smov (!%p44_p4, %s46_s22), %s2507_s16 }
  0x21   : > { %s51_s26 = ssub.s32 %s2503_s15, %s3413_s21  ;;  %p2680_p7 = por %p3327_p5, %p68_p3 }
  0x22   : > { %p48_p8 = scmp.ge.s32.totalorder %s3415_s22, 2  ;;  %s83_s19 = sadd.s32 1, %s2471_s29 }
  0x23   : > { %p90_p9 = scmp.ne.s32.totalorder %s2471_s29, %s2467_s28  ;;  %p124_p10 = scmp.ne.s32.totalorder %s2467_s28, %s2463_s27 }
  0x24   : > { %s3417_s22 = smov (%p48_p8, %s3415_s22), 0  ;;  %p255_p13 = scmp.eq.s32.totalorder %s2643_s18, 7 }
  0x25   : > { %3351 = sst [smem:[#allocation24_spill]] %s3417_s22  ;;  %p2693_p11 = por %p90_p9, %p63_p2 }
  0x26   : > { %p2699_p12 = por %p124_p10, %p3327_p5  ;;  %s50_s8 = ssub.s32 %s2507_s16, %s3417_s22 }
  0x27   : > { %s52_s12 = sor.u32 %s51_s26, %s50_s8  ;;  %s80_s13 = sor.u32 %s79_s25, %s50_s8 }
  0x28   : > { %s3353_s20 = scalar_select %p2699_p12, 1, 0 }
  0x29   : > { %p53_p0 = scmp.eq.s32.totalorder %s52_s12, 0  ;;  %p81_p4 = scmp.eq.s32.totalorder %s80_s13, 0 }
  0x2a   : > { %3354 = sst [smem:[#allocation25_spill]] %s3353_s20  ;;  %p2709_p8 = por %p255_p13, %p62_p1 }
  0x2b   : > { %s3357_s6 = sadd.s32 4294967294, %s2511_s17   ;;  %s3358_s4 = sadd.s32 1, %s2483_s10 }
  0x2c   : > { %s3355_s27 = scalar_select %p2709_p8, 1, 0 }
  0x2d   : > { %p261_p2 = scmp.eq.s32.totalorder %s3357_s6, 7  ;;  %p1856_p10 = scmp.ge.s32.totalorder %s2511_s17, 1 }
  0x2e   : > { %3356 = sst [smem:[#allocation26_spill]] %s3355_s27  ;;  %p268_p5 = scmp.lt.s32.totalorder %s2511_s17, 9 }
  0x2f   : > { %s2718_s5 = scalar_select %p53_p0, %s2483_s10, %s3358_s4  }
  0x30   : > { %s2721_s3 = scalar_select %p81_p4, %s2471_s29, %s83_s19  }
  0x31   : > { %3359 = sst [smem:[#allocation27_spill]] %s2718_s5  ;;  %p2726_p9 = por %p261_p2, %p68_p3 }
  0x32   : > { %3360 = sst [smem:[#allocation28_spill]] %s2721_s3  ;;  %p2735_p1 = pnand %p1856_p10, %p268_p5 }
  0x33   : > { %s3361_s22 = scalar_select %p2726_p9, 1, 0 }
  0x34   : > { %s3363_s7 = sld [smem:[#allocation37_spill]]  ;;  %s2513_s4 = smov [#allocation12]  }
  0x35   : > { %3362 = sst [smem:[#allocation29_spill]] %s3361_s22  ;;  %s293_s6 = sshll.u32 %s2513_s4, 4  ;;  %s294_s6 = int_to_ptr.vmem [resolvable:$true] %s293_s6 }
  0x36   : > { %p2036_p13 = pneg %p2735_p1  ;;  %p3365_p3 = scmp.eq.s32.totalorder %s2643_s18, 0 }
  0x37   : > { %s2514_s19 = smov 64   ;;  %s2515_s26 = smov 4  }
  0x38   : > { %p2037_p0 = pnand %p2036_p13, %p3365_p3  ;;  %p1858_p4 = scmp.ge.s32.totalorder %s2511_s17, 8 }
  0x39   : > { %s307_s8 = sand.u32 (!%p1858_p4), 1, %s2483_s10   ;;  %s2746_s12 = sshll.u32 (!%p1858_p4), %s2507_s16, 3 }
  0x3a   : > { %s291_s13 = sshll.u32 %s3363_s7, 4  ;;  %303 = sbr.rel (%p1858_p4) target bundleno = 91 (0x5b), region = 36  ;;  %s292_s13 = int_to_ptr.hbm [resolvable:$true] %s291_s13 }
  0x3b   : > { %2039 = dma.hbm_to_vmem [thread:$0]  (!%p2037_p0), %s292_s13, 256, %s294_s6, [#allocation11], %s2514_s19, %s2514_s19, %s2515_s26  }
  0x3c   : > { %s1859_s4 = sshll.u32 (!%p1858_p4), %s307_s8, 5  ;;  %s315_s7 = sadd.s32 (!%p1858_p4), %s2503_s15, %s2746_s12 }
  0x3d   : > { %s1861_s5 = sshll.u32 (!%p1858_p4), %s315_s7, 3  ;;  %s311_s3 = scalar_lea.vmem (!%p1858_p4), [#allocation6], %s1859_s4 }
  0x3e   : > { %s320_s22 = sshll.u32 (!%p1858_p4), %s311_s3, 4  ;;  %s3366_s0 = sld [smem:[#allocation30_spill]] (!%p1858_p4)  ;;  %s321_s22 = int_to_ptr.vmem [resolvable:$true] %s320_s22 }
  0x3f   : > { %s308_s19 = scalar_lea.sflag [#allocation7], %s307_s8  ;;  %s2516_s26 = smov 256  }
  0x40   : > { %s2517_s11 = smov 128   ;;  %s2518_s20 = smov 8  }
  0x41   : > { %s331_s3 = sand.u32 (%p2693_p11), 1, %s2471_s29   ;;  %s335_s7 = sadd.s32 (%p2693_p11), %s2499_s14, %s2746_s12 }
  0x42   : > { %329 = sbr.rel (!%p2693_p11) target bundleno = 79 (0x4f), region = 44  ;;  %s1862_s30 = sshll.u32 (%p2693_p11), %s331_s3, 4 }
  0x43   : > { %s3367_s1 = sld [smem:[#allocation31_spill]] (%p2693_p11)  ;;  %s333_s24 = scalar_lea.vmem (%p2693_p11), [#allocation9], %s1862_s30 }
  0x44   : > { %s317_s13 = scalar_lea.hbm %s3366_s0, %s1861_s5  ;;  %s1864_s5 = sshll.u32 (%p2693_p11), %s335_s7, 2 }
  0x45   : > { %s318_s6 = sshll.u32 %s317_s13, 4  ;;  %s319_s6 = int_to_ptr.hbm [resolvable:$true] %s318_s6 }
  0x46   : > { %2028 = dma.hbm_to_vmem [thread:$0]  (%p2664_p6), %s319_s6, 512, %s321_s22, %s308_s19, %s2516_s26, %s2517_s11, %s2518_s20  }
  0x49   : > { %s337_s8 = scalar_lea.vmem %s3367_s1, %s1864_s5 }
  0x4a   : > { %v354_v0 = vld [vmem:[%s337_s8] sm:$0xf]  ;;  %v356_v1 = vld [vmem:[%s337_s8 + $0x8] sm:$0xf]  ;;  %v358_v2 = vld [vmem:[%s337_s8 + $0x10] sm:$0xf] }
  0x4b   : > { %355 = vst [vmem:[%s333_s24] sm:$0xf] %v354_v0  ;;  %v360_v3 = vld [vmem:[%s337_s8 + $0x18] sm:$0xf] }
  0x4c   : > { %357 = vst [vmem:[%s333_s24 + $0x4] sm:$0xf] %v356_v1 }
  0x4d   : > { %359 = vst [vmem:[%s333_s24 + $0x8] sm:$0xf] %v358_v2 }
  0x4e   : > { %361 = vst [vmem:[%s333_s24 + $0xc] sm:$0xf] %v360_v3 }
  0x4f PF: > { %s394_s20 = sand.u32 1, %s2511_s17   ;;  %s396_s22 = sand.u32 1, %s2471_s29  }
  0x50   : > { %s1865_s13 = sshll.u32 %s396_s22, 4  ;;  %s402_s6 = sadd.s32 %s2499_s14, %s2746_s12 }
  0x51   : > { %s1867_s19 = sshll.u32 %s402_s6, 2  ;;  %s398_s26 = scalar_lea.vmem [#allocation10], %s1865_s13 }
  0x52   : > { %s407_s3 = sshll.u32 %s398_s26, 4  ;;  %s3368_s2 = sld [smem:[#allocation32_spill]]  ;;  %s408_s3 = int_to_ptr.vmem [resolvable:$true] %s407_s3 }
  0x53   : > { %s395_s4 = scalar_lea.sflag [#allocation11], %s394_s20  ;;  %s2519_s8 = smov 64  }
  0x54   : > { %s2520_s24 = smov 4  }
  0x58   : > { %s404_s5 = scalar_lea.hbm %s3368_s2, %s1867_s19 }
  0x59   : > { %s405_s27 = sshll.u32 %s404_s5, 4  ;;  %s406_s27 = int_to_ptr.hbm [resolvable:$true] %s405_s27 }
  0x5a   : > { %2029 = dma.hbm_to_vmem [thread:$0]  (%p2693_p11), %s406_s27, 256, %s408_s3, %s395_s4, %s2517_s11, %s2519_s8, %s2520_s24  }
  0x5b PF: > { %419 = sbr.rel (%p2735_p1) target bundleno = 1677 (0x68d), region = 89  ;;  %s2777_s12 = sand.u32 (!%p2735_p1), 1, %s2479_s9  }
  0x5c   : > { %s1869_s22 = sshll.u32 (!%p2735_p1), %s2777_s12, 5  ;;  %s422_s13 = scalar_lea.sflag (!%p2735_p1), [#allocation7], %s2777_s12 }
  0x5d   : > { %s2781_s6 = scalar_lea.vmem (!%p2735_p1), [#allocation6], %s1869_s22 }
  0x60   : > { %2446 = dma.done.wait (%p2680_p7), %s422_s13, 512  }
  0x61   : > { %2448 = vsyncadd (%p2680_p7), %s422_s13, 4294966784  ;;  %s432_s21 = sand.u32 1, %s2467_s28   ;;  %s438_s25 = sand.u32 1, %s2643_s18  }
  0x62   : > { %s2789_s20 = sshll.u32 %s432_s21, 4  ;;  %s439_s26 = scalar_lea.sflag [#allocation11], %s438_s25 }
  0x63   : > { %s434_s19 = scalar_lea.vmem [#allocation9], %s2789_s20  ;;  %s442_s3 = scalar_lea.vmem [#allocation10], %s2789_s20 }
  0x64   : > { %2450 = dma.done.wait (%p2699_p12), %s439_s26, 256  }
  0x65   : > { %2452 = vsyncadd (%p2699_p12), %s439_s26, 4294967040  ;;  %p3370_p5 = scmp.eq.s32.totalorder %s2643_s18, 0 }
  0x67   : > { %2454 = dma.done.wait (%p3370_p5), [#allocation11], 256   ;;  %p3371_p6 = pmov %p3370_p5 }
  0x68   : > { %s2801_s23 = scalar_lea.vmem [#allocation13], %s1869_s22  ;;  %s3372_s7 = sld [smem:[#allocation19_spill]] }
  0x69   : > { %2456 = vsyncadd (%p3371_p6), [#allocation11], 4294967040 }
  0x6e   : > { %p1874_p7 = scmp.ne.s32.totalorder %s3372_s7, 0 }
  0x6f   : > { %s3373_s5 = sld [smem:[#allocation33_spill]] (!%p1874_p7) }
  0x70   : > { %494 = sbr.rel (%p1874_p7) target bundleno = 267 (0x10b), region = 109 }
  0x75   : > { %v497_v4 = vld [vmem:[%s2781_s6 + $0x10] sm:$0xff]  ;;  %v498_v5 = vld [vmem:[%s2781_s6 + $0x18] sm:$0xff]  ;;  %v495_v6 = vld [vmem:[%s2781_s6] sm:$0xff]  ;;  %vm515_vm0 = vcmask 261120   ;;  %v2521_v12 = vmov -inf   ;;  %v2522_v13 = vmov 0.0  }
  0x76   : > { %v500_v7 = vpack.c.bf16 %v498_v5, %v497_v4  ;;  %v496_v8 = vld [vmem:[%s2781_s6 + $0x8] sm:$0xff]  ;;  %v1990_v11 = vld [vmem:[%s3373_s5 + $0x8] sm:$0xff]  ;;  %553 = vst [vmem:[#allocation3] sm:$0x1] %v2521_v12 }
  0x77   : > { %v499_v9 = vpack.c.bf16 %v496_v8, %v495_v6  ;;  %v1989_v10 = vld [vmem:[%s3373_s5] sm:$0xff]  ;;  %554 = vst [vmem:[#allocation3 + $0x1] sm:$0x1] %v2521_v12 }
  0x78   : > { %528 = vmatpush.bf16.msra.mxu0 %v500_v7  ;;  %2020 = vmatpush.bf16.msra.mxu1 %v500_v7  ;;  %555 = vst [vmem:[#allocation4] sm:$0x1] %v2522_v13 }
  0x79   : > { %556 = vst [vmem:[#allocation4 + $0x1] sm:$0x1] %v2522_v13 }
  0x7a   : > { %557 = vst [vmem:[#allocation5 + $0x8] sm:$0xff] %v2522_v13 }
  0x7b   : > { %558 = vst [vmem:[#allocation5 + $0x10] sm:$0xff] %v2522_v13 }
  0x7c   : > { %529 = vmatpush.bf16.msra.mxu0 %v499_v9  ;;  %2021 = vmatpush.bf16.msra.mxu1 %v499_v9  ;;  %559 = vst [vmem:[#allocation5] sm:$0xff] %v2522_v13 }
  0x7d   : > { %560 = vst [vmem:[#allocation5 + $0x18] sm:$0xff] %v2522_v13 }
  0x7f   : > { %1883 = vmatmul.msk.bf16.vlgmr.msra.gmra.mxu0 %vm515_vm0, %v1989_v10  ;;  %1884 = vmatmul.msk.bf16.vlgmr.msra.gmra.mxu1 %vm515_vm0, %v1990_v11 }
  0xfc   : > { %v531_v14 = vpop.f32.mrf.mxu0  ;;  %v536_v15 = vpop.f32.mrf.mxu1 }
  0xfd   : > { %v541_v18 = vmul.f32 0.25, %v531_v14  ;;  %v543_v19 = vmul.f32 0.25, %v536_v15 }
 0x104   : > { %v533_v16 = vpop.f32.mrf.mxu0  ;;  %v538_v17 = vpop.f32.mrf.mxu1 }
 0x105   : > { %v542_v20 = vmul.f32 0.25, %v533_v16  ;;  %v544_v21 = vmul.f32 0.25, %v538_v17 }
 0x107   : > { %v2012_v22 = vpack.c.bf16 %v542_v20, %v541_v18  ;;  %v2017_v23 = vpack.c.bf16 %v544_v21, %v543_v19 }
 0x109   : > { %2013 = vst [vmem:[#allocation2] sm:$0xff] %v2012_v22  }
 0x10a   : > { %2019 = vst [vmem:[#allocation2 + $0x8] sm:$0xff] %v2017_v23  }
 0x10b PF: > { %v1991_v24 = vld [vmem:[%s434_s19] sm:$0xff]  ;;  %v1992_v25 = vld [vmem:[%s434_s19 + $0x8] sm:$0xff]  ;;  %vm601_vm1 = vcmask 130048   ;;  %s3374_s8 = sld [smem:[#allocation19_spill]] }
 0x10c   : > { %2171 = vxpose.binary.xlu0.c.b16.start.end [1/2] (short) %v1992_v25, %v1991_v24, 128 }
 0x110   : > { %v1995_v26 = vld [vmem:[#allocation2] sm:$0xff] }
 0x111   : > { %633 = vmatpush.bf16.msra.mxu0 %v1995_v26  ;;  %2022 = vmatpush.bf16.msra.mxu2 %v1995_v26  ;;  %v1996_v27 = vld [vmem:[#allocation2 + $0x8] sm:$0xff]  ;;  %p1925_p11 = scmp.ne.s32.totalorder %s3374_s8, 1 }
 0x112   : > { %734 = vmatpush.bf16.msra.mxu1 %v1996_v27  ;;  %2023 = vmatpush.bf16.msra.mxu3 %v1996_v27  ;;  %s3375_s13 = sld [smem:[#allocation35_spill]] (!%p1925_p11) }
 0x113   : > { %s3381_s18 = sld [smem:[#allocation34_spill]] (!%p1925_p11) }
 0x114   : > { %s3382_s24 = sld [smem:[#allocation36_spill]] (!%p1925_p11) }
 0x118   : > { %s3376_s21 = smov (!%p1925_p11), %s3375_s13 }
 0x1b8   : > { %v2172_v28 = vpop.trf.xlu0 }
 0x1b9   : > { %1893 = vmatmul.msk.bf16.vlgmr.msra.gmra.mxu0 %vm601_vm1, %v2172_v28 }
 0x1c0   : > { %v2173_v29 = vpop.trf.xlu0 }
 0x1c1   : > { %1909 = vmatmul.msk.bf16.vlgmr.msra.gmra.mxu1 %vm601_vm1, %v2173_v29 }
 0x1c8   : > { %v2174_v30 = vpop.trf.xlu0 }
 0x1c9   : > { %1894 = vmatmul.msk.bf16.gmra.mxu0 %vm601_vm1, %v2174_v30 }
 0x1d0   : > { %v2175_v31 = vpop.trf.xlu0 }
 0x1d1   : > { %1910 = vmatmul.msk.bf16.gmra.mxu1 %vm601_vm1, %v2175_v31 }
 0x1d8   : > { %v2176_v32 = vpop.trf.xlu0 }
 0x1d9   : > { %1895 = vmatmul.msk.bf16.gmra.mxu0 %vm601_vm1, %v2176_v32 }
 0x1e0   : > { %v2177_v33 = vpop.trf.xlu0 }
 0x1e1   : > { %1911 = vmatmul.msk.bf16.gmra.mxu1 %vm601_vm1, %v2177_v33 }
 0x1e8   : > { %v2178_v34 = vpop.trf.xlu0 }
 0x1e9   : > { %1896 = vmatmul.msk.bf16.gmra.mxu0 %vm601_vm1, %v2178_v34 }
 0x1f0   : > { %v2179_v35 = vpop.trf.xlu0 }
 0x1f1   : > { %1912 = vmatmul.msk.bf16.gmra.mxu1 %vm601_vm1, %v2179_v35 }
 0x1f8   : > { %v2180_v36 = vpop.trf.xlu0 }
 0x1f9   : > { %1897 = vmatmul.msk.bf16.gmra.mxu0 %vm601_vm1, %v2180_v36 }
 0x200   : > { %v2181_v37 = vpop.trf.xlu0 }
 0x201   : > { %1913 = vmatmul.msk.bf16.gmra.mxu1 %vm601_vm1, %v2181_v37 }
 0x208   : > { %v2182_v38 = vpop.trf.xlu0 }
 0x209   : > { %1898 = vmatmul.msk.bf16.vlgmr.msra.gmra.mxu2 %vm601_vm1, %v2182_v38 }
 0x210   : > { %v2183_v39 = vpop.trf.xlu0 }
 0x211   : > { %1914 = vmatmul.msk.bf16.vlgmr.msra.gmra.mxu3 %vm601_vm1, %v2183_v39 }
 0x218   : > { %v2184_v40 = vpop.trf.xlu0 }
 0x219   : > { %1899 = vmatmul.msk.bf16.gmra.mxu2 %vm601_vm1, %v2184_v40 }
 0x220   : > { %v2185_v41 = vpop.trf.xlu0 }
 0x221   : > { %1915 = vmatmul.msk.bf16.gmra.mxu3 %vm601_vm1, %v2185_v41 }
 0x228   : > { %v2186_v42 = vpop.trf.xlu0 }
 0x229   : > { %1900 = vmatmul.msk.bf16.gmra.mxu2 %vm601_vm1, %v2186_v42 }
 0x230   : > { %v2187_v43 = vpop.trf.xlu0 }
 0x231   : > { %1916 = vmatmul.msk.bf16.gmra.mxu3 %vm601_vm1, %v2187_v43 }
 0x236   : > { %v2834_v44 = vpop.f32.mrf.mxu0 }
 0x23e   : > { %v2836_v45 = vpop.f32.mrf.mxu1  ;;  %v2838_v46 = vpop.f32.mrf.mxu0 }
 0x246   : > { %v2840_v47 = vpop.f32.mrf.mxu1  ;;  %v2842_v48 = vpop.f32.mrf.mxu0 }
 0x247   : > { %v778_v4 = vmax.f32 %v2834_v44, %v2842_v48 }
 0x24e   : > { %v2844_v49 = vpop.f32.mrf.mxu1  ;;  %v2846_v50 = vpop.f32.mrf.mxu0 }
 0x24f   : > { %v779_v5 = vmax.f32 %v2838_v46, %v2846_v50  ;;  %v799_v16 = vmax.f32 %v2836_v45, %v2844_v49 }
 0x256   : > { %v2848_v51 = vpop.f32.mrf.mxu1  ;;  %v2850_v52 = vpop.f32.mrf.mxu0 }
 0x257   : > { %v780_v7 = vmax.f32 %v778_v4, %v2850_v52  ;;  %v800_v17 = vmax.f32 %v2840_v47, %v2848_v51 }
 0x25e   : > { %v2852_v53 = vpop.f32.mrf.mxu1  ;;  %v2854_v54 = vpop.f32.mrf.mxu0 }
 0x25f   : > { %v781_v8 = vmax.f32 %v779_v5, %v2854_v54  ;;  %v801_v20 = vmax.f32 %v799_v16, %v2852_v53 }
 0x266   : > { %v2856_v55 = vpop.f32.mrf.mxu1  ;;  %v2860_v57 = vpop.f32.mrf.mxu0 }
 0x267   : > { %v782_v12 = vmax.f32 %v780_v7, %v2860_v57  ;;  %v802_v21 = vmax.f32 %v800_v17, %v2856_v55 }
 0x26e   : > { %v2866_v60 = vpop.f32.mrf.mxu1  ;;  %v2868_v61 = vpop.f32.mrf.mxu0 }
 0x26f   : > { %v783_v13 = vmax.f32 %v781_v8, %v2868_v61  ;;  %v803_v27 = vmax.f32 %v801_v20, %v2866_v60  ;;  %v2930_v8 = vld [vmem:[#allocation3] sm:$0x1] }
 0x276   : > { %v2874_v0 = vpop.f32.mrf.mxu1  ;;  %v2876_v1 = vpop.f32.mrf.mxu0 }
 0x277   : > { %v784_v14 = vmax.f32 %v782_v12, %v2876_v1  ;;  %v804_v28 = vmax.f32 %v802_v21, %v2874_v0 }
 0x27e   : > { %v2886_v6 = vpop.f32.mrf.mxu1  ;;  %v2890_v9 = vpop.f32.mrf.mxu0 }
 0x27f   : > { %v785_v15 = vmax.f32 %v783_v13, %v2890_v9  ;;  %v805_v31 = vmax.f32 %v803_v27, %v2886_v6 }
 0x286   : > { %v2908_v22 = vpop.f32.mrf.mxu1 }
 0x287   : > { %v806_v32 = vmax.f32 %v804_v28, %v2908_v22 }
 0x28c   : > { %v2858_v56 = vpop.f32.mrf.mxu2 }
 0x28d   : > { %v786_v18 = vmax.f32 %v784_v14, %v2858_v56 }
 0x294   : > { %v2862_v58 = vpop.f32.mrf.mxu2  ;;  %v2864_v59 = vpop.f32.mrf.mxu3 }
 0x295   : > { %v787_v19 = vmax.f32 %v785_v15, %v2862_v58  ;;  %v807_v34 = vmax.f32 %v805_v31, %v2864_v59 }
 0x29c   : > { %v2870_v62 = vpop.f32.mrf.mxu2  ;;  %v2872_v63 = vpop.f32.mrf.mxu3 }
 0x29d   : > { %v788_v23 = vmax.f32 %v786_v18, %v2870_v62  ;;  %v808_v35 = vmax.f32 %v806_v32, %v2872_v63 }
 0x2a4   : > { %v2878_v2 = vpop.f32.mrf.mxu2  ;;  %v2880_v3 = vpop.f32.mrf.mxu3 }
 0x2a5   : > { %v789_v24 = vmax.f32 %v787_v19, %v2878_v2  ;;  %v809_v37 = vmax.f32 %v807_v34, %v2880_v3 }
 0x2ac   : > { %v2892_v10 = vpop.f32.mrf.mxu2  ;;  %v2894_v11 = vpop.f32.mrf.mxu3 }
 0x2ad   : > { %v790_v29 = vmax.f32 %v788_v23, %v2892_v10  ;;  %v810_v38 = vmax.f32 %v808_v35, %v2894_v11 }
 0x2b4   : > { %v2912_v25 = vpop.f32.mrf.mxu2  ;;  %v2914_v26 = vpop.f32.mrf.mxu3 }
 0x2b5   : > { %v791_v30 = vmax.f32 %v789_v24, %v2912_v25  ;;  %v811_v42 = vmax.f32 %v809_v37, %v2914_v26 }
 0x2b7   : > { %v792_v33 = vmax.f32 %v790_v29, %v791_v30 }
 0x2b9   : > { %v793_v36 = vrot.slane %v792_v33, 4 }
 0x2bb   : > { %v794_v39 = vmax.f32 %v792_v33, %v793_v36 }
 0x2bc   : > { %v2926_v40 = vpop.f32.mrf.mxu3 }
 0x2bd   : > { %v795_v41 = vrot.slane %v794_v39, 2  ;;  %v812_v43 = vmax.f32 %v810_v38, %v2926_v40 }
 0x2bf   : > { %v796_v4 = vmax.f32 %v794_v39, %v795_v41  ;;  %v813_v5 = vmax.f32 %v811_v42, %v812_v43 }
 0x2c1   : > { %v797_v7 = vrot.slane %v796_v4, 1  ;;  %v814_v12 = vrot.slane %v813_v5, 4 }
 0x2c3   : > { %v798_v13 = vmax.f32 %v796_v4, %v797_v7  ;;  %v815_v15 = vmax.f32 %v813_v5, %v814_v12 }
 0x2c5   : > { %v2933_v14 = vmax.f32 %v2930_v8, %v798_v13  ;;  %v816_v21 = vrot.slane %v815_v15, 2 }
 0x2c7   : > { %v830_v16 = vperm.slane %v2933_v14, 0  ;;  %1170 = vst [vmem:[#allocation3] sm:$0x1] %v2933_v14 }
 0x2c9   : > { %v834_v17 = vsub.f32 %v2834_v44, %v830_v16  ;;  %v835_v18 = vsub.f32 %v2838_v46, %v830_v16  ;;  %v836_v19 = vsub.f32 %v2842_v48, %v830_v16  ;;  %v837_v20 = vsub.f32 %v2846_v50, %v830_v16 }
 0x2ca   : > { %v838_v23 = vsub.f32 %v2850_v52, %v830_v16  ;;  %v839_v24 = vsub.f32 %v2854_v54, %v830_v16  ;;  %v840_v27 = vsub.f32 %v2860_v57, %v830_v16  ;;  %v841_v31 = vsub.f32 %v2868_v61, %v830_v16 }
 0x2cb   : > { %v866_v28 = vmul.f32 1.442695, %v834_v17  ;;  %v868_v29 = vmul.f32 1.442695, %v835_v18  ;;  %v870_v30 = vmul.f32 1.442695, %v836_v19  ;;  %v817_v44 = vmax.f32 %v815_v15, %v816_v21 }
 0x2cc   : > { %v872_v32 = vmul.f32 1.442695, %v837_v20  ;;  %v842_v46 = vsub.f32 %v2876_v1, %v830_v16  ;;  %v874_v48 = vmul.f32 1.442695, %v838_v23  ;;  %v843_v50 = vsub.f32 %v2890_v9, %v830_v16  ;;  %v2950_v1 = vld [vmem:[#allocation3 + $0x1] sm:$0x1] }
 0x2cd   : > { %2188 = vpow2.f32 %v866_v28  ;;  %v876_v33 = vmul.f32 1.442695, %v839_v24  ;;  %v844_v52 = vsub.f32 %v2858_v56, %v830_v16  ;;  %v878_v54 = vmul.f32 1.442695, %v840_v27 }
 0x2ce   : > { %2190 = vpow2.f32 %v868_v29  ;;  %v845_v57 = vsub.f32 %v2862_v58, %v830_v16  ;;  %v880_v34 = vmul.f32 1.442695, %v841_v31  ;;  %v818_v35 = vrot.slane %v817_v44, 1 }
 0x2cf   : > { %2192 = vpow2.f32 %v870_v30  ;;  %v846_v61 = vsub.f32 %v2870_v62, %v830_v16  ;;  %v882_v36 = vmul.f32 1.442695, %v842_v46  ;;  %v847_v37 = vsub.f32 %v2878_v2, %v830_v16 }
 0x2d0   : > { %2194 = vpow2.f32 %v872_v32  ;;  %v884_v9 = vmul.f32 1.442695, %v843_v50  ;;  %v819_v38 = vmax.f32 %v817_v44, %v818_v35  ;;  %v848_v56 = vsub.f32 %v2892_v10, %v830_v16 }
 0x2d1   : > { %2196 = vpow2.f32 %v874_v48  ;;  %v886_v58 = vmul.f32 1.442695, %v844_v52  ;;  %v849_v42 = vsub.f32 %v2912_v25, %v830_v16  ;;  %v888_v62 = vmul.f32 1.442695, %v845_v57 }
 0x2d2   : > { %2198 = vpow2.f32 %v876_v33  ;;  %v2960_v43 = vmax.f32 %v2950_v1, %v819_v38  ;;  %v890_v2 = vmul.f32 1.442695, %v846_v61  ;;  %v892_v10 = vmul.f32 1.442695, %v847_v37 }
 0x2d3   : > { %v2953_v39 = vpop.eup %2188  ;;  %2200 = vpow2.f32 %v878_v54  ;;  %v894_v13 = vmul.f32 1.442695, %v848_v56  ;;  %v896_v17 = vmul.f32 1.442695, %v849_v42 }
 0x2d4   : > { %v2956_v41 = vpop.eup %2190  ;;  %2202 = vpow2.f32 %v880_v34  ;;  %v2969_v12 = vperm.slane %v2960_v43, 0  ;;  %1171 = vst [vmem:[#allocation3 + $0x1] sm:$0x1] %v2960_v43 }
 0x2d5   : > { %v2962_v4 = vpop.eup %2192  ;;  %2204 = vpow2.f32 %v882_v36  ;;  %v966_v5 = vadd.f32 %v2956_v41, %v2953_v39 }
 0x2d6   : > { %v2966_v7 = vpop.eup %2194  ;;  %2206 = vpow2.f32 %v884_v9  ;;  %v850_v20 = vsub.f32 %v2836_v45, %v2969_v12  ;;  %v851_v23 = vsub.f32 %v2840_v47, %v2969_v12  ;;  %v852_v24 = vsub.f32 %v2844_v49, %v2969_v12 }
 0x2d7   : > { %v2972_v25 = vpop.eup %2196  ;;  %2208 = vpow2.f32 %v886_v58  ;;  %v967_v15 = vadd.f32 %v2962_v4, %v966_v5  ;;  %v853_v27 = vsub.f32 %v2848_v51, %v2969_v12  ;;  %v854_v45 = vsub.f32 %v2852_v53, %v2969_v12 }
 0x2d8   : > { %v2975_v16 = vpop.eup %2198  ;;  %2210 = vpow2.f32 %v888_v62  ;;  %v855_v30 = vsub.f32 %v2856_v55, %v2969_v12  ;;  %v856_v47 = vsub.f32 %v2866_v60, %v2969_v12  ;;  %v857_v49 = vsub.f32 %v2874_v0, %v2969_v12 }
 0x2d9   : > { %v2977_v18 = vpop.eup %2200  ;;  %2212 = vpow2.f32 %v890_v2  ;;  %v968_v19 = vadd.f32 %v2966_v7, %v967_v15  ;;  %v858_v51 = vsub.f32 %v2886_v6, %v2969_v12  ;;  %v859_v53 = vsub.f32 %v2908_v22, %v2969_v12 }
 0x2da   : > { %v2982_v21 = vpop.eup %2202  ;;  %2214 = vpow2.f32 %v892_v10  ;;  %v860_v55 = vsub.f32 %v2864_v59, %v2969_v12  ;;  %v861_v46 = vsub.f32 %v2872_v63, %v2969_v12  ;;  %v862_v60 = vsub.f32 %v2880_v3, %v2969_v12 }
 0x2db   : > { %v2990_v28 = vpop.eup %2204  ;;  %2216 = vpow2.f32 %v894_v13  ;;  %v969_v29 = vadd.f32 %v2972_v25, %v968_v19  ;;  %v898_v0 = vmul.f32 1.442695, %v850_v20  ;;  %v900_v50 = vmul.f32 1.442695, %v851_v23 }
 0x2dc   : > { %v2997_v31 = vpop.eup %2206  ;;  %2218 = vpow2.f32 %v896_v17  ;;  %v902_v33 = vmul.f32 1.442695, %v852_v24  ;;  %v863_v54 = vsub.f32 %v2894_v11, %v2969_v12  ;;  %v864_v57 = vsub.f32 %v2914_v26, %v2969_v12 }
 0x2dd   : > { %v2209_v32 = vpop.eup %2208  ;;  %v970_v44 = vadd.f32 %v2975_v16, %v969_v29  ;;  %v865_v59 = vsub.f32 %v2926_v40, %v2969_v12  ;;  %2220 = vpow2.f32 %v898_v0  ;;  %v904_v34 = vmul.f32 1.442695, %v853_v27 }
 0x2de   : > { %v2211_v48 = vpop.eup %2210  ;;  %v906_v3 = vmul.f32 1.442695, %v854_v45  ;;  %v940_v35 = vpack.c.bf16 %v2209_v32, %v2209_v32  ;;  %2222 = vpow2.f32 %v900_v50  ;;  %v908_v37 = vmul.f32 1.442695, %v855_v30 }
 0x2df   : > { %v2213_v6 = vpop.eup %2212  ;;  %v971_v52 = vadd.f32 %v2977_v18, %v970_v44  ;;  %v910_v9 = vmul.f32 1.442695, %v856_v47  ;;  %2224 = vpow2.f32 %v902_v33  ;;  %v912_v26 = vmul.f32 1.442695, %v857_v49 }
 0x2e0   : > { %v3021_v63 = vpop.eup %2214  ;;  %v914_v38 = vmul.f32 1.442695, %v858_v51  ;;  %v918_v56 = vmul.f32 1.442695, %v860_v55  ;;  %v920_v58 = vmul.f32 1.442695, %v861_v46  ;;  %2226 = vpow2.f32 %v904_v34 }
 0x2e1   : > { %v3023_v61 = vpop.eup %2216  ;;  %v972_v36 = vadd.f32 %v2982_v21, %v971_v52  ;;  %v922_v42 = vmul.f32 1.442695, %v862_v60  ;;  %v924_v62 = vmul.f32 1.442695, %v863_v54  ;;  %v942_v10 = vpack.c.bf16 %v2213_v6, %v2213_v6 }
 0x2e2   : > { %v3026_v11 = vpop.eup %2218  ;;  %v944_v2 = vpack.c.bf16 %v3023_v61, %v3023_v61  ;;  %2228 = vpow2.f32 %v906_v3  ;;  %v943_v15 = vpack.c.bf16 %v3021_v63, %v3021_v63  ;;  %v941_v17 = vpack.c.bf16 %v2211_v48, %v2211_v48 }
 0x2e3   : > { %v973_v40 = vadd.f32 %v2990_v28, %v972_v36  ;;  %v945_v5 = vpack.c.bf16 %v3026_v11, %v3026_v11  ;;  %v3036_v19 = vpop.eup %2220  ;;  %2230 = vpow2.f32 %v908_v37  ;;  %v1046_v24 = vunpack.c.l.b16 %v942_v10 }
 0x2e4   : > { %v1048_v20 = vunpack.c.l.b16 %v944_v2  ;;  %v3038_v27 = vpop.eup %2222  ;;  %2232 = vpow2.f32 %v910_v9  ;;  %v1047_v45 = vunpack.c.l.b16 %v943_v15  ;;  %v1044_v30 = vunpack.c.l.b16 %v940_v35 }
 0x2e5   : > { %v974_v13 = vadd.f32 %v2997_v31, %v973_v40  ;;  %v1049_v23 = vunpack.c.l.b16 %v945_v5  ;;  %v3040_v47 = vpop.eup %2224  ;;  %2234 = vpow2.f32 %v912_v26  ;;  %v987_v49 = vadd.f32 %v3038_v27, %v3036_v19 }
 0x2e6   : > { %v1045_v44 = vunpack.c.l.b16 %v941_v17  ;;  %2236 = vpow2.f32 %v914_v38  ;;  %v926_v46 = vmul.f32 1.442695, %v864_v57  ;;  %v928_v60 = vmul.f32 1.442695, %v865_v59  ;;  %v3044_v0 = vpop.eup %2226 }
 0x2e7   : > { %v975_v29 = vadd.f32 %v2209_v32, %v974_v13  ;;  %v1057_v51 = vpack.c.b16 %v1049_v23, %v1048_v20  ;;  %2238 = vpow2.f32 %v918_v56  ;;  %v988_v32 = vadd.f32 %v3040_v47, %v987_v49 }
 0x2e8   : > { %v1056_v50 = vpack.c.b16 %v1047_v45, %v1046_v24  ;;  %v1055_v33 = vpack.c.b16 %v1045_v44, %v1044_v30  ;;  %v3047_v52 = vpop.eup %2228  ;;  %2240 = vpow2.f32 %v920_v58  ;;  %v938_v34 = vpack.c.bf16 %v2990_v28, %v2990_v28 }
 0x2e9   : > { %v976_v55 = vadd.f32 %v2211_v48, %v975_v29  ;;  %1066 = vmatpush.bf16.msrb.mxu2 %v1057_v51  ;;  %v936_v48 = vpack.c.bf16 %v2977_v18, %v2977_v18  ;;  %v3053_v57 = vpop.eup %2230  ;;  %2242 = vpow2.f32 %v922_v42  ;;  %v989_v59 = vadd.f32 %v3044_v0, %v988_v32 }
 0x2ea   : > { %v939_v3 = vpack.c.bf16 %v2997_v31, %v2997_v31  ;;  %v937_v35 = vpack.c.bf16 %v2982_v21, %v2982_v21  ;;  %v3060_v36 = vpop.eup %2232  ;;  %v916_v28 = vmul.f32 1.442695, %v859_v53  ;;  %2244 = vpow2.f32 %v924_v62 }
 0x2eb   : > { %v977_v54 = vadd.f32 %v2213_v6, %v976_v55  ;;  %v1040_v18 = vunpack.c.l.b16 %v936_v48  ;;  %v3066_v37 = vpop.eup %2234  ;;  %2246 = vpow2.f32 %v926_v46  ;;  %v990_v9 = vadd.f32 %v3047_v52, %v989_v59 }
 0x2ec   : > { %v1041_v31 = vunpack.c.l.b16 %v937_v35  ;;  %v3069_v26 = vpop.eup %2236  ;;  %2248 = vpow2.f32 %v928_v60  ;;  %v1042_v56 = vunpack.c.l.b16 %v938_v34  ;;  %v1043_v22 = vunpack.c.l.b16 %v939_v3 }
 0x2ed   : > { %v978_v6 = vadd.f32 %v3021_v63, %v977_v54  ;;  %1067 = vmatpush.bf16.msrb.mxu2 %v1056_v50  ;;  %v2239_v38 = vpop.eup %2238  ;;  %v991_v63 = vadd.f32 %v3053_v57, %v990_v9  ;;  %2250 = vpow2.f32 %v916_v28  ;;  %v934_v13 = vpack.c.bf16 %v2972_v25, %v2972_v25 }
 0x2ee   : > { %v1053_v12 = vpack.c.b16 %v1041_v31, %v1040_v18  ;;  %v2241_v53 = vpop.eup %2240  ;;  %v1054_v10 = vpack.c.b16 %v1043_v22, %v1042_v56  ;;  %v935_v15 = vpack.c.bf16 %v2975_v16, %v2975_v16  ;;  %v822_v23 = vsub.f32 %v2930_v8, %v2933_v14 }
 0x2ef   : > { %v979_v21 = vadd.f32 %v3023_v61, %v978_v6  ;;  %v2243_v58 = vpop.eup %2242  ;;  %v992_v42 = vadd.f32 %v3060_v36, %v991_v63  ;;  %v932_v25 = vpack.c.bf16 %v2962_v4, %v2962_v4  ;;  %v933_v16 = vpack.c.bf16 %v2966_v7, %v2966_v7 }
 0x2f0   : > { %v2245_v62 = vpop.eup %2244  ;;  %v958_v45 = vpack.c.bf16 %v2243_v58, %v2243_v58  ;;  %v1038_v60 = vunpack.c.l.b16 %v934_v13  ;;  %v1039_v32 = vunpack.c.l.b16 %v935_v15  ;;  %v956_v8 = vpack.c.bf16 %v2239_v38, %v2239_v38 }
 0x2f1   : > { %v980_v40 = vadd.f32 %v3026_v11, %v979_v21  ;;  %1068 = vmatpush.bf16.msrb.mxu2 %v1055_v33  ;;  %v2247_v5 = vpop.eup %2246  ;;  %v993_v61 = vadd.f32 %v3066_v37, %v992_v42  ;;  %v959_v30 = vpack.c.bf16 %v2245_v62, %v2245_v62  ;;  %v957_v14 = vpack.c.bf16 %v2241_v53, %v2241_v53 }
 0x2f2   : > { %v2249_v17 = vpop.eup %2248  ;;  %v960_v11 = vpack.c.bf16 %v2247_v5, %v2247_v5  ;;  %v824_v50 = vmul.f32 1.442695, %v822_v23  ;;  %v1114_v34 = vunpack.c.l.b16 %v958_v45  ;;  %v930_v3 = vpack.c.bf16 %v2953_v39, %v2953_v39 }
 0x2f3   : > { %v981_v2 = vrot.slane %v980_v40, 4  ;;  %v994_v24 = vadd.f32 %v3069_v26, %v993_v61  ;;  %v961_v29 = vpack.c.bf16 %v2249_v17, %v2249_v17  ;;  %v2251_v49 = vpop.eup %2250  ;;  %v1115_v48 = vunpack.c.l.b16 %v959_v30  ;;  %v962_v61 = vld [vmem:[#allocation4] sm:$0x1] }
 0x2f4   : > { %v1116_v44 = vunpack.c.l.b16 %v960_v11  ;;  %v931_v4 = vpack.c.bf16 %v2956_v41, %v2956_v41  ;;  %v1052_v35 = vpack.c.b16 %v1039_v32, %v1038_v60  ;;  %v1036_v6 = vunpack.c.l.b16 %v932_v25 }
 0x2f5   : > { %v982_v20 = vadd.f32 %v981_v2, %v980_v40  ;;  %1069 = vmatpush.bf16.msrb.mxu2 %v1054_v10  ;;  %v995_v55 = vadd.f32 %v2251_v49, %v994_v24  ;;  %v1117_v46 = vunpack.c.l.b16 %v961_v29  ;;  %v1037_v28 = vunpack.c.l.b16 %v933_v16  ;;  %v1993_v24 = vld [vmem:[%s442_s3] sm:$0xff] }
 0x2f6   : > { %v1112_v18 = vunpack.c.l.b16 %v956_v8  ;;  %v954_v9 = vpack.c.bf16 %v3069_v26, %v3069_v26  ;;  %v955_v31 = vpack.c.bf16 %v2251_v49, %v2251_v49  ;;  %v1113_v63 = vunpack.c.l.b16 %v957_v14 }
 0x2f7   : > { %v983_v51 = vrot.slane %v982_v20, 2  ;;  %v996_v33 = vadd.f32 %v2239_v38, %v995_v55  ;;  %v1125_v54 = vpack.c.b16 %v1117_v46, %v1116_v44  ;;  %v1124_v38 = vpack.c.b16 %v1115_v48, %v1114_v34  ;;  %v1994_v48 = vld [vmem:[%s442_s3 + $0x8] sm:$0xff] }
 0x2f8   : > { %2252 = vpow2.f32 %v824_v50  ;;  %v1051_v22 = vpack.c.b16 %v1037_v28, %v1036_v6  ;;  %v1034_v41 = vunpack.c.l.b16 %v930_v3  ;;  %v1111_v40 = vunpack.c.l.b16 %v955_v31  ;;  %v1149_v6 = vld [vmem:[#allocation5 + $0x10] sm:$0xff] }
 0x2f9   : > { %1070 = vmatpush.bf16.msrb.mxu2 %v1053_v12  ;;  %v984_v59 = vadd.f32 %v983_v51, %v982_v20  ;;  %v997_v7 = vadd.f32 %v2241_v53, %v996_v33  ;;  %1134 = vmatpush.bf16.msrb.mxu3 %v1125_v54  ;;  %v1035_v12 = vunpack.c.l.b16 %v931_v4  ;;  %v1110_v53 = vunpack.c.l.b16 %v954_v9  ;;  %v963_v33 = vld [vmem:[#allocation4 + $0x1] sm:$0x1] }
 0x2fa   : > { %v952_v42 = vpack.c.bf16 %v3060_v36, %v3060_v36  ;;  %v1123_v26 = vpack.c.b16 %v1113_v63, %v1112_v18  ;;  %v950_v23 = vpack.c.bf16 %v3047_v52, %v3047_v52  ;;  %v823_v45 = vsub.f32 %v2950_v1, %v2960_v43 }
 0x2fb   : > { %v998_v21 = vadd.f32 %v2243_v58, %v997_v7  ;;  %v985_v56 = vrot.slane %v984_v59, 1  ;;  %v953_v58 = vpack.c.bf16 %v3066_v37, %v3066_v37  ;;  %v1050_v15 = vpack.c.b16 %v1035_v12, %v1034_v41 }
 0x2fc   : > { %v1122_v20 = vpack.c.b16 %v1111_v40, %v1110_v53  ;;  %v1108_v11 = vunpack.c.l.b16 %v952_v42  ;;  %v951_v37 = vpack.c.bf16 %v3053_v57, %v3053_v57  ;;  %v1106_v49 = vunpack.c.l.b16 %v950_v23 }
 0x2fd   : > { %1071 = vmatpush.bf16.msrb.mxu2 %v1052_v35  ;;  %v999_v39 = vadd.f32 %v2245_v62, %v998_v21  ;;  %1135 = vmatpush.bf16.msrb.mxu3 %v1124_v38  ;;  %v986_v10 = vadd.f32 %v985_v56, %v984_v59  ;;  %v1109_v29 = vunpack.c.l.b16 %v953_v58  ;;  %v948_v52 = vpack.c.bf16 %v3040_v47, %v3040_v47  ;;  %v1150_v21 = vld [vmem:[#allocation5] sm:$0xff] }
 0x2fe   : > { %v2253_v13 = vpop.eup %2252  ;;  %v949_v51 = vpack.c.bf16 %v3044_v0, %v3044_v0  ;;  %v1107_v16 = vunpack.c.l.b16 %v951_v37  ;;  %v826_v55 = vmul.f32 1.442695, %v823_v45  ;;  %v946_v1 = vpack.c.bf16 %v3036_v19, %v3036_v19 }
 0x2ff   : > { %v1000_v2 = vadd.f32 %v2247_v5, %v999_v39  ;;  %v964_v36 = vmul.f32 %v2253_v13, %v962_v61  ;;  %v1121_v25 = vpack.c.b16 %v1109_v29, %v1108_v11  ;;  %v1104_v46 = vunpack.c.l.b16 %v948_v52  ;;  %v1151_v39 = vld [vmem:[#allocation5 + $0x18] sm:$0xff] }
 0x300   : > { %v1120_v43 = vpack.c.b16 %v1107_v16, %v1106_v49  ;;  %v1105_v60 = vunpack.c.l.b16 %v949_v51  ;;  %v947_v47 = vpack.c.bf16 %v3038_v27, %v3038_v27  ;;  %2254 = vpow2.f32 %v826_v55  ;;  %v1148_v27 = vld [vmem:[#allocation5 + $0x8] sm:$0xff] }
 0x301   : > { %1072 = vmatpush.bf16.msrb.mxu2 %v1051_v22  ;;  %v1001_v62 = vadd.f32 %v2249_v17, %v1000_v2  ;;  %1136 = vmatpush.bf16.msrb.mxu3 %v1123_v26  ;;  %v1008_v17 = vadd.f32 %v986_v10, %v964_v36  ;;  %v1102_v8 = vunpack.c.l.b16 %v946_v1  ;;  %v1154_v3 = vperm.slane %v2253_v13, 0 }
 0x302   : > { %v1119_v32 = vpack.c.b16 %v1105_v60, %v1104_v46  ;;  %v1103_v14 = vunpack.c.l.b16 %v947_v47 }
 0x303   : > { %v1002_v5 = vrot.slane %v1001_v62, 4  ;;  %1010 = vst [vmem:[#allocation4] sm:$0x1] %v1008_v17  ;;  %v1158_v4 = vmul.f32 %v1154_v3, %v1148_v27  ;;  %v1159_v28 = vmul.f32 %v1154_v3, %v1149_v6 }
 0x304   : > { %v1118_v34 = vpack.c.b16 %v1103_v14, %v1102_v8 }
 0x305   : > { %1073 = vmatpush.bf16.msrb.mxu2 %v1050_v15  ;;  %v1003_v30 = vadd.f32 %v1002_v5, %v1001_v62  ;;  %1137 = vmatpush.bf16.msrb.mxu3 %v1122_v20 }
 0x306   : > { %v2255_v50 = vpop.eup %2254 }
 0x307   : > { %v1004_v44 = vrot.slane %v1003_v30, 2  ;;  %v965_v59 = vmul.f32 %v2255_v50, %v963_v33  ;;  %v1155_v31 = vperm.slane %v2255_v50, 0 }
 0x308   : > { %1074 = vmatmul.bf16.vlgmr.msrb.gmra.mxu2 %v1993_v24 }
 0x309   : > { %1138 = vmatpush.bf16.msrb.mxu3 %v1121_v25  ;;  %v1005_v57 = vadd.f32 %v1004_v44, %v1003_v30  ;;  %v1160_v38 = vmul.f32 %v1155_v31, %v1150_v21  ;;  %v1161_v22 = vmul.f32 %v1155_v31, %v1151_v39 }
 0x30b   : > { %v1006_v0 = vrot.slane %v1005_v57, 1 }
 0x30d   : > { %1139 = vmatpush.bf16.msrb.mxu3 %v1120_v43  ;;  %v1007_v54 = vadd.f32 %v1006_v0, %v1005_v57 }
 0x30f   : > { %v1009_v19 = vadd.f32 %v1007_v54, %v965_v59 }
 0x311   : > { %1140 = vmatpush.bf16.msrb.mxu3 %v1119_v32  ;;  %1011 = vst [vmem:[#allocation4 + $0x1] sm:$0x1] %v1009_v19 }
 0x315   : > { %1141 = vmatpush.bf16.msrb.mxu3 %v1118_v34 }
 0x318   : > { %1142 = vmatmul.bf16.vlgmr.msrb.gmra.mxu3 %v1994_v48 }
 0x38b   : > { %v1075_v7 = vpop.f32.mrf.mxu2 }
 0x38c   : > { %v1162_v35 = vadd.f32 %v1158_v4, %v1075_v7 }
 0x38e   : > { %1166 = vst [vmem:[#allocation5 + $0x8] sm:$0xff] %v1162_v35 }
 0x393   : > { %v1077_v18 = vpop.f32.mrf.mxu2 }
 0x394   : > { %v1163_v9 = vadd.f32 %v1159_v28, %v1077_v18 }
 0x396   : > { %1167 = vst [vmem:[#allocation5 + $0x10] sm:$0xff] %v1163_v9 }
 0x39b   : > { %v1143_v63 = vpop.f32.mrf.mxu3 }
 0x39c   : > { %v1164_v56 = vadd.f32 %v1160_v38, %v1143_v63 }
 0x39e   : > { %1168 = vst [vmem:[#allocation5] sm:$0xff] %v1164_v56 }
 0x3a2   : > { %1175 = sbr.rel (%p1925_p11) target bundleno = 1652 (0x674), region = 113 }
 0x3a3   : > { %v1145_v41 = vpop.f32.mrf.mxu3 }
 0x3a4   : > { %v1165_v12 = vadd.f32 %v1161_v22, %v1145_v41 }
 0x3a6   : > { %1169 = vst [vmem:[#allocation5 + $0x18] sm:$0xff] %v1165_v12 }
 0x3a7   : > { %v1189_v53 = vld [vmem:[#allocation4 + $0x1] sm:$0x1]  ;;  %v2523_v40 = vmov 0   ;;  %v1188_v42 = vld [vmem:[#allocation4] sm:$0x1]  ;;  %v3119_v2 = vld [vmem:[%s3375_s13] sm:$0xff] }
 0x3a8   : > { %2269 = vrcp.f32 %v1189_v53  ;;  %2256 = vset.pattern.permute.xlu0 %v2523_v40  ;;  %2257 = vset.pattern.permute.xlu1 %v2523_v40  ;;  %vm1209_vm2 = vweird.f32 %v1189_v53  ;;  %v1215_v10 = vand.u32 2147483648, %v1189_v53  ;;  %v1213_v62 = vand.u32 2147483647, %v1189_v53  ;;  %v3133_v30 = vld [vmem:[%s3376_s21 + $0x10] sm:$0xff]  ;;  %v3138_v49 = vld [vmem:[%s3376_s21 + $0x8] sm:$0xff]  ;;  %v1184_v1 = vld [vmem:[#allocation5 + $0x8] sm:$0xff] }
 0x3a9   : > { %2271 = vrcp.f32 %v1188_v42  ;;  %1236 = vperm.xlu0 %2256, %v3119_v2   ;;  %vm1195_vm4 = vweird.f32 %v1188_v42  ;;  %v1201_v20 = vand.u32 2147483648, %v1188_v42  ;;  %v1199_v24 = vand.u32 2147483647, %v1188_v42  ;;  %1246 = vperm.xlu1 %2257, %v3133_v30   ;;  %v1186_v44 = vld [vmem:[#allocation5] sm:$0xff]  ;;  %v1185_v43 = vld [vmem:[#allocation5 + $0x10] sm:$0xff]  ;;  %v1177_v18 = vld [vmem:[%s2781_s6 + $0x8] sm:$0xff] }
 0x3aa   : > { %v1216_v5 = vor.u32 1.1754944e-38, %v1215_v10  ;;  %vm1214_vm7 = vcmp.eq.f32.partialorder %v1213_v62, 8.507059e+37  ;;  %v2524_v55 = vmov 1   ;;  %v3150_v8 = vld [vmem:[%s3376_s21 + $0x18] sm:$0xff]  ;;  %v2525_v34 = vmov 2   ;;  %v1997_v48 = vld [vmem:[%s3381_s18] sm:$0xff] }
 0x3ab   : > { %v1202_v17 = vor.u32 1.1754944e-38, %v1201_v20  ;;  %vm1200_vm9 = vcmp.eq.f32.partialorder %v1199_v24, 8.507059e+37  ;;  %2258 = vset.pattern.permute.xlu2 %v2524_v55  ;;  %vm1264_vm10 = vcmask 261120   ;;  %v1998_v59 = vld [vmem:[%s3381_s18 + $0x8] sm:$0xff]  ;;  %v2526_v35 = vmov 32.0   ;;  %v1176_v21 = vld [vmem:[%s2781_s6] sm:$0xff] }
 0x3ac   : > { %1353 = vperm.xlu2 %2258, %v3133_v30   ;;  %2273 = vrcp.f32 %v2526_v35  ;;  %v1178_v38 = vld [vmem:[%s2781_s6 + $0x10] sm:$0xff]  ;;  %v1179_v12 = vld [vmem:[%s2781_s6 + $0x18] sm:$0xff] }
 0x3ad   : > { %v1187_v25 = vld [vmem:[#allocation5 + $0x18] sm:$0xff] }
 0x3ae   : > { %v2270_v26 = vpop.eup %2269 }
 0x3af   : > { %v1205_v58 = vmul.f32 %v2270_v26, %v1189_v53  ;;  %v2272_v61 = vpop.eup %2271  ;;  %vm1210_vm3 = vweird.f32 %v2270_v26 }
 0x3b0   : > { %v1191_v15 = vmul.f32 %v2272_v61, %v1188_v42  ;;  %vm1196_vm5 = vweird.f32 %v2272_v61  ;;  %vm3122_vm6 = vmor %vm1209_vm2, %vm1210_vm3 }
 0x3b1   : > { %v1206_v13 = vsub.f32 1.0, %v1205_v58  ;;  %vm3126_vm8 = vmor %vm1195_vm4, %vm1196_vm5  ;;  %1241 = vperm.xlu0 %2256, %v3138_v49   ;;  %1251 = vperm.xlu1 %2257, %v3150_v8  }
 0x3b2   : > { %v1192_v23 = vsub.f32 1.0, %v1191_v15  ;;  %v2274_v63 = vpop.eup %2273 }
 0x3b3   : > { %v1207_v11 = vmul.f32 %v2270_v26, %v1206_v13  ;;  %v1304_v40 = vmul.f32 32.0, %v2274_v63  ;;  %vm1308_vm11 = vweird.f32 %v2274_v63 }
 0x3b4   : > { %v1193_v37 = vmul.f32 %v2272_v61, %v1192_v23  ;;  %1357 = vperm.xlu2 %2258, %v3150_v8  }
 0x3b5   : > { %v1208_v29 = vadd.f32 %v2270_v26, %v1207_v11  ;;  %v1305_v10 = vsub.f32 1.0, %v1304_v40 }
 0x3b6   : > { %v1194_v51 = vadd.f32 %v2272_v61, %v1193_v37 }
 0x3b7   : > { %v1212_v52 = vsel %vm3122_vm6, %v2270_v26, %v1208_v29  ;;  %v1306_v15 = vmul.f32 %v2274_v63, %v1305_v10  ;;  %v2003_v10 = vld [vmem:[%s3382_s24 + $0x20] sm:$0xff] }
 0x3b8   : > { %v1217_v16 = vsel %vm1214_vm7, %v1216_v5, %v1212_v52  ;;  %v1198_v46 = vsel %vm3126_vm8, %v2272_v61, %v1194_v51 }
 0x3b9   : > { %v1221_v57 = vperm.slane %v1217_v16, 0  ;;  %v1203_v60 = vsel %vm1200_vm9, %v1202_v17, %v1198_v46  ;;  %2259 = vset.pattern.permute.xlu0 %v2525_v34  ;;  %2260 = vset.pattern.permute.xlu1 %v2525_v34  ;;  %v1307_v23 = vadd.f32 %v2274_v63, %v1306_v15  ;;  %v2000_v15 = vld [vmem:[%s3382_s24 + $0x8] sm:$0xff] }
 0x3ba   : > { %v1220_v32 = vperm.slane %v1203_v60, 0  ;;  %1373 = vperm.xlu0 %2259, %v3133_v30   ;;  %1377 = vperm.xlu1 %2260, %v3150_v8  }
 0x3bb   : > { %v1226_v47 = vmul.f32 %v1221_v57, %v1186_v44  ;;  %v1227_v0 = vmul.f32 %v1221_v57, %v1187_v25  ;;  %v3172_v5 = vsel %vm1308_vm11, %v2274_v63, %v1307_v23  ;;  %v2006_v23 = vld [vmem:[%s3382_s24 + $0x38] sm:$0xff] }
 0x3bc   : > { %v1224_v50 = vmul.f32 %v1220_v32, %v1184_v1  ;;  %v1225_v33 = vmul.f32 %v1220_v32, %v1185_v43  ;;  %1345 = vperm.xlu2 %2258, %v3119_v2  }
 0x3bd   : > { %v1233_v14 = vpack.c.bf16 %v1227_v0, %v1226_v47 }
 0x3be   : > { %v1232_v54 = vpack.c.bf16 %v1225_v33, %v1224_v50 }
 0x3bf   : > { %1277 = vmatpush.bf16.msra.mxu0 %v1233_v14 }
 0x3c2   : > { %1369 = vperm.xlu0 %2259, %v3138_v49   ;;  %2261 = vset.pattern.permute.xlu1 %v2524_v55 }
 0x3c3   : > { %1278 = vmatpush.bf16.msra.mxu0 %v1232_v54  ;;  %1349 = vperm.xlu1 %2261, %v3138_v49  }
 0x3c4   : > { %2262 = vset.pattern.permute.xlu2 %v2525_v34 }
 0x3c5   : > { %1365 = vperm.xlu2 %2262, %v3119_v2  }
 0x3c6   : > { %1934 = vmatmul.msk.bf16.vlgmr.msra.gmra.mxu0 %vm1264_vm10, %v1997_v48 }
 0x3d6   : > { %1935 = vmatmul.msk.bf16.gmra.mxu0 %vm1264_vm10, %v1998_v59 }
 0x406   : > { %v1354_v14 = vpop.permute.xlu2 %1353 }
 0x40e   : > { %v1358_v34 = vpop.permute.xlu2 %1357 }
 0x41b   : > { %v1237_v3 = vpop.permute.xlu0 %1236  ;;  %v1247_v4 = vpop.permute.xlu1 %1246 }
 0x423   : > { %v1242_v7 = vpop.permute.xlu0 %1241  ;;  %v1252_v41 = vpop.permute.xlu1 %1251 }
 0x42c   : > { %v1374_v35 = vpop.permute.xlu0 %1373 }
 0x434   : > { %v1370_v40 = vpop.permute.xlu0 %1369 }
 0x443   : > { %v1280_v19 = vpop.f32.mrf.mxu0 }
 0x444   : > { %v1281_v9 = vadd.f32 %v1280_v19, %v1237_v3  ;;  %v1378_v19 = vpop.permute.xlu1 %1377 }
 0x446   : > { %v1290_v39 = vadd.f32 %v1281_v9, %v1176_v21 }
 0x44b   : > { %v1282_v27 = vpop.f32.mrf.mxu0 }
 0x44c   : > { %v1283_v28 = vadd.f32 %v1282_v27, %v1242_v7  ;;  %v1346_v7 = vpop.permute.xlu2 %1345 }
 0x44e   : > { %v1291_v56 = vadd.f32 %v1283_v28, %v1177_v18  ;;  %v1350_v18 = vpop.permute.xlu1 %1349 }
 0x450   : > { %v1294_v42 = vadd.f32 %v1291_v56, %v1290_v39 }
 0x453   : > { %v1285_v6 = vpop.f32.mrf.mxu0 }
 0x454   : > { %v1286_v31 = vadd.f32 %v1285_v6, %v1247_v4 }
 0x456   : > { %v1292_v22 = vadd.f32 %v1286_v31, %v1178_v38 }
 0x458   : > { %v1295_v58 = vadd.f32 %v1294_v42, %v1292_v22 }
 0x45b   : > { %v1287_v53 = vpop.f32.mrf.mxu0 }
 0x45c   : > { %v1288_v26 = vadd.f32 %v1287_v53, %v1252_v41  ;;  %v1366_v41 = vpop.permute.xlu2 %1365 }
 0x45e   : > { %v1293_v61 = vadd.f32 %v1288_v26, %v1179_v12 }
 0x460   : > { %v1296_v13 = vadd.f32 %v1295_v58, %v1293_v61 }
 0x462   : > { %v1297_v62 = vrot.slane %v1296_v13, 4 }
 0x464   : > { %v1298_v20 = vadd.f32 %v1297_v62, %v1296_v13  ;;  %v1999_v13 = vld [vmem:[%s3382_s24] sm:$0xff]  ;;  %v2004_v62 = vld [vmem:[%s3382_s24 + $0x28] sm:$0xff] }
 0x466   : > { %v1299_v11 = vrot.slane %v1298_v20, 2 }
 0x468   : > { %v1300_v24 = vadd.f32 %v1299_v11, %v1298_v20  ;;  %v2005_v20 = vld [vmem:[%s3382_s24 + $0x30] sm:$0xff] }
 0x469   : > { %v2001_v11 = vld [vmem:[%s3382_s24 + $0x10] sm:$0xff] }
 0x46a   : > { %v1301_v36 = vrot.slane %v1300_v24, 1 }
 0x46c   : > { %v1302_v29 = vadd.f32 %v1301_v36, %v1300_v24  ;;  %v2002_v24 = vld [vmem:[%s3382_s24 + $0x18] sm:$0xff] }
 0x46e   : > { %v1310_v37 = vmul.f32 %v3172_v5, %v1302_v29 }
 0x470   : > { %v1311_v45 = vsub.f32 %v1290_v39, %v1310_v37  ;;  %v1312_v17 = vsub.f32 %v1291_v56, %v1310_v37  ;;  %v1313_v52 = vsub.f32 %v1292_v22, %v1310_v37  ;;  %v1314_v51 = vsub.f32 %v1293_v61, %v1310_v37 }
 0x472   : > { %v1315_v44 = vmul.f32 %v1311_v45, %v1311_v45  ;;  %v1316_v25 = vmul.f32 %v1312_v17, %v1312_v17  ;;  %v1317_v16 = vmul.f32 %v1313_v52, %v1313_v52  ;;  %v1318_v57 = vmul.f32 %v1314_v51, %v1314_v51 }
 0x474   : > { %v1319_v55 = vadd.f32 %v1316_v25, %v1315_v44 }
 0x476   : > { %v1320_v46 = vadd.f32 %v1319_v55, %v1317_v16 }
 0x478   : > { %v1321_v1 = vadd.f32 %v1320_v46, %v1318_v57 }
 0x47a   : > { %v1322_v43 = vrot.slane %v1321_v1, 4 }
 0x47c   : > { %v1323_v60 = vadd.f32 %v1322_v43, %v1321_v1 }
 0x47e   : > { %v1324_v47 = vrot.slane %v1323_v60, 2 }
 0x480   : > { %v1325_v0 = vadd.f32 %v1324_v47, %v1323_v60 }
 0x482   : > { %v1326_v32 = vrot.slane %v1325_v0, 1 }
 0x484   : > { %v1327_v50 = vadd.f32 %v1326_v32, %v1325_v0 }
 0x486   : > { %v1328_v33 = vmul.f32 %v1327_v50, %v3172_v5 }
 0x488   : > { %v1329_v54 = vadd.f32 1e-06, %v1328_v33 }
 0x48a   : > { %2275 = vrsqrt.f32 %v1329_v54  ;;  %vm1336_vm13 = vweird.f32 %v1329_v54 }
 0x490   : > { %v2276_v48 = vpop.eup %2275 }
 0x491   : > { %v1331_v59 = vmul.f32 %v2276_v48, %v1329_v54  ;;  %vm1337_vm12 = vweird.f32 %v2276_v48 }
 0x492   : > { %vm1338_vm14 = vmor %vm1336_vm13, %vm1337_vm12 }
 0x493   : > { %v1332_v3 = vmul.f32 %v2276_v48, %v1331_v59 }
 0x495   : > { %v1333_v27 = vmul.f32 0.5, %v1332_v3 }
 0x497   : > { %v1334_v4 = vsub.f32 1.5, %v1333_v27 }
 0x499   : > { %v1335_v6 = vmul.f32 %v2276_v48, %v1334_v4 }
 0x49b   : > { %v1339_v28 = vsel %vm1338_vm14, %v2276_v48, %v1335_v6 }
 0x49c   : > { %v1342_v9 = vmul.f32 %v1339_v28, %v1313_v52  ;;  %v1343_v31 = vmul.f32 %v1339_v28, %v1314_v51  ;;  %v1340_v21 = vmul.f32 %v1339_v28, %v1311_v45  ;;  %v1341_v38 = vmul.f32 %v1339_v28, %v1312_v17 }
 0x49e   : > { %v1362_v63 = vmul.f32 %v1354_v14, %v1342_v9  ;;  %v1363_v56 = vmul.f32 %v1358_v34, %v1343_v31  ;;  %v1360_v39 = vmul.f32 %v1346_v7, %v1340_v21  ;;  %v1361_v22 = vmul.f32 %v1350_v18, %v1341_v38 }
 0x4a0   : > { %v3176_v12 = vadd.f32 %v1374_v35, %v1362_v63  ;;  %v3178_v53 = vadd.f32 %v1378_v19, %v1363_v56  ;;  %v3180_v42 = vadd.f32 %v1370_v40, %v1361_v22  ;;  %v3182_v26 = vadd.f32 %v1366_v41, %v1360_v39 }
 0x4a2   : > { %v1401_v58 = vpack.c.bf16 %v3178_v53, %v3176_v12  ;;  %v1400_v61 = vpack.c.bf16 %v3180_v42, %v3182_v26 }
 0x4a4   : > { %1472 = vmatpush.bf16.msra.mxu1 %v1401_v58  ;;  %2024 = vmatpush.bf16.msra.mxu3 %v1401_v58 }
 0x4a8   : > { %1473 = vmatpush.bf16.msra.mxu1 %v1400_v61  ;;  %2025 = vmatpush.bf16.msra.mxu3 %v1400_v61 }
 0x4ab   : > { %1972 = vmatmul.msk.bf16.vlgmr.msra.gmra.mxu3 %vm1264_vm10, %v2003_v10  ;;  %1968 = vmatmul.msk.bf16.vlgmr.msra.gmra.mxu1 %vm1264_vm10, %v1999_v13  ;;  %v2527_v10 = vmov 3  }
 0x4ac   : > { %2263 = vset.pattern.permute.xlu1 %v2527_v10  ;;  %2265 = vset.pattern.permute.xlu0 %v2527_v10 }
 0x4ad   : > { %1646 = vperm.xlu1 %2263, %v3119_v2   ;;  %1654 = vperm.xlu0 %2265, %v3133_v30  }
 0x4ae   : > { %2264 = vset.pattern.permute.xlu2 %v2527_v10 }
 0x4af   : > { %1650 = vperm.xlu2 %2264, %v3138_v49  }
 0x4b5   : > { %1658 = vperm.xlu1 %2263, %v3150_v8  }
 0x4bb   : > { %1973 = vmatmul.msk.bf16.gmra.mxu3 %vm1264_vm10, %v2004_v62  ;;  %1969 = vmatmul.msk.bf16.gmra.mxu1 %vm1264_vm10, %v2000_v15 }
 0x4cb   : > { %1974 = vmatmul.msk.bf16.gmra.mxu3 %vm1264_vm10, %v2005_v20  ;;  %1970 = vmatmul.msk.bf16.gmra.mxu1 %vm1264_vm10, %v2001_v11 }
 0x4db   : > { %1975 = vmatmul.msk.bf16.gmra.mxu3 %vm1264_vm10, %v2006_v23  ;;  %1971 = vmatmul.msk.bf16.gmra.mxu1 %vm1264_vm10, %v2002_v24 }
 0x51f   : > { %v1655_v10 = vpop.permute.xlu0 %1654 }
 0x528   : > { %v3220_v36 = vpop.f32.mrf.mxu1 }
 0x529   : > { %v1515_v13 = vmax.f32 %v3220_v36, 0.0 }
 0x52b   : > { %v1531_v23 = vmin.f32 %v1515_v13, 6.0 }
 0x52e   : > { %v1495_v29 = vpop.f32.mrf.mxu3 }
 0x52f   : > { %v1523_v4 = vmax.f32 %v1495_v29, 0.0 }
 0x530   : > { %v3222_v37 = vpop.f32.mrf.mxu1 }
 0x531   : > { %v1539_v31 = vmin.f32 %v1523_v4, 6.0  ;;  %v1516_v62 = vmax.f32 %v3222_v37, 0.0  ;;  %v2008_v37 = vld [vmem:[#allocation12 + $0x8] sm:$0xff] }
 0x533   : > { %v1532_v24 = vmin.f32 %v1516_v62, 6.0 }
 0x535   : > { %v1551_v36 = vpack.c.bf16 %v1532_v24, %v1531_v23 }
 0x536   : > { %v1497_v45 = vpop.f32.mrf.mxu3 }
 0x537   : > { %v1524_v19 = vmax.f32 %v1497_v45, 0.0  ;;  %v2528_v45 = vmov 4  }
 0x538   : > { %v1480_v52 = vpop.f32.mrf.mxu1  ;;  %2268 = vset.pattern.permute.xlu0 %v2528_v45  ;;  %2266 = vset.pattern.permute.xlu2 %v2528_v45 }
 0x539   : > { %v1540_v6 = vmin.f32 %v1524_v19, 6.0  ;;  %v1517_v22 = vmax.f32 %v1480_v52, 0.0  ;;  %1678 = vperm.xlu0 %2268, %v3150_v8   ;;  %1666 = vperm.xlu2 %2266, %v3119_v2  }
 0x53a   : > { %2267 = vset.pattern.permute.xlu1 %v2528_v45 }
 0x53b   : > { %v1555_v21 = vpack.c.bf16 %v1540_v6, %v1539_v31  ;;  %v1533_v15 = vmin.f32 %v1517_v22, 6.0  ;;  %1670 = vperm.xlu1 %2267, %v3138_v49   ;;  %v1647_v22 = vpop.permute.xlu1 %1646 }
 0x53e   : > { %v1500_v17 = vpop.f32.mrf.mxu3 }
 0x53f   : > { %v1525_v48 = vmax.f32 %v1500_v17, 0.0  ;;  %v2007_v17 = vld [vmem:[#allocation12] sm:$0xff] }
 0x540   : > { %v1482_v44 = vpop.f32.mrf.mxu1 }
 0x541   : > { %v1541_v35 = vmin.f32 %v1525_v48, 6.0  ;;  %v1518_v41 = vmax.f32 %v1482_v44, 0.0  ;;  %1674 = vperm.xlu2 %2266, %v3133_v30  }
 0x543   : > { %v1534_v20 = vmin.f32 %v1518_v41, 6.0  ;;  %v1651_v41 = vpop.permute.xlu2 %1650  ;;  %v1659_v62 = vpop.permute.xlu1 %1658 }
 0x545   : > { %v1552_v29 = vpack.c.bf16 %v1534_v20, %v1533_v15 }
 0x546   : > { %v1502_v51 = vpop.f32.mrf.mxu3 }
 0x547   : > { %v1526_v33 = vmax.f32 %v1502_v51, 0.0 }
 0x548   : > { %v1485_v16 = vpop.f32.mrf.mxu1 }
 0x549   : > { %v1542_v3 = vmin.f32 %v1526_v33, 6.0  ;;  %v1519_v38 = vmax.f32 %v1485_v16, 0.0 }
 0x54b   : > { %v1556_v9 = vpack.c.bf16 %v1542_v3, %v1541_v35  ;;  %v1535_v40 = vmin.f32 %v1519_v38, 6.0 }
 0x54e   : > { %v1505_v25 = vpop.f32.mrf.mxu3 }
 0x54f   : > { %v1527_v32 = vmax.f32 %v1505_v25, 0.0 }
 0x550   : > { %v1487_v57 = vpop.f32.mrf.mxu1 }
 0x551   : > { %v1543_v59 = vmin.f32 %v1527_v32, 6.0  ;;  %v1520_v63 = vmax.f32 %v1487_v57, 0.0 }
 0x553   : > { %v1536_v58 = vmin.f32 %v1520_v63, 6.0 }
 0x555   : > { %v1553_v11 = vpack.c.bf16 %v1536_v58, %v1535_v40 }
 0x556   : > { %v1507_v55 = vpop.f32.mrf.mxu3 }
 0x557   : > { %v1528_v47 = vmax.f32 %v1507_v55, 0.0 }
 0x558   : > { %v1490_v43 = vpop.f32.mrf.mxu1 }
 0x559   : > { %v1544_v54 = vmin.f32 %v1528_v47, 6.0  ;;  %v1521_v28 = vmax.f32 %v1490_v43, 0.0 }
 0x55b   : > { %v1557_v27 = vpack.c.bf16 %v1544_v54, %v1543_v59  ;;  %v1537_v56 = vmin.f32 %v1521_v28, 6.0 }
 0x55e   : > { %v1510_v46 = vpop.f32.mrf.mxu3 }
 0x55f   : > { %v1529_v1 = vmax.f32 %v1510_v46, 0.0 }
 0x560   : > { %v1492_v7 = vpop.f32.mrf.mxu1 }
 0x561   : > { %v1545_v14 = vmin.f32 %v1529_v1, 6.0  ;;  %v1522_v18 = vmax.f32 %v1492_v7, 0.0 }
 0x563   : > { %v1538_v39 = vmin.f32 %v1522_v18, 6.0 }
 0x565   : > { %v1554_v61 = vpack.c.bf16 %v1538_v39, %v1537_v56 }
 0x566   : > { %v1512_v60 = vpop.f32.mrf.mxu3 }
 0x567   : > { %v1530_v0 = vmax.f32 %v1512_v60, 0.0 }
 0x569   : > { %v1546_v50 = vmin.f32 %v1530_v0, 6.0 }
 0x56b   : > { %v1558_v34 = vpack.c.bf16 %v1546_v50, %v1545_v14 }
 0x56d   : > { %1571 = vmatpush.bf16.msra.mxu2 %v1558_v34 }
 0x571   : > { %1572 = vmatpush.bf16.msra.mxu2 %v1557_v27 }
 0x575   : > { %1573 = vmatpush.bf16.msra.mxu2 %v1556_v9 }
 0x579   : > { %1574 = vmatpush.bf16.msra.mxu2 %v1555_v21 }
 0x57d   : > { %1575 = vmatpush.bf16.msra.mxu2 %v1554_v61 }
 0x581   : > { %1576 = vmatpush.bf16.msra.mxu2 %v1553_v11 }
 0x585   : > { %1577 = vmatpush.bf16.msra.mxu2 %v1552_v29 }
 0x589   : > { %1578 = vmatpush.bf16.msra.mxu2 %v1551_v36 }
 0x58c   : > { %1579 = vmatmul.bf16.vlgmr.msra.gmra.mxu2 %v2007_v17 }
 0x593   : > { %v1667_v15 = vpop.permute.xlu2 %1666 }
 0x59c   : > { %1584 = vmatmul.bf16.gmra.mxu2 %v2008_v37 }
 0x5ad   : > { %v1671_v45 = vpop.permute.xlu1 %1670 }
 0x60f   : > { %v1580_v52 = vpop.f32.mrf.mxu2 }
 0x610   : > { %v1590_v16 = vmax.f32 %v1580_v52, 0.0 }
 0x612   : > { %v1594_v8 = vmin.f32 %v1590_v16, 6.0 }
 0x614   : > { %v1598_v43 = vadd.f32 %v1594_v8, %v3182_v26 }
 0x617   : > { %v1582_v51 = vpop.f32.mrf.mxu2 }
 0x618   : > { %v1591_v44 = vmax.f32 %v1582_v51, 0.0 }
 0x61a   : > { %v1595_v57 = vmin.f32 %v1591_v44, 6.0  ;;  %v1679_v44 = vpop.permute.xlu0 %1678 }
 0x61c   : > { %v1599_v1 = vadd.f32 %v1595_v57, %v3180_v42 }
 0x61e   : > { %v1602_v30 = vadd.f32 %v1599_v1, %v1598_v43 }
 0x61f   : > { %v1585_v25 = vpop.f32.mrf.mxu2 }
 0x620   : > { %v1592_v55 = vmax.f32 %v1585_v25, 0.0  ;;  %v1675_v25 = vpop.permute.xlu2 %1674 }
 0x622   : > { %v1596_v46 = vmin.f32 %v1592_v55, 6.0 }
 0x624   : > { %v1600_v49 = vadd.f32 %v1596_v46, %v3176_v12 }
 0x626   : > { %v1603_v0 = vadd.f32 %v1602_v30, %v1600_v49 }
 0x627   : > { %v1587_v2 = vpop.f32.mrf.mxu2 }
 0x628   : > { %v1593_v60 = vmax.f32 %v1587_v2, 0.0 }
 0x62a   : > { %v1597_v47 = vmin.f32 %v1593_v60, 6.0 }
 0x62c   : > { %v1601_v32 = vadd.f32 %v1597_v47, %v3178_v53 }
 0x62e   : > { %v1604_v14 = vadd.f32 %v1603_v0, %v1601_v32 }
 0x630   : > { %v1605_v50 = vrot.slane %v1604_v14, 4 }
 0x632   : > { %v1606_v33 = vadd.f32 %v1605_v50, %v1604_v14 }
 0x634   : > { %v1607_v54 = vrot.slane %v1606_v33, 2 }
 0x636   : > { %v1608_v34 = vadd.f32 %v1607_v54, %v1606_v33 }
 0x638   : > { %v1609_v48 = vrot.slane %v1608_v34, 1 }
 0x63a   : > { %v1610_v59 = vadd.f32 %v1609_v48, %v1608_v34 }
 0x63c   : > { %v1611_v42 = vmul.f32 %v1610_v59, %v3172_v5 }
 0x63e   : > { %v1613_v19 = vsub.f32 %v1599_v1, %v1611_v42  ;;  %v1614_v3 = vsub.f32 %v1600_v49, %v1611_v42  ;;  %v1612_v26 = vsub.f32 %v1598_v43, %v1611_v42  ;;  %v1615_v27 = vsub.f32 %v1601_v32, %v1611_v42 }
 0x640   : > { %v1616_v12 = vmul.f32 %v1612_v26, %v1612_v26  ;;  %v1617_v4 = vmul.f32 %v1613_v19, %v1613_v19  ;;  %v1618_v7 = vmul.f32 %v1614_v3, %v1614_v3  ;;  %v1619_v6 = vmul.f32 %v1615_v27, %v1615_v27 }
 0x642   : > { %v1620_v35 = vadd.f32 %v1617_v4, %v1616_v12 }
 0x644   : > { %v1621_v28 = vadd.f32 %v1620_v35, %v1618_v7 }
 0x646   : > { %v1622_v53 = vadd.f32 %v1621_v28, %v1619_v6 }
 0x648   : > { %v1623_v18 = vrot.slane %v1622_v53, 4 }
 0x64a   : > { %v1624_v9 = vadd.f32 %v1623_v18, %v1622_v53 }
 0x64c   : > { %v1625_v31 = vrot.slane %v1624_v9, 2 }
 0x64e   : > { %v1626_v21 = vadd.f32 %v1625_v31, %v1624_v9 }
 0x650   : > { %v1627_v38 = vrot.slane %v1626_v21, 1 }
 0x652   : > { %v1628_v63 = vadd.f32 %v1627_v38, %v1626_v21 }
 0x654   : > { %v1629_v56 = vmul.f32 %v1628_v63, %v3172_v5 }
 0x656   : > { %v1630_v39 = vadd.f32 1e-06, %v1629_v56 }
 0x658   : > { %2277 = vrsqrt.f32 %v1630_v39  ;;  %vm1637_vm0 = vweird.f32 %v1630_v39 }
 0x65e   : > { %v2278_v40 = vpop.eup %2277 }
 0x65f   : > { %v1632_v58 = vmul.f32 %v2278_v40, %v1630_v39  ;;  %vm1638_vm15 = vweird.f32 %v2278_v40 }
 0x660   : > { %vm1639_vm1 = vmor %vm1637_vm0, %vm1638_vm15 }
 0x661   : > { %v1633_v61 = vmul.f32 %v2278_v40, %v1632_v58 }
 0x663   : > { %v1634_v13 = vmul.f32 0.5, %v1633_v61 }
 0x665   : > { %v1635_v20 = vsub.f32 1.5, %v1634_v13 }
 0x667   : > { %v1636_v11 = vmul.f32 %v2278_v40, %v1635_v20 }
 0x669   : > { %v1640_v23 = vsel %vm1639_vm1, %v2278_v40, %v1636_v11 }
 0x66a   : > { %v1641_v24 = vmul.f32 %v1640_v23, %v1612_v26  ;;  %v1642_v5 = vmul.f32 %v1640_v23, %v1613_v19  ;;  %v1644_v29 = vmul.f32 %v1640_v23, %v1615_v27  ;;  %v1643_v36 = vmul.f32 %v1640_v23, %v1614_v3 }
 0x66c   : > { %v1661_v17 = vmul.f32 %v1647_v22, %v1641_v24  ;;  %v1662_v37 = vmul.f32 %v1651_v41, %v1642_v5  ;;  %v1664_v52 = vmul.f32 %v1659_v62, %v1644_v29  ;;  %v1663_v51 = vmul.f32 %v1655_v10, %v1643_v36 }
 0x66e   : > { %v1681_v16 = vadd.f32 %v1667_v15, %v1661_v17  ;;  %v1683_v55 = vadd.f32 %v1675_v25, %v1663_v51  ;;  %v1682_v57 = vadd.f32 %v1671_v45, %v1662_v37  ;;  %v1684_v8 = vadd.f32 %v1679_v44, %v1664_v52 }
 0x670   : > { %1685 = vst [vmem:[%s2801_s23] sm:$0xff] %v1681_v16 }
 0x671   : > { %1687 = vst [vmem:[%s2801_s23 + $0x10] sm:$0xff] %v1683_v55 }
 0x672   : > { %1686 = vst [vmem:[%s2801_s23 + $0x8] sm:$0xff] %v1682_v57 }
 0x673   : > { %1688 = vst [vmem:[%s2801_s23 + $0x18] sm:$0xff] %v1684_v8 }
 0x674 PF: > { %s3383_s22 = sld [smem:[#allocation21_spill]]  ;;  %s1703_s19 = sshll.u32 %s2801_s23, 4  ;;  %s1704_s19 = int_to_ptr.vmem [resolvable:$true] %s1703_s19 }
 0x675   : > { %s3384_s13 = sld [smem:[#allocation20_spill]]  ;;  %s1690_s8 = scalar_lea.sflag [#allocation8], %s2777_s12 }
 0x676   : > { %s3386_s30 = sld [smem:[#allocation38_spill]] }
 0x67a   : > { %s1985_s25 = sshll.u32 %s3383_s22, 3 }
 0x67b   : > { %s1700_s20 = sadd.s32 %s3384_s13, %s1985_s25 }
 0x67c   : > { %s1986_s26 = sshll.u32 %s1700_s20, 3  ;;  %s3387_s4 = smov %s3386_s30 }
 0x67d   : > { %s1702_s27 = scalar_lea.hbm %s3386_s30, %s1986_s26  ;;  %s2385_s23 = scalar_lea.hbm %s3387_s4, 128 }
 0x67e   : > { %s1705_s6 = sshll.u32 %s1702_s27, 4  ;;  %s1706_s6 = int_to_ptr.hbm [resolvable:$true] %s1705_s6 }
 0x67f   : > { %s2379_s0 = sshra.s32 %s1706_s6, 4  ;;  %s2380_s0 = int_to_ptr.hbm [resolvable:$true] %s2379_s0 }
 0x680   : > { %s2381_s1 = scalar_lea.hbm %s2380_s0, 32  ;;  %p2386_p1 = scmp.lt.s32.totalorder %s2380_s0, %s3387_s4 }
 0x681   : > { %p2382_p12 = scmp.ne.s32.totalorder %s2380_s0, %s2381_s1  ;;  %p2387_p13 = scmp.lt.s32.totalorder %s2385_s23, %s2381_s1 }
 0x683   : > { %p2383_p2 = pnand %p2382_p12, %p2709_p8  ;;  %p2388_p3 = por %p2387_p13, %p2386_p1 }
 0x685   : > { %p2384_p10 = pneg %p2383_p2 }
 0x687   : > { %p2389_p0 = pnand %p2388_p3, %p2384_p10 }
 0x689   : > { %2392 = shalt.err (!%p2389_p0)
}
 0x68a   : > { %s2529_s12 = smov 128   ;;  %s2530_s20 = smov 256  }
 0x68b   : > { %s2531_s26 = smov 8  }
 0x68c   : > { %2034 = dma.vmem_to_hbm [thread:$0]  (%p2709_p8), %s1704_s19, 512, %s1706_s6, %s1690_s8, %s2529_s12, %s2530_s20, %s2531_s26  }
 0x68d PF: > { %s3388_s3 = sld [smem:[#allocation18_spill]]  ;;  %p2046_p4 = scmp.ge.s32.totalorder %s2511_s17, 2 }
 0x68f   : > { %p2041_p5 = pnand %p2046_p4, %p2726_p9 }
 0x691   : > { %p2042_p6 = pneg %p2041_p5 }
 0x693   : > { %s1720_s2 = sand.u32 1, %s3388_s3  }
 0x694   : > { %s1721_s0 = scalar_lea.sflag [#allocation8], %s1720_s2 }
 0x695   : > { %2458 = dma.done.wait (%p2042_p6), %s1721_s0, 512  }
 0x696   : > { %2460 = vsyncadd (%p2042_p6), %s1721_s0, 4294966784  ;;  %s27_s17 = sadd.s32 1, %s2511_s17   ;;  %s3391_s11 = sld [smem:[#allocation28_spill]] }
 0x697   : > { %p3266_p7 = scmp.ge.s32.totalorder %s27_s17, 10   ;;  %s3392_s19 = sld [smem:[#allocation27_spill]] }
 0x698   : > { %s3393_s6 = sld [smem:[#allocation22_spill]]  ;;  %s3396_s27 = smov %s2467_s28 }
 0x699   : > { %s3394_s8 = sld [smem:[#allocation23_spill]]  ;;  %s3397_s28 = smov %s2471_s29 }
 0x69a   : > { %s3395_s22 = sld [smem:[#allocation24_spill]]  ;;  %s3399_s30 = smov %s2479_s9 }
 0x69b   : > { %s3400_s9 = smov %s2483_s10  ;;  %s3403_s12 = smov %s2503_s15 }
 0x69c   : > { %s3398_s29 = smov %s3391_s11  ;;  %s3402_s11 = smov %s2499_s14 }
 0x69d   : > { %s3401_s10 = smov %s3392_s19  ;;  %s3404_s13 = smov %s2507_s16 }
 0x69e   : > { %s3405_s14 = smov %s3393_s6  ;;  %26 = sbr.rel (!%p3266_p7) target bundleno = 22 (0x16), region = 171 }
 0x69f   : > { %s3406_s15 = smov %s3394_s8 }
 0x6a0   : > { %s3407_s16 = smov %s3395_s22 }
 0x6a3   :  { %1727 = vsyncpa [#allocation7], 1 }
 0x6a4   :  { %1729 = vsyncpa [#allocation7 + $0x1], 1 }
 0x6a5   :  { %1730 = vsyncpa [#allocation11], 1 }
 0x6a6   :  { %1732 = vsyncpa [#allocation11 + $0x1], 1 }
 0x6a7   :  { %1733 = vsyncpa [#allocation8], 1 }
 0x6a8   :  { %1735 = vsyncpa [#allocation8 + $0x1], 1 }

</bundles_post_ra>
